<compile_context>
chip_gen: v6e
topology: v6e:2x2x1
jax: 0.10.0
libtpu: 0.0.40
codegen_flags: <defaults>
</compile_context>

<pallas_src>
import functools

import jax
import jax.numpy as jnp
from jax.experimental import pallas as pl
from jax.experimental.pallas import tpu as pltpu

# MXU operand dtype.  All accumulation and all elementwise epilogues are f32.
COMPUTE_DTYPE = jnp.bfloat16


def _round_up(x, m):
    return ((x + m - 1) // m) * m


def _pad2(x, rows, cols):
    r, c = x.shape
    if r == rows and c == cols:
        return x
    return jnp.pad(x, ((0, rows - r), (0, cols - c)))


def _epilogue(y, activation):
    if activation == "relu":
        return jnp.maximum(y, 0.0)
    if activation == "elu":
        return jnp.where(y > 0.0, y, jnp.exp(y) - 1.0)
    return y


# -----------------------------------------------------------------------------
# 1. Tiled matmul + bias + activation  (nn.Linear building block)
# -----------------------------------------------------------------------------
def _matmul_kernel_acc(x_ref, w_ref, b_ref, o_ref, acc_ref, *, activation):
    k = pl.program_id(2)

    @pl.when(k == 0)
    def _():
        acc_ref[...] = jnp.zeros_like(acc_ref)

    # bf16 operands straight to the MXU, f32 accumulation.
    acc_ref[...] += jnp.dot(x_ref[...], w_ref[...],
                            preferred_element_type=jnp.float32)

    @pl.when(k == pl.num_programs(2) - 1)
    def _():
        y = acc_ref[...] + b_ref[...]              # (tm, tn) + (1, tn), f32
        o_ref[...] = _epilogue(y, activation).astype(o_ref.dtype)


def _matmul_kernel_single(x_ref, w_ref, b_ref, o_ref, *, activation):
    # Specialized K-grid == 1 path: no accumulator scratch, no zero-init pass.
    y = jnp.dot(x_ref[...], w_ref[...],
                preferred_element_type=jnp.float32) + b_ref[...]
    o_ref[...] = _epilogue(y, activation).astype(o_ref.dtype)


def linear(x, w, b=None, activation="none", *, tm=128, tn=256, tk=512):
    """y = act(x @ w + b) with a tiled, pipelined Pallas matmul (any 2-D shapes)."""
    M, K = x.shape
    K2, N = w.shape
    assert K == K2
    tm_e = min(tm, _round_up(M, 8))
    tn_e = min(tn, _round_up(N, 128))
    tk_e = min(tk, _round_up(K, 128))
    Mp, Kp, Np = _round_up(M, tm_e), _round_up(K, tk_e), _round_up(N, tn_e)

    xp = _pad2(x, Mp, Kp).astype(COMPUTE_DTYPE)
    wp = _pad2(w, Kp, Np).astype(COMPUTE_DTYPE)
    bvec = jnp.zeros((N,), jnp.float32) if b is None else b.astype(jnp.float32)
    bp = _pad2(bvec.reshape(1, N), 1, Np)

    nk = Kp // tk_e
    if nk == 1:
        out = pl.pallas_call(
            functools.partial(_matmul_kernel_single, activation=activation),
            out_shape=jax.ShapeDtypeStruct((Mp, Np), jnp.float32),
            grid=(Mp // tm_e, Np // tn_e),
            in_specs=[
                pl.BlockSpec((tm_e, Kp), lambda i, j: (i, 0)),
                pl.BlockSpec((Kp, tn_e), lambda i, j: (0, j)),
                pl.BlockSpec((1, tn_e), lambda i, j: (0, j)),
            ],
            out_specs=pl.BlockSpec((tm_e, tn_e), lambda i, j: (i, j)),
            compiler_params=pltpu.CompilerParams(
                dimension_semantics=("parallel", "parallel")),
        )(xp, wp, bp)
    else:
        # NOTE: for real-size gene counts (long K) raise vmem_limit_bytes (v5e default
        # scoped limit is 16 MiB) and use pipeline_mode=pl.Buffered(3) on x/w specs.
        out = pl.pallas_call(
            functools.partial(_matmul_kernel_acc, activation=activation),
            out_shape=jax.ShapeDtypeStruct((Mp, Np), jnp.float32),
            grid=(Mp // tm_e, Np // tn_e, nk),
            in_specs=[
                pl.BlockSpec((tm_e, tk_e), lambda i, j, k: (i, k)),
                pl.BlockSpec((tk_e, tn_e), lambda i, j, k: (k, j)),
                pl.BlockSpec((1, tn_e), lambda i, j, k: (0, j)),
            ],
            out_specs=pl.BlockSpec((tm_e, tn_e), lambda i, j, k: (i, j)),
            scratch_shapes=[pltpu.VMEM((tm_e, tn_e), jnp.float32)],
            compiler_params=pltpu.CompilerParams(
                dimension_semantics=("parallel", "parallel", "arbitrary")),
        )(xp, wp, bp)
    return out[:M, :N]


# -----------------------------------------------------------------------------
# 2. Fused GraphConvolution (p_drop = 0): out_i = relu(adj @ (x_i @ W))
#    Batched over branches that share (adj, W); grid axis = batch ("parallel").
# -----------------------------------------------------------------------------
def _gcn_fused_kernel(x_ref, w_ref, adj_ref, o_ref):
    # support = x @ W stays in VMEM/vregs; it never round-trips HBM.
    support = jnp.dot(x_ref[...], w_ref[...],
                      preferred_element_type=jnp.float32)
    out = jnp.dot(adj_ref[...], support.astype(x_ref.dtype),
                  preferred_element_type=jnp.float32)
    o_ref[...] = jnp.maximum(out, 0.0).astype(o_ref.dtype)


def gcn_layer_batched(xs, adj, w):
    """Apply one GraphConvolution to several inputs sharing (adj, w) in one call."""
    nB = len(xs)
    Nn, K = xs[0].shape
    K2, F = w.shape
    assert K == K2
    Nnp = _round_up(Nn, 8)
    Kp = _round_up(K, 128)
    Fp = _round_up(F, 128)

    x_stacked = jnp.concatenate(
        [_pad2(x, Nnp, Kp) for x in xs], axis=0).astype(COMPUTE_DTYPE)
    wp = _pad2(w, Kp, Fp).astype(COMPUTE_DTYPE)
    adj_p = _pad2(adj, Nnp, Nnp).astype(COMPUTE_DTYPE)

    # TODO(synk): for very large graphs / gene counts, tile K inside the kernel; the
    # whole-block DMA below assumes the (N,K), (K,F) and (N,N) tiles fit in VMEM
    # (trivially true at these model sizes on v5e/v6e/v7x).
    out = pl.pallas_call(
        _gcn_fused_kernel,
        out_shape=jax.ShapeDtypeStruct((nB * Nnp, Fp), jnp.float32),
        grid=(nB,),
        in_specs=[
            pl.BlockSpec((Nnp, Kp), lambda b: (b, 0)),
            pl.BlockSpec((Kp, Fp), lambda b: (0, 0)),     # fetched once
            pl.BlockSpec((Nnp, Nnp), lambda b: (0, 0)),   # fetched once
        ],
        out_specs=pl.BlockSpec((Nnp, Fp), lambda b: (b, 0)),
        compiler_params=pltpu.CompilerParams(
            dimension_semantics=("parallel",)),
    )(x_stacked, wp, adj_p)
    return [out[b * Nnp: b * Nnp + Nn, :F] for b in range(nB)]


# -----------------------------------------------------------------------------
# 3. AvgReadout (+ fused sigmoid)
# -----------------------------------------------------------------------------
def _avg_readout_kernel(mask_ref, emb_ref, o_ref, *, apply_sigmoid):
    vsum = jnp.dot(mask_ref[...], emb_ref[...],
                   preferred_element_type=jnp.float32)
    # For a non-negative mask with strictly positive row sums,
    #   F.normalize((mask @ emb) / row_sum, dim=1) == vsum / ||vsum||,
    # so the row_sum reduce and the (N, D) divide are elided.
    sq = jnp.sum(vsum * vsum, axis=1, keepdims=True)
    y = vsum * jax.lax.rsqrt(jnp.maximum(sq, 1e-24))
    if apply_sigmoid:
        y = 1.0 / (1.0 + jnp.exp(-y))
    o_ref[...] = y.astype(o_ref.dtype)


def avg_readout(emb, mask, apply_sigmoid=False, *, tm=256):
    """AvgReadout.forward(emb, mask): emb (M, D), mask (N, M) -> (N, D)."""
    N, M = mask.shape
    M2, D = emb.shape
    assert M == M2
    tm_e = min(tm, _round_up(N, 8))
    Np = _round_up(N, tm_e)
    Dp = _round_up(D, 128)

    mask_p = _pad2(mask, Np, M).astype(COMPUTE_DTYPE)   # contraction dim at full extent
    emb_p = _pad2(emb, M, Dp).astype(COMPUTE_DTYPE)

    out = pl.pallas_call(
        functools.partial(_avg_readout_kernel, apply_sigmoid=apply_sigmoid),
        out_shape=jax.ShapeDtypeStruct((Np, Dp), jnp.float32),
        grid=(Np // tm_e,),
        in_specs=[
            pl.BlockSpec((tm_e, M), lambda i: (i, 0)),   # mask row tile, full contraction
            pl.BlockSpec((M, Dp), lambda i: (0, 0)),     # emb DMA'd once, not re-streamed
        ],
        out_specs=pl.BlockSpec((tm_e, Dp), lambda i: (i, 0)),
        compiler_params=pltpu.CompilerParams(
            dimension_semantics=("parallel",)),
    )(mask_p, emb_p)
    return out[:N, :D]


# -----------------------------------------------------------------------------
# 4. Bilinear discriminator  (nn.Bilinear(n_h, n_h, 1) on both pairs)
# -----------------------------------------------------------------------------
def _disc_kernel(c_ref, hpl_ref, hmi_ref, wt_ref, b_ref, o_ref):
    # sum_j (h @ W)[:, j] * c[:, j]  ==  sum_i h[:, i] * (c @ W^T)[:, i]
    # -> one shared MXU matmul; the two row reductions go to the XLU slot.
    u = jnp.dot(c_ref[...], wt_ref[...], preferred_element_type=jnp.float32)
    b = b_ref[...]                                                    # (1, 1)
    sc1 = jnp.sum(hpl_ref[...].astype(jnp.float32) * u, axis=1, keepdims=True) + b
    sc2 = jnp.sum(hmi_ref[...].astype(jnp.float32) * u, axis=1, keepdims=True) + b
    # Lane-dense (N, 128) store: scores live in lanes 0 and 1, rest is zero padding.
    lane = jax.lax.broadcasted_iota(jnp.int32, o_ref.shape, dimension=1)
    o_ref[...] = jnp.where(lane == 0, sc1,
                           jnp.where(lane == 1, sc2, 0.0)).astype(o_ref.dtype)


def discriminator(c, h_pl, h_mi, w, b):
    """logits = cat(f_k(h_pl, c), f_k(h_mi, c)), f_k = Bilinear(n_h, n_h, 1)."""
    N, D = h_pl.shape
    Np, Dp = _round_up(N, 8), _round_up(D, 128)
    c_p = _pad2(c, Np, Dp).astype(COMPUTE_DTYPE)
    hpl_p = _pad2(h_pl, Np, Dp).astype(COMPUTE_DTYPE)
    hmi_p = _pad2(h_mi, Np, Dp).astype(COMPUTE_DTYPE)
    wt_p = _pad2(w.T, Dp, Dp).astype(COMPUTE_DTYPE)   # W^T taken once, outside the kernel
    b_p = jnp.asarray(b, jnp.float32).reshape(1, 1)

    out = pl.pallas_call(
        _disc_kernel,
        out_shape=jax.ShapeDtypeStruct((Np, 128), jnp.float32),
        grid=(1,),
        in_specs=[
            pl.BlockSpec((Np, Dp), lambda i: (0, 0)),
            pl.BlockSpec((Np, Dp), lambda i: (0, 0)),
            pl.BlockSpec((Np, Dp), lambda i: (0, 0)),
            pl.BlockSpec((Dp, Dp), lambda i: (0, 0)),
            pl.BlockSpec((1, 1), lambda i: (0, 0)),
        ],
        out_specs=pl.BlockSpec((Np, 128), lambda i: (0, 0)),
        compiler_params=pltpu.CompilerParams(dimension_semantics=("arbitrary",)),
    )(c_p, hpl_p, hmi_p, wt_p, b_p)
    return out[:N, :2]


# -----------------------------------------------------------------------------
# Encoder parameters + forward pass
# -----------------------------------------------------------------------------
def init_encoder_params(key, in_features, out_features):
    p1, p2, g1, g2, img_out = 1024, 512, 256, 128, 128
    # decoder_gene is Linear(gcn_hid_2, in_features) but is also applied to z,
    # so the module is only shape-consistent when out_features == gcn_hid_2.
    assert out_features == g2
    ks = jax.random.split(key, 13)

    def xavier(k, fan_in, fan_out):
        bound = (6.0 / (fan_in + fan_out)) ** 0.5
        return jax.random.uniform(k, (fan_in, fan_out), jnp.float32, -bound, bound)

    def bias(k, n):
        return jax.random.uniform(k, (n,), jnp.float32, -0.05, 0.05)

    return {
        "gene_pre_w": xavier(ks[0], in_features, p1), "gene_pre_b": bias(ks[1], p1),
        "gene2_pre_w": xavier(ks[2], in_features, p1), "gene2_pre_b": bias(ks[3], p1),
        "proj_w": xavier(ks[4], p1, p2), "proj_b": bias(ks[5], p2),
        "gc1_w": xavier(ks[6], p2, g1),
        "gc2_w": xavier(ks[7], g1, g2),
        "lf2_w": xavier(ks[8], g1, img_out), "lf2_b": bias(ks[9], img_out),
        "fusion_w": xavier(ks[10], g2 + img_out, out_features),
        "fusion_b": jnp.zeros((out_features,), jnp.float32),
        "dec_w": xavier(ks[11], g2, in_features),
        "dec_b": jnp.zeros((in_features,), jnp.float32),
        "disc_w": xavier(ks[12], out_features, out_features),
        "disc_b": jnp.float32(0.0),                     # Bilinear bias filled with 0
    }


def encoder_forward(params, feat, feat_a, adj, feat2_pre, graph_neigh, is_masked):
    p = params
    n = feat.shape[0]

    # gene_pre shared by (feat, feat_a): one row-batched Linear+ELU.
    hp = linear(jnp.concatenate([feat, feat_a], axis=0),
                p["gene_pre_w"], p["gene_pre_b"], "elu")
    h, fa = hp[:n], hp[n:]
    h2 = linear(feat2_pre, p["gene2_pre_w"], p["gene2_pre_b"], "elu")

    # projector shared by (h, fa, h2): one row-batched Linear+ELU.
    pr = linear(jnp.concatenate([h, fa, h2], axis=0),
                p["proj_w"], p["proj_b"], "elu")
    h, fa, h2 = pr[:n], pr[n:2 * n], pr[2 * n:]

    # encoding_mask_noise: replace masked rows of h with rows of h2.
    # TODO(synk): torch.randperm-based row masking is host RNG; the permutation is
    # drawn with jax.random in the driver and applied here with a single XLA select.
    h_masked = jnp.where(is_masked[:, None], h2, h)

    # Fused GraphConvolution stacks, batched over branches that share (adj, W).
    xg, xi, zn1 = gcn_layer_batched([h_masked, h2, fa], adj, p["gc1_w"])
    z_gene, z_n = gcn_layer_batched([xg, zn1], adj, p["gc2_w"])

    z_gene2 = linear(xi, p["lf2_w"], p["lf2_b"], "elu")
    z = linear(jnp.concatenate([z_gene, z_gene2], axis=1),   # torch.cat, dim=1
               p["fusion_w"], p["fusion_b"], "elu")

    # decoder_gene shared by (z, z_gene): one row-batched Linear.
    dec = linear(jnp.concatenate([z, z_gene], axis=0),
                 p["dec_w"], p["dec_b"], "none")
    h_cross, h_gene = dec[:n], dec[n:]

    # z_p = sigm(read(z, graph_neigh)) -- sigmoid fused into the readout epilogue.
    z_p = avg_readout(z, graph_neigh, apply_sigmoid=True)

    ret = discriminator(z_p, z, z_n, p["disc_w"], p["disc_b"])
    return z, z_gene, z_gene2, h_cross, ret, h_gene


# -----------------------------------------------------------------------------
# Pure-JAX reference mirroring the PyTorch module (f32, HIGHEST precision)
# -----------------------------------------------------------------------------
_HI = jax.lax.Precision.HIGHEST


def _ref_linear(x, w, b=None, activation="none"):
    y = jnp.dot(x, w, precision=_HI)
    if b is not None:
        y = y + b
    return _epilogue(y, activation)


def _ref_gcn(x, adj, w):
    return jnp.maximum(jnp.dot(adj, jnp.dot(x, w, precision=_HI), precision=_HI), 0.0)


def _ref_avg_readout(emb, mask):
    vsum = jnp.dot(mask, emb, precision=_HI)
    row_sum = jnp.sum(mask, axis=1, keepdims=True)
    g = vsum / row_sum
    nrm = jnp.sqrt(jnp.sum(g * g, axis=1, keepdims=True))
    return g / jnp.maximum(nrm, 1e-12)


def _ref_disc(c, h_pl, h_mi, w, b):
    sc1 = jnp.sum(jnp.dot(h_pl, w, precision=_HI) * c, axis=1, keepdims=True) + b
    sc2 = jnp.sum(jnp.dot(h_mi, w, precision=_HI) * c, axis=1, keepdims=True) + b
    return jnp.concatenate([sc1, sc2], axis=1)


def encoder_forward_ref(params, feat, feat_a, adj, feat2_pre, graph_neigh, is_masked):
    p = params
    h = _ref_linear(feat, p["gene_pre_w"], p["gene_pre_b"], "elu")
    h2 = _ref_linear(feat2_pre, p["gene2_pre_w"], p["gene2_pre_b"], "elu")
    h = _ref_linear(h, p["proj_w"], p["proj_b"], "elu")
    h2 = _ref_linear(h2, p["proj_w"], p["proj_b"], "elu")
    h = jnp.where(is_masked[:, None], h2, h)
    xg = _ref_gcn(h, adj, p["gc1_w"])
    z_gene = _ref_gcn(xg, adj, p["gc2_w"])
    xi = _ref_gcn(h2, adj, p["gc1_w"])
    z_gene2 = _ref_linear(xi, p["lf2_w"], p["lf2_b"], "elu")
    z = _ref_linear(jnp.concatenate([z_gene, z_gene2], axis=1),
                    p["fusion_w"], p["fusion_b"], "elu")
    h_cross = _ref_linear(z, p["dec_w"], p["dec_b"])
    h_gene = _ref_linear(z_gene, p["dec_w"], p["dec_b"])
    z_p = 1.0 / (1.0 + jnp.exp(-_ref_avg_readout(z, graph_neigh)))
    fa = _ref_linear(feat_a, p["gene_pre_w"], p["gene_pre_b"], "elu")
    fa = _ref_linear(fa, p["proj_w"], p["proj_b"], "elu")
    z_n = _ref_gcn(fa, adj, p["gc1_w"])
    z_n = _ref_gcn(z_n, adj, p["gc2_w"])
    ret = _ref_disc(z_p, z, z_n, p["disc_w"], p["disc_b"])
    return z, z_gene, z_gene2, h_cross, ret, h_gene


if __name__ == "__main__":
    key = jax.random.PRNGKey(0)
    (k_feat, k_feat_a, k_feat2, k_adj,
     k_neigh, k_params, k_perm) = jax.random.split(key, 7)

    # Small graph: 64 nodes, 128 input genes; out_features must equal gcn_hid_2 (=128).
    num_nodes, in_features, out_features = 64, 128, 128

    feat = jax.random.normal(k_feat, (num_nodes, in_features), jnp.float32)
    feat_a = jax.random.normal(k_feat_a, (num_nodes, in_features), jnp.float32)
    feat2_pre = jax.random.normal(k_feat2, (num_nodes, in_features), jnp.float32)

    # Row-normalized dense adjacency with self loops.
    a = (jax.random.uniform(k_adj, (num_nodes, num_nodes)) < 0.1).astype(jnp.float32)
    a = jnp.minimum(a + a.T + jnp.eye(num_nodes, dtype=jnp.float32), 1.0)
    adj = a / jnp.sum(a, axis=1, keepdims=True)

    # Binary neighborhood mask for AvgReadout (self loops => strictly positive row sums).
    graph_neigh = jnp.minimum(
        (jax.random.uniform(k_neigh, (num_nodes, num_nodes)) < 0.2).astype(jnp.float32)
        + jnp.eye(num_nodes, dtype=jnp.float32), 1.0)

    params = init_encoder_params(k_params, in_features, out_features)

    # encoding_mask_noise (if_mask=True, mask_rate=0.3)
    perm = jax.random.permutation(k_perm, num_nodes)
    num_mask = int(0.3 * num_nodes)
    mask_nodes, keep_nodes = perm[:num_mask], perm[num_mask:]
    is_masked = jnp.zeros((num_nodes,), dtype=bool).at[mask_nodes].set(True)

    fwd = jax.jit(encoder_forward)
    outs = fwd(params, feat, feat_a, adj, feat2_pre, graph_neigh, is_masked)
    outs = jax.block_until_ready(outs)

    refs = encoder_forward_ref(params, feat, feat_a, adj, feat2_pre, graph_neigh,
                               is_masked)
    names = ("z", "z_gene", "z_gene2", "h_cross", "ret", "h_gene")
    for name, got, want in zip(names, outs, refs):
        assert got.shape == want.shape, f"shape mismatch for {name}"
        # Kernels feed the MXU bf16 operands (f32 accumulation) across a ~7-matmul
        # chain, while the reference runs f32 at HIGHEST precision; compare the max
        # absolute error against a few percent of the output scale.
        err = float(jnp.max(jnp.abs(got - want)))
        scale = float(jnp.max(jnp.abs(want))) + 1.0
        assert err <= 5e-2 * scale, (
            f"mismatch vs reference: {name} (err={err:.4g}, scale={scale:.4g})")

    print("KERNEL_OK")
</pallas_src>

<mosaic_0001>
module attributes {stable_mosaic.version = 11 : i64} {
  func.func @_matmul_kernel_single(%arg0: i32, %arg1: i32, %arg2: memref<128x128xbf16, #tpu.memory_space<vmem>>, %arg3: memref<128x256xbf16, #tpu.memory_space<vmem>>, %arg4: memref<1x256xf32, #tpu.memory_space<vmem>>, %arg5: memref<128x256xf32, #tpu.memory_space<vmem>>) attributes {dimension_semantics = [#tpu.dimension_semantics<parallel>, #tpu.dimension_semantics<parallel>], iteration_bounds = array<i64: 1, 4>, scalar_prefetch = 0 : i64, scratch_operands = 0 : i64, tpu.core_type = #tpu.core_type<tc>, window_params = [{transform_indices = @transform_0, window_bounds = array<i64: 128, 128>}, {transform_indices = @transform_1, window_bounds = array<i64: 128, 256>}, {transform_indices = @transform_2, window_bounds = array<i64: 1, 256>}, {transform_indices = @transform_3, window_bounds = array<i64: 128, 256>}]} {
    %c0 = arith.constant 0 : index
    %c0_0 = arith.constant 0 : index
    %0 = vector.load %arg2[%c0, %c0_0] : memref<128x128xbf16, #tpu.memory_space<vmem>>, vector<128x128xbf16>
    %c0_1 = arith.constant 0 : index
    %c0_2 = arith.constant 0 : index
    %1 = vector.load %arg3[%c0_1, %c0_2] : memref<128x256xbf16, #tpu.memory_space<vmem>>, vector<128x256xbf16>
    %cst = arith.constant dense<0.000000e+00> : vector<128x256xf32>
    %2 = tpu.matmul %0, %1, %cst {dimension_numbers = #tpu.dot_dimension_numbers<[1], [0], [0], [1], [0, 0, 1, 1], [], []>} : vector<128x128xbf16>, vector<128x256xbf16>, vector<128x256xf32> -> vector<128x256xf32>
    %c0_3 = arith.constant 0 : index
    %c0_4 = arith.constant 0 : index
    %3 = vector.load %arg4[%c0_3, %c0_4] : memref<1x256xf32, #tpu.memory_space<vmem>>, vector<1x256xf32>
    %4 = vector.broadcast %3 : vector<1x256xf32> to vector<128x256xf32>
    %5 = arith.addf %2, %4 : vector<128x256xf32>
    %cst_5 = arith.constant 0.000000e+00 : f32
    %6 = vector.broadcast %cst_5 : f32 to vector<128x256xf32>
    %7 = arith.cmpf ogt, %5, %6 : vector<128x256xf32>
    %8 = math.exp %5 : vector<128x256xf32>
    %cst_6 = arith.constant 1.000000e+00 : f32
    %9 = vector.broadcast %cst_6 : f32 to vector<128x256xf32>
    %10 = arith.subf %8, %9 : vector<128x256xf32>
    %11 = arith.select %7, %5, %10 : vector<128x256xi1>, vector<128x256xf32>
    %c0_7 = arith.constant 0 : index
    %c0_8 = arith.constant 0 : index
    %12 = vector.load %arg5[%c0_7, %c0_8] : memref<128x256xf32, #tpu.memory_space<vmem>>, vector<128x256xf32>
    tpu.vector_store %arg5[%c0_7, %c0_8], %11 {strides = array<i32>} : memref<128x256xf32, #tpu.memory_space<vmem>>, vector<128x256xf32>,
    return
  }
  func.func @transform_0(%arg0: i32, %arg1: i32) -> (i32, i32) {
    %c0_i32 = arith.constant 0 : i32
    %c0_i32_0 = arith.constant 0 : i32
    return %arg0, %c0_i32 : i32, i32
  }
  func.func @transform_1(%arg0: i32, %arg1: i32) -> (i32, i32) {
    %c0_i32 = arith.constant 0 : i32
    %c0_i32_0 = arith.constant 0 : i32
    return %c0_i32, %arg1 : i32, i32
  }
  func.func @transform_2(%arg0: i32, %arg1: i32) -> (i32, i32) {
    %c0_i32 = arith.constant 0 : i32
    %c0_i32_0 = arith.constant 0 : i32
    return %c0_i32, %arg1 : i32, i32
  }
  func.func @transform_3(%arg0: i32, %arg1: i32) -> (i32, i32) {
    %c0_i32 = arith.constant 0 : i32
    return %arg0, %arg1 : i32, i32
  }
}

module attributes {stable_mosaic.version = 11 : i64} {
  func.func @_matmul_kernel_single(%arg0: i32, %arg1: i32, %arg2: memref<64x128xbf16, #tpu.memory_space<vmem>>, %arg3: memref<128x256xbf16, #tpu.memory_space<vmem>>, %arg4: memref<1x256xf32, #tpu.memory_space<vmem>>, %arg5: memref<64x256xf32, #tpu.memory_space<vmem>>) attributes {dimension_semantics = [#tpu.dimension_semantics<parallel>, #tpu.dimension_semantics<parallel>], iteration_bounds = array<i64: 1, 4>, scalar_prefetch = 0 : i64, scratch_operands = 0 : i64, tpu.core_type = #tpu.core_type<tc>, window_params = [{transform_indices = @transform_0, window_bounds = array<i64: 64, 128>}, {transform_indices = @transform_1, window_bounds = array<i64: 128, 256>}, {transform_indices = @transform_2, window_bounds = array<i64: 1, 256>}, {transform_indices = @transform_3, window_bounds = array<i64: 64, 256>}]} {
    %c0 = arith.constant 0 : index
    %c0_0 = arith.constant 0 : index
    %0 = vector.load %arg2[%c0, %c0_0] : memref<64x128xbf16, #tpu.memory_space<vmem>>, vector<64x128xbf16>
    %c0_1 = arith.constant 0 : index
    %c0_2 = arith.constant 0 : index
    %1 = vector.load %arg3[%c0_1, %c0_2] : memref<128x256xbf16, #tpu.memory_space<vmem>>, vector<128x256xbf16>
    %cst = arith.constant dense<0.000000e+00> : vector<64x256xf32>
    %2 = tpu.matmul %0, %1, %cst {dimension_numbers = #tpu.dot_dimension_numbers<[1], [0], [0], [1], [0, 0, 1, 1], [], []>} : vector<64x128xbf16>, vector<128x256xbf16>, vector<64x256xf32> -> vector<64x256xf32>
    %c0_3 = arith.constant 0 : index
    %c0_4 = arith.constant 0 : index
    %3 = vector.load %arg4[%c0_3, %c0_4] : memref<1x256xf32, #tpu.memory_space<vmem>>, vector<1x256xf32>
    %4 = vector.broadcast %3 : vector<1x256xf32> to vector<64x256xf32>
    %5 = arith.addf %2, %4 : vector<64x256xf32>
    %cst_5 = arith.constant 0.000000e+00 : f32
    %6 = vector.broadcast %cst_5 : f32 to vector<64x256xf32>
    %7 = arith.cmpf ogt, %5, %6 : vector<64x256xf32>
    %8 = math.exp %5 : vector<64x256xf32>
    %cst_6 = arith.constant 1.000000e+00 : f32
    %9 = vector.broadcast %cst_6 : f32 to vector<64x256xf32>
    %10 = arith.subf %8, %9 : vector<64x256xf32>
    %11 = arith.select %7, %5, %10 : vector<64x256xi1>, vector<64x256xf32>
    %c0_7 = arith.constant 0 : index
    %c0_8 = arith.constant 0 : index
    %12 = vector.load %arg5[%c0_7, %c0_8] : memref<64x256xf32, #tpu.memory_space<vmem>>, vector<64x256xf32>
    tpu.vector_store %arg5[%c0_7, %c0_8], %11 {strides = array<i32>} : memref<64x256xf32, #tpu.memory_space<vmem>>, vector<64x256xf32>,
    return
  }
  func.func @transform_0(%arg0: i32, %arg1: i32) -> (i32, i32) {
    %c0_i32 = arith.constant 0 : i32
    %c0_i32_0 = arith.constant 0 : i32
    return %arg0, %c0_i32 : i32, i32
  }
  func.func @transform_1(%arg0: i32, %arg1: i32) -> (i32, i32) {
    %c0_i32 = arith.constant 0 : i32
    %c0_i32_0 = arith.constant 0 : i32
    return %c0_i32, %arg1 : i32, i32
  }
  func.func @transform_2(%arg0: i32, %arg1: i32) -> (i32, i32) {
    %c0_i32 = arith.constant 0 : i32
    %c0_i32_0 = arith.constant 0 : i32
    return %c0_i32, %arg1 : i32, i32
  }
  func.func @transform_3(%arg0: i32, %arg1: i32) -> (i32, i32) {
    %c0_i32 = arith.constant 0 : i32
    return %arg0, %arg1 : i32, i32
  }
}

module attributes {stable_mosaic.version = 11 : i64} {
  func.func @_matmul_kernel_acc(%arg0: i32, %arg1: i32, %arg2: i32, %arg3: memref<128x512xbf16, #tpu.memory_space<vmem>>, %arg4: memref<512x256xbf16, #tpu.memory_space<vmem>>, %arg5: memref<1x256xf32, #tpu.memory_space<vmem>>, %arg6: memref<128x256xf32, #tpu.memory_space<vmem>>, %arg7: memref<128x256xf32, #tpu.memory_space<vmem>>) attributes {dimension_semantics = [#tpu.dimension_semantics<parallel>, #tpu.dimension_semantics<parallel>, #tpu.dimension_semantics<arbitrary>], iteration_bounds = array<i64: 2, 2, 2>, scalar_prefetch = 0 : i64, scratch_operands = 1 : i64, tpu.core_type = #tpu.core_type<tc>, window_params = [{transform_indices = @transform_0, window_bounds = array<i64: 128, 512>}, {transform_indices = @transform_1, window_bounds = array<i64: 512, 256>}, {transform_indices = @transform_2, window_bounds = array<i64: 1, 256>}, {transform_indices = @transform_3, window_bounds = array<i64: 128, 256>}]} {
    %c0_i32 = arith.constant 0 : i32
    %0 = arith.cmpi eq, %arg2, %c0_i32 : i32
    %1 = arith.extui %0 : i1 to i32
    %c0_i32_0 = arith.constant 0 : i32
    %2 = arith.cmpi ne, %1, %c0_i32_0 : i32
    scf.if %2 {
      %cst_9 = arith.constant 0.000000e+00 : f32
      %12 = vector.broadcast %cst_9 : f32 to vector<128x256xf32>
      %c0_10 = arith.constant 0 : index
      %c0_11 = arith.constant 0 : index
      %13 = vector.load %arg7[%c0_10, %c0_11] : memref<128x256xf32, #tpu.memory_space<vmem>>, vector<128x256xf32>
      tpu.vector_store %arg7[%c0_10, %c0_11], %12 {strides = array<i32>} : memref<128x256xf32, #tpu.memory_space<vmem>>, vector<128x256xf32>,
    } else {
    }
    %c0 = arith.constant 0 : index
    %c0_1 = arith.constant 0 : index
    %3 = vector.load %arg7[%c0, %c0_1] : memref<128x256xf32, #tpu.memory_space<vmem>>, vector<128x256xf32>
    %c0_2 = arith.constant 0 : index
    %c0_3 = arith.constant 0 : index
    %4 = vector.load %arg3[%c0_2, %c0_3] : memref<128x512xbf16, #tpu.memory_space<vmem>>, vector<128x512xbf16>
    %c0_4 = arith.constant 0 : index
    %c0_5 = arith.constant 0 : index
    %5 = vector.load %arg4[%c0_4, %c0_5] : memref<512x256xbf16, #tpu.memory_space<vmem>>, vector<512x256xbf16>
    %cst = arith.constant dense<0.000000e+00> : vector<128x256xf32>
    %6 = tpu.matmul %4, %5, %cst {dimension_numbers = #tpu.dot_dimension_numbers<[1], [0], [0], [1], [0, 0, 1, 1], [], []>} : vector<128x512xbf16>, vector<512x256xbf16>, vector<128x256xf32> -> vector<128x256xf32>
    %7 = arith.addf %3, %6 : vector<128x256xf32>
    %c0_6 = arith.constant 0 : index
    %c0_7 = arith.constant 0 : index
    %8 = vector.load %arg7[%c0_6, %c0_7] : memref<128x256xf32, #tpu.memory_space<vmem>>, vector<128x256xf32>
    tpu.vector_store %arg7[%c0_6, %c0_7], %7 {strides = array<i32>} : memref<128x256xf32, #tpu.memory_space<vmem>>, vector<128x256xf32>,
    %c1_i32 = arith.constant 1 : i32
    %9 = arith.cmpi eq, %arg2, %c1_i32 : i32
    %10 = arith.extui %9 : i1 to i32
    %c0_i32_8 = arith.constant 0 : i32
    %11 = arith.cmpi ne, %10, %c0_i32_8 : i32
    scf.if %11 {
      %c0_9 = arith.constant 0 : index
      %c0_10 = arith.constant 0 : index
      %12 = vector.load %arg7[%c0_9, %c0_10] : memref<128x256xf32, #tpu.memory_space<vmem>>, vector<128x256xf32>
      %c0_11 = arith.constant 0 : index
      %c0_12 = arith.constant 0 : index
      %13 = vector.load %arg5[%c0_11, %c0_12] : memref<1x256xf32, #tpu.memory_space<vmem>>, vector<1x256xf32>
      %14 = vector.broadcast %13 : vector<1x256xf32> to vector<128x256xf32>
      %15 = arith.addf %12, %14 : vector<128x256xf32>
      %cst_13 = arith.constant 0.000000e+00 : f32
      %16 = vector.broadcast %cst_13 : f32 to vector<128x256xf32>
      %17 = arith.cmpf ogt, %15, %16 : vector<128x256xf32>
      %18 = math.exp %15 : vector<128x256xf32>
      %cst_14 = arith.constant 1.000000e+00 : f32
      %19 = vector.broadcast %cst_14 : f32 to vector<128x256xf32>
      %20 = arith.subf %18, %19 : vector<128x256xf32>
      %21 = arith.select %17, %15, %20 : vector<128x256xi1>, vector<128x256xf32>
      %c0_15 = arith.constant 0 : index
      %c0_16 = arith.constant 0 : index
      %22 = vector.load %arg6[%c0_15, %c0_16] : memref<128x256xf32, #tpu.memory_space<vmem>>, vector<128x256xf32>
      tpu.vector_store %arg6[%c0_15, %c0_16], %21 {strides = array<i32>} : memref<128x256xf32, #tpu.memory_space<vmem>>, vector<128x256xf32>,
    } else {
    }
    return
  }
  func.func @transform_0(%arg0: i32, %arg1: i32, %arg2: i32) -> (i32, i32) {
    %c0_i32 = arith.constant 0 : i32
    return %arg0, %arg2 : i32, i32
  }
  func.func @transform_1(%arg0: i32, %arg1: i32, %arg2: i32) -> (i32, i32) {
    %c0_i32 = arith.constant 0 : i32
    return %arg2, %arg1 : i32, i32
  }
  func.func @transform_2(%arg0: i32, %arg1: i32, %arg2: i32) -> (i32, i32) {
    %c0_i32 = arith.constant 0 : i32
    %c0_i32_0 = arith.constant 0 : i32
    return %c0_i32, %arg1 : i32, i32
  }
  func.func @transform_3(%arg0: i32, %arg1: i32, %arg2: i32) -> (i32, i32) {
    %c0_i32 = arith.constant 0 : i32
    return %arg0, %arg1 : i32, i32
  }
}

module attributes {stable_mosaic.version = 11 : i64} {
  func.func @_gcn_fused_kernel(%arg0: i32, %arg1: memref<64x512xbf16, #tpu.memory_space<vmem>>, %arg2: memref<512x256xbf16, #tpu.memory_space<vmem>>, %arg3: memref<64x64xbf16, #tpu.memory_space<vmem>>, %arg4: memref<64x256xf32, #tpu.memory_space<vmem>>) attributes {dimension_semantics = [#tpu.dimension_semantics<parallel>], iteration_bounds = array<i64: 3>, scalar_prefetch = 0 : i64, scratch_operands = 0 : i64, tpu.core_type = #tpu.core_type<tc>, window_params = [{transform_indices = @transform_0, window_bounds = array<i64: 64, 512>}, {pipeline_mode = #tpu.pipeline_mode<synchronous>, transform_indices = @transform_1, window_bounds = array<i64: 512, 256>}, {pipeline_mode = #tpu.pipeline_mode<synchronous>, transform_indices = @transform_2, window_bounds = array<i64: 64, 64>}, {transform_indices = @transform_3, window_bounds = array<i64: 64, 256>}]} {
    %c0 = arith.constant 0 : index
    %c0_0 = arith.constant 0 : index
    %0 = vector.load %arg1[%c0, %c0_0] : memref<64x512xbf16, #tpu.memory_space<vmem>>, vector<64x512xbf16>
    %c0_1 = arith.constant 0 : index
    %c0_2 = arith.constant 0 : index
    %1 = vector.load %arg2[%c0_1, %c0_2] : memref<512x256xbf16, #tpu.memory_space<vmem>>, vector<512x256xbf16>
    %cst = arith.constant dense<0.000000e+00> : vector<64x256xf32>
    %2 = tpu.matmul %0, %1, %cst {dimension_numbers = #tpu.dot_dimension_numbers<[1], [0], [0], [1], [0, 0, 1, 1], [], []>} : vector<64x512xbf16>, vector<512x256xbf16>, vector<64x256xf32> -> vector<64x256xf32>
    %c0_3 = arith.constant 0 : index
    %c0_4 = arith.constant 0 : index
    %3 = vector.load %arg3[%c0_3, %c0_4] : memref<64x64xbf16, #tpu.memory_space<vmem>>, vector<64x64xbf16>
    %4 = arith.truncf %2 : vector<64x256xf32> to vector<64x256xbf16>
    %cst_5 = arith.constant dense<0.000000e+00> : vector<64x256xf32>
    %5 = tpu.matmul %3, %4, %cst_5 {dimension_numbers = #tpu.dot_dimension_numbers<[1], [0], [0], [1], [0, 0, 1, 1], [], []>} : vector<64x64xbf16>, vector<64x256xbf16>, vector<64x256xf32> -> vector<64x256xf32>
    %cst_6 = arith.constant 0.000000e+00 : f32
    %6 = vector.broadcast %cst_6 : f32 to vector<64x256xf32>
    %7 = arith.maximumf %5, %6 : vector<64x256xf32>
    %c0_7 = arith.constant 0 : index
    %c0_8 = arith.constant 0 : index
    %8 = vector.load %arg4[%c0_7, %c0_8] : memref<64x256xf32, #tpu.memory_space<vmem>>, vector<64x256xf32>
    tpu.vector_store %arg4[%c0_7, %c0_8], %7 {strides = array<i32>} : memref<64x256xf32, #tpu.memory_space<vmem>>, vector<64x256xf32>,
    return
  }
  func.func @transform_0(%arg0: i32) -> (i32, i32) {
    %c0_i32 = arith.constant 0 : i32
    %c0_i32_0 = arith.constant 0 : i32
    return %arg0, %c0_i32 : i32, i32
  }
  func.func @transform_1(%arg0: i32) -> (i32, i32) {
    %c0_i32 = arith.constant 0 : i32
    %c0_i32_0 = arith.constant 0 : i32
    %c0_i32_1 = arith.constant 0 : i32
    return %c0_i32, %c0_i32_0 : i32, i32
  }
  func.func @transform_2(%arg0: i32) -> (i32, i32) {
    %c0_i32 = arith.constant 0 : i32
    %c0_i32_0 = arith.constant 0 : i32
    %c0_i32_1 = arith.constant 0 : i32
    return %c0_i32, %c0_i32_0 : i32, i32
  }
  func.func @transform_3(%arg0: i32) -> (i32, i32) {
    %c0_i32 = arith.constant 0 : i32
    %c0_i32_0 = arith.constant 0 : i32
    return %arg0, %c0_i32 : i32, i32
  }
}

module attributes {stable_mosaic.version = 11 : i64} {
  func.func @_gcn_fused_kernel(%arg0: i32, %arg1: memref<64x256xbf16, #tpu.memory_space<vmem>>, %arg2: memref<256x128xbf16, #tpu.memory_space<vmem>>, %arg3: memref<64x64xbf16, #tpu.memory_space<vmem>>, %arg4: memref<64x128xf32, #tpu.memory_space<vmem>>) attributes {dimension_semantics = [#tpu.dimension_semantics<parallel>], iteration_bounds = array<i64: 2>, scalar_prefetch = 0 : i64, scratch_operands = 0 : i64, tpu.core_type = #tpu.core_type<tc>, window_params = [{transform_indices = @transform_0, window_bounds = array<i64: 64, 256>}, {pipeline_mode = #tpu.pipeline_mode<synchronous>, transform_indices = @transform_1, window_bounds = array<i64: 256, 128>}, {pipeline_mode = #tpu.pipeline_mode<synchronous>, transform_indices = @transform_2, window_bounds = array<i64: 64, 64>}, {transform_indices = @transform_3, window_bounds = array<i64: 64, 128>}]} {
    %c0 = arith.constant 0 : index
    %c0_0 = arith.constant 0 : index
    %0 = vector.load %arg1[%c0, %c0_0] : memref<64x256xbf16, #tpu.memory_space<vmem>>, vector<64x256xbf16>
    %c0_1 = arith.constant 0 : index
    %c0_2 = arith.constant 0 : index
    %1 = vector.load %arg2[%c0_1, %c0_2] : memref<256x128xbf16, #tpu.memory_space<vmem>>, vector<256x128xbf16>
    %cst = arith.constant dense<0.000000e+00> : vector<64x128xf32>
    %2 = tpu.matmul %0, %1, %cst {dimension_numbers = #tpu.dot_dimension_numbers<[1], [0], [0], [1], [0, 0, 1, 1], [], []>} : vector<64x256xbf16>, vector<256x128xbf16>, vector<64x128xf32> -> vector<64x128xf32>
    %c0_3 = arith.constant 0 : index
    %c0_4 = arith.constant 0 : index
    %3 = vector.load %arg3[%c0_3, %c0_4] : memref<64x64xbf16, #tpu.memory_space<vmem>>, vector<64x64xbf16>
    %4 = arith.truncf %2 : vector<64x128xf32> to vector<64x128xbf16>
    %cst_5 = arith.constant dense<0.000000e+00> : vector<64x128xf32>
    %5 = tpu.matmul %3, %4, %cst_5 {dimension_numbers = #tpu.dot_dimension_numbers<[1], [0], [0], [1], [0, 0, 1, 1], [], []>} : vector<64x64xbf16>, vector<64x128xbf16>, vector<64x128xf32> -> vector<64x128xf32>
    %cst_6 = arith.constant 0.000000e+00 : f32
    %6 = vector.broadcast %cst_6 : f32 to vector<64x128xf32>
    %7 = arith.maximumf %5, %6 : vector<64x128xf32>
    %c0_7 = arith.constant 0 : index
    %c0_8 = arith.constant 0 : index
    %8 = vector.load %arg4[%c0_7, %c0_8] : memref<64x128xf32, #tpu.memory_space<vmem>>, vector<64x128xf32>
    tpu.vector_store %arg4[%c0_7, %c0_8], %7 {strides = array<i32>} : memref<64x128xf32, #tpu.memory_space<vmem>>, vector<64x128xf32>,
    return
  }
  func.func @transform_0(%arg0: i32) -> (i32, i32) {
    %c0_i32 = arith.constant 0 : i32
    %c0_i32_0 = arith.constant 0 : i32
    return %arg0, %c0_i32 : i32, i32
  }
  func.func @transform_1(%arg0: i32) -> (i32, i32) {
    %c0_i32 = arith.constant 0 : i32
    %c0_i32_0 = arith.constant 0 : i32
    %c0_i32_1 = arith.constant 0 : i32
    return %c0_i32, %c0_i32_0 : i32, i32
  }
  func.func @transform_2(%arg0: i32) -> (i32, i32) {
    %c0_i32 = arith.constant 0 : i32
    %c0_i32_0 = arith.constant 0 : i32
    %c0_i32_1 = arith.constant 0 : i32
    return %c0_i32, %c0_i32_0 : i32, i32
  }
  func.func @transform_3(%arg0: i32) -> (i32, i32) {
    %c0_i32 = arith.constant 0 : i32
    %c0_i32_0 = arith.constant 0 : i32
    return %arg0, %c0_i32 : i32, i32
  }
}

module attributes {stable_mosaic.version = 11 : i64} {
  func.func @_matmul_kernel_single(%arg0: i32, %arg1: i32, %arg2: memref<64x256xbf16, #tpu.memory_space<vmem>>, %arg3: memref<256x128xbf16, #tpu.memory_space<vmem>>, %arg4: memref<1x128xf32, #tpu.memory_space<vmem>>, %arg5: memref<64x128xf32, #tpu.memory_space<vmem>>) attributes {dimension_semantics = [#tpu.dimension_semantics<parallel>, #tpu.dimension_semantics<parallel>], iteration_bounds = array<i64: 1, 1>, scalar_prefetch = 0 : i64, scratch_operands = 0 : i64, tpu.core_type = #tpu.core_type<tc>, window_params = [{transform_indices = @transform_0, window_bounds = array<i64: 64, 256>}, {transform_indices = @transform_1, window_bounds = array<i64: 256, 128>}, {transform_indices = @transform_2, window_bounds = array<i64: 1, 128>}, {transform_indices = @transform_3, window_bounds = array<i64: 64, 128>}]} {
    %c0 = arith.constant 0 : index
    %c0_0 = arith.constant 0 : index
    %0 = vector.load %arg2[%c0, %c0_0] : memref<64x256xbf16, #tpu.memory_space<vmem>>, vector<64x256xbf16>
    %c0_1 = arith.constant 0 : index
    %c0_2 = arith.constant 0 : index
    %1 = vector.load %arg3[%c0_1, %c0_2] : memref<256x128xbf16, #tpu.memory_space<vmem>>, vector<256x128xbf16>
    %cst = arith.constant dense<0.000000e+00> : vector<64x128xf32>
    %2 = tpu.matmul %0, %1, %cst {dimension_numbers = #tpu.dot_dimension_numbers<[1], [0], [0], [1], [0, 0, 1, 1], [], []>} : vector<64x256xbf16>, vector<256x128xbf16>, vector<64x128xf32> -> vector<64x128xf32>
    %c0_3 = arith.constant 0 : index
    %c0_4 = arith.constant 0 : index
    %3 = vector.load %arg4[%c0_3, %c0_4] : memref<1x128xf32, #tpu.memory_space<vmem>>, vector<1x128xf32>
    %4 = vector.broadcast %3 : vector<1x128xf32> to vector<64x128xf32>
    %5 = arith.addf %2, %4 : vector<64x128xf32>
    %cst_5 = arith.constant 0.000000e+00 : f32
    %6 = vector.broadcast %cst_5 : f32 to vector<64x128xf32>
    %7 = arith.cmpf ogt, %5, %6 : vector<64x128xf32>
    %8 = math.exp %5 : vector<64x128xf32>
    %cst_6 = arith.constant 1.000000e+00 : f32
    %9 = vector.broadcast %cst_6 : f32 to vector<64x128xf32>
    %10 = arith.subf %8, %9 : vector<64x128xf32>
    %11 = arith.select %7, %5, %10 : vector<64x128xi1>, vector<64x128xf32>
    %c0_7 = arith.constant 0 : index
    %c0_8 = arith.constant 0 : index
    %12 = vector.load %arg5[%c0_7, %c0_8] : memref<64x128xf32, #tpu.memory_space<vmem>>, vector<64x128xf32>
    tpu.vector_store %arg5[%c0_7, %c0_8], %11 {strides = array<i32>} : memref<64x128xf32, #tpu.memory_space<vmem>>, vector<64x128xf32>,
    return
  }
  func.func @transform_0(%arg0: i32, %arg1: i32) -> (i32, i32) {
    %c0_i32 = arith.constant 0 : i32
    %c0_i32_0 = arith.constant 0 : i32
    return %arg0, %c0_i32 : i32, i32
  }
  func.func @transform_1(%arg0: i32, %arg1: i32) -> (i32, i32) {
    %c0_i32 = arith.constant 0 : i32
    %c0_i32_0 = arith.constant 0 : i32
    return %c0_i32, %arg1 : i32, i32
  }
  func.func @transform_2(%arg0: i32, %arg1: i32) -> (i32, i32) {
    %c0_i32 = arith.constant 0 : i32
    %c0_i32_0 = arith.constant 0 : i32
    return %c0_i32, %arg1 : i32, i32
  }
  func.func @transform_3(%arg0: i32, %arg1: i32) -> (i32, i32) {
    %c0_i32 = arith.constant 0 : i32
    return %arg0, %arg1 : i32, i32
  }
}

module attributes {stable_mosaic.version = 11 : i64} {
  func.func @_disc_kernel(%arg0: i32, %arg1: memref<64x128xbf16, #tpu.memory_space<vmem>>, %arg2: memref<64x128xbf16, #tpu.memory_space<vmem>>, %arg3: memref<64x128xbf16, #tpu.memory_space<vmem>>, %arg4: memref<128x128xbf16, #tpu.memory_space<vmem>>, %arg5: memref<1x1xf32, #tpu.memory_space<vmem>>, %arg6: memref<64x128xf32, #tpu.memory_space<vmem>>) attributes {dimension_semantics = [#tpu.dimension_semantics<arbitrary>], iteration_bounds = array<i64: 1>, scalar_prefetch = 0 : i64, scratch_operands = 0 : i64, tpu.core_type = #tpu.core_type<tc>, window_params = [{pipeline_mode = #tpu.pipeline_mode<synchronous>, transform_indices = @transform_0, window_bounds = array<i64: 64, 128>}, {pipeline_mode = #tpu.pipeline_mode<synchronous>, transform_indices = @transform_1, window_bounds = array<i64: 64, 128>}, {pipeline_mode = #tpu.pipeline_mode<synchronous>, transform_indices = @transform_2, window_bounds = array<i64: 64, 128>}, {pipeline_mode = #tpu.pipeline_mode<synchronous>, transform_indices = @transform_3, window_bounds = array<i64: 128, 128>}, {pipeline_mode = #tpu.pipeline_mode<synchronous>, transform_indices = @transform_4, window_bounds = array<i64: 1, 1>}, {pipeline_mode = #tpu.pipeline_mode<synchronous>, transform_indices = @transform_5, window_bounds = array<i64: 64, 128>}]} {
    %c0 = arith.constant 0 : index
    %c0_0 = arith.constant 0 : index
    %0 = vector.load %arg1[%c0, %c0_0] : memref<64x128xbf16, #tpu.memory_space<vmem>>, vector<64x128xbf16>
    %c0_1 = arith.constant 0 : index
    %c0_2 = arith.constant 0 : index
    %1 = vector.load %arg4[%c0_1, %c0_2] : memref<128x128xbf16, #tpu.memory_space<vmem>>, vector<128x128xbf16>
    %cst = arith.constant dense<0.000000e+00> : vector<64x128xf32>
    %2 = tpu.matmul %0, %1, %cst {dimension_numbers = #tpu.dot_dimension_numbers<[1], [0], [0], [1], [0, 0, 1, 1], [], []>} : vector<64x128xbf16>, vector<128x128xbf16>, vector<64x128xf32> -> vector<64x128xf32>
    %c0_3 = arith.constant 0 : index
    %c0_4 = arith.constant 0 : index
    %3 = vector.load %arg5[%c0_3, %c0_4] : memref<1x1xf32, #tpu.memory_space<vmem>>, vector<1x1xf32>
    %c0_5 = arith.constant 0 : index
    %c0_6 = arith.constant 0 : index
    %4 = vector.load %arg2[%c0_5, %c0_6] : memref<64x128xbf16, #tpu.memory_space<vmem>>, vector<64x128xbf16>
    %5 = arith.extf %4 : vector<64x128xbf16> to vector<64x128xf32>
    %6 = arith.mulf %5, %2 : vector<64x128xf32>
    %cst_7 = arith.constant dense<0.000000e+00> : vector<64xf32>
    %7 = vector.multi_reduction <add>, %6, %cst_7 [1] : vector<64x128xf32> to vector<64xf32>
    %8 = vector.shape_cast %7 : vector<64xf32> to vector<64x1xf32>
    %9 = vector.broadcast %3 : vector<1x1xf32> to vector<64x1xf32>
    %10 = arith.addf %8, %9 : vector<64x1xf32>
    %c0_8 = arith.constant 0 : index
    %c0_9 = arith.constant 0 : index
    %11 = vector.load %arg3[%c0_8, %c0_9] : memref<64x128xbf16, #tpu.memory_space<vmem>>, vector<64x128xbf16>
    %12 = arith.extf %11 : vector<64x128xbf16> to vector<64x128xf32>
    %13 = arith.mulf %12, %2 : vector<64x128xf32>
    %cst_10 = arith.constant dense<0.000000e+00> : vector<64xf32>
    %14 = vector.multi_reduction <add>, %13, %cst_10 [1] : vector<64x128xf32> to vector<64xf32>
    %15 = vector.shape_cast %14 : vector<64xf32> to vector<64x1xf32>
    %16 = vector.broadcast %3 : vector<1x1xf32> to vector<64x1xf32>
    %17 = arith.addf %15, %16 : vector<64x1xf32>
    %18 = tpu.iota {dimensions = array<i32: 1>} : vector<64x128xi32>
    %c0_i32 = arith.constant 0 : i32
    %19 = vector.broadcast %c0_i32 : i32 to vector<64x128xi32>
    %20 = arith.cmpi eq, %18, %19 : vector<64x128xi32>
    %c1_i32 = arith.constant 1 : i32
    %21 = vector.broadcast %c1_i32 : i32 to vector<64x128xi32>
    %22 = arith.cmpi eq, %18, %21 : vector<64x128xi32>
    %cst_11 = arith.constant 0.000000e+00 : f32
    %23 = vector.shape_cast %17 : vector<64x1xf32> to vector<64x1xf32>
    %24 = vector.broadcast %23 : vector<64x1xf32> to vector<64x128xf32>
    %25 = vector.broadcast %cst_11 : f32 to vector<64x128xf32>
    %26 = arith.select %22, %24, %25 : vector<64x128xi1>, vector<64x128xf32>
    %27 = vector.shape_cast %10 : vector<64x1xf32> to vector<64x1xf32>
    %28 = vector.broadcast %27 : vector<64x1xf32> to vector<64x128xf32>
    %29 = arith.select %20, %28, %26 : vector<64x128xi1>, vector<64x128xf32>
    %c0_12 = arith.constant 0 : index
    %c0_13 = arith.constant 0 : index
    %30 = vector.load %arg6[%c0_12, %c0_13] : memref<64x128xf32, #tpu.memory_space<vmem>>, vector<64x128xf32>
    tpu.vector_store %arg6[%c0_12, %c0_13], %29 {strides = array<i32>} : memref<64x128xf32, #tpu.memory_space<vmem>>, vector<64x128xf32>,
    return
  }
  func.func @transform_0(%arg0: i32) -> (i32, i32) {
    %c0_i32 = arith.constant 0 : i32
    %c0_i32_0 = arith.constant 0 : i32
    %c0_i32_1 = arith.constant 0 : i32
    return %c0_i32, %c0_i32_0 : i32, i32
  }
  func.func @transform_1(%arg0: i32) -> (i32, i32) {
    %c0_i32 = arith.constant 0 : i32
    %c0_i32_0 = arith.constant 0 : i32
    %c0_i32_1 = arith.constant 0 : i32
    return %c0_i32, %c0_i32_0 : i32, i32
  }
  func.func @transform_2(%arg0: i32) -> (i32, i32) {
    %c0_i32 = arith.constant 0 : i32
    %c0_i32_0 = arith.constant 0 : i32
    %c0_i32_1 = arith.constant 0 : i32
    return %c0_i32, %c0_i32_0 : i32, i32
  }
  func.func @transform_3(%arg0: i32) -> (i32, i32) {
    %c0_i32 = arith.constant 0 : i32
    %c0_i32_0 = arith.constant 0 : i32
    %c0_i32_1 = arith.constant 0 : i32
    return %c0_i32, %c0_i32_0 : i32, i32
  }
  func.func @transform_4(%arg0: i32) -> (i32, i32) {
    %c0_i32 = arith.constant 0 : i32
    %c0_i32_0 = arith.constant 0 : i32
    %c0_i32_1 = arith.constant 0 : i32
    return %c0_i32, %c0_i32_0 : i32, i32
  }
  func.func @transform_5(%arg0: i32) -> (i32, i32) {
    %c0_i32 = arith.constant 0 : i32
    %c0_i32_0 = arith.constant 0 : i32
    %c0_i32_1 = arith.constant 0 : i32
    return %c0_i32, %c0_i32_0 : i32, i32
  }
}

module attributes {stable_mosaic.version = 11 : i64} {
  func.func @_avg_readout_kernel(%arg0: i32, %arg1: memref<64x64xbf16, #tpu.memory_space<vmem>>, %arg2: memref<64x128xbf16, #tpu.memory_space<vmem>>, %arg3: memref<64x128xf32, #tpu.memory_space<vmem>>) attributes {dimension_semantics = [#tpu.dimension_semantics<parallel>], iteration_bounds = array<i64: 1>, scalar_prefetch = 0 : i64, scratch_operands = 0 : i64, tpu.core_type = #tpu.core_type<tc>, window_params = [{transform_indices = @transform_0, window_bounds = array<i64: 64, 64>}, {pipeline_mode = #tpu.pipeline_mode<synchronous>, transform_indices = @transform_1, window_bounds = array<i64: 64, 128>}, {transform_indices = @transform_2, window_bounds = array<i64: 64, 128>}]} {
    %c0 = arith.constant 0 : index
    %c0_0 = arith.constant 0 : index
    %0 = vector.load %arg1[%c0, %c0_0] : memref<64x64xbf16, #tpu.memory_space<vmem>>, vector<64x64xbf16>
    %c0_1 = arith.constant 0 : index
    %c0_2 = arith.constant 0 : index
    %1 = vector.load %arg2[%c0_1, %c0_2] : memref<64x128xbf16, #tpu.memory_space<vmem>>, vector<64x128xbf16>
    %cst = arith.constant dense<0.000000e+00> : vector<64x128xf32>
    %2 = tpu.matmul %0, %1, %cst {dimension_numbers = #tpu.dot_dimension_numbers<[1], [0], [0], [1], [0, 0, 1, 1], [], []>} : vector<64x64xbf16>, vector<64x128xbf16>, vector<64x128xf32> -> vector<64x128xf32>
    %3 = arith.mulf %2, %2 : vector<64x128xf32>
    %cst_3 = arith.constant dense<0.000000e+00> : vector<64xf32>
    %4 = vector.multi_reduction <add>, %3, %cst_3 [1] : vector<64x128xf32> to vector<64xf32>
    %5 = vector.shape_cast %4 : vector<64xf32> to vector<64x1xf32>
    %cst_4 = arith.constant 1.000000e-24 : f32
    %6 = vector.broadcast %cst_4 : f32 to vector<64x1xf32>
    %7 = arith.maximumf %5, %6 : vector<64x1xf32>
    %8 = math.rsqrt %7 : vector<64x1xf32>
    %9 = vector.broadcast %8 : vector<64x1xf32> to vector<64x128xf32>
    %10 = arith.mulf %2, %9 : vector<64x128xf32>
    %cst_5 = arith.constant 0.000000e+00 : f32
    %11 = vector.broadcast %cst_5 : f32 to vector<64x128xf32>
    %12 = arith.subf %11, %10 : vector<64x128xf32>
    %13 = math.exp %12 : vector<64x128xf32>
    %cst_6 = arith.constant 1.000000e+00 : f32
    %14 = vector.broadcast %cst_6 : f32 to vector<64x128xf32>
    %15 = arith.addf %14, %13 : vector<64x128xf32>
    %cst_7 = arith.constant 1.000000e+00 : f32
    %16 = vector.broadcast %cst_7 : f32 to vector<64x128xf32>
    %17 = arith.divf %16, %15 : vector<64x128xf32>
    %c0_8 = arith.constant 0 : index
    %c0_9 = arith.constant 0 : index
    %18 = vector.load %arg3[%c0_8, %c0_9] : memref<64x128xf32, #tpu.memory_space<vmem>>, vector<64x128xf32>
    tpu.vector_store %arg3[%c0_8, %c0_9], %17 {strides = array<i32>} : memref<64x128xf32, #tpu.memory_space<vmem>>, vector<64x128xf32>,
    return
  }
  func.func @transform_0(%arg0: i32) -> (i32, i32) {
    %c0_i32 = arith.constant 0 : i32
    %c0_i32_0 = arith.constant 0 : i32
    return %arg0, %c0_i32 : i32, i32
  }
  func.func @transform_1(%arg0: i32) -> (i32, i32) {
    %c0_i32 = arith.constant 0 : i32
    %c0_i32_0 = arith.constant 0 : i32
    %c0_i32_1 = arith.constant 0 : i32
    return %c0_i32, %c0_i32_0 : i32, i32
  }
  func.func @transform_2(%arg0: i32) -> (i32, i32) {
    %c0_i32 = arith.constant 0 : i32
    %c0_i32_0 = arith.constant 0 : i32
    return %arg0, %c0_i32 : i32, i32
  }
}

module attributes {stable_mosaic.version = 11 : i64} {
  func.func @_matmul_kernel_single(%arg0: i32, %arg1: i32, %arg2: memref<128x128xbf16, #tpu.memory_space<vmem>>, %arg3: memref<128x128xbf16, #tpu.memory_space<vmem>>, %arg4: memref<1x128xf32, #tpu.memory_space<vmem>>, %arg5: memref<128x128xf32, #tpu.memory_space<vmem>>) attributes {dimension_semantics = [#tpu.dimension_semantics<parallel>, #tpu.dimension_semantics<parallel>], iteration_bounds = array<i64: 1, 1>, scalar_prefetch = 0 : i64, scratch_operands = 0 : i64, tpu.core_type = #tpu.core_type<tc>, window_params = [{transform_indices = @transform_0, window_bounds = array<i64: 128, 128>}, {transform_indices = @transform_1, window_bounds = array<i64: 128, 128>}, {transform_indices = @transform_2, window_bounds = array<i64: 1, 128>}, {transform_indices = @transform_3, window_bounds = array<i64: 128, 128>}]} {
    %c0 = arith.constant 0 : index
    %c0_0 = arith.constant 0 : index
    %0 = vector.load %arg2[%c0, %c0_0] : memref<128x128xbf16, #tpu.memory_space<vmem>>, vector<128x128xbf16>
    %c0_1 = arith.constant 0 : index
    %c0_2 = arith.constant 0 : index
    %1 = vector.load %arg3[%c0_1, %c0_2] : memref<128x128xbf16, #tpu.memory_space<vmem>>, vector<128x128xbf16>
    %cst = arith.constant dense<0.000000e+00> : vector<128x128xf32>
    %2 = tpu.matmul %0, %1, %cst {dimension_numbers = #tpu.dot_dimension_numbers<[1], [0], [0], [1], [0, 0, 1, 1], [], []>} : vector<128x128xbf16>, vector<128x128xbf16>, vector<128x128xf32> -> vector<128x128xf32>
    %c0_3 = arith.constant 0 : index
    %c0_4 = arith.constant 0 : index
    %3 = vector.load %arg4[%c0_3, %c0_4] : memref<1x128xf32, #tpu.memory_space<vmem>>, vector<1x128xf32>
    %4 = vector.broadcast %3 : vector<1x128xf32> to vector<128x128xf32>
    %5 = arith.addf %2, %4 : vector<128x128xf32>
    %c0_5 = arith.constant 0 : index
    %c0_6 = arith.constant 0 : index
    %6 = vector.load %arg5[%c0_5, %c0_6] : memref<128x128xf32, #tpu.memory_space<vmem>>, vector<128x128xf32>
    tpu.vector_store %arg5[%c0_5, %c0_6], %5 {strides = array<i32>} : memref<128x128xf32, #tpu.memory_space<vmem>>, vector<128x128xf32>,
    return
  }
  func.func @transform_0(%arg0: i32, %arg1: i32) -> (i32, i32) {
    %c0_i32 = arith.constant 0 : i32
    %c0_i32_0 = arith.constant 0 : i32
    return %arg0, %c0_i32 : i32, i32
  }
  func.func @transform_1(%arg0: i32, %arg1: i32) -> (i32, i32) {
    %c0_i32 = arith.constant 0 : i32
    %c0_i32_0 = arith.constant 0 : i32
    return %c0_i32, %arg1 : i32, i32
  }
  func.func @transform_2(%arg0: i32, %arg1: i32) -> (i32, i32) {
    %c0_i32 = arith.constant 0 : i32
    %c0_i32_0 = arith.constant 0 : i32
    return %c0_i32, %arg1 : i32, i32
  }
  func.func @transform_3(%arg0: i32, %arg1: i32) -> (i32, i32) {
    %c0_i32 = arith.constant 0 : i32
    return %arg0, %arg1 : i32, i32
  }
}

</mosaic_0001>

<bundles_post_ra>
// kernel: encoder_forward.11
= control target key start
LH: loop header
LB: loop body
LE: loop exit
PB: predicated region body
PF: predicated region fallthrough
CT: control target
= control target key end

     0   :  { %s1014_s12 = smov 0   ;;  %s1016_s13 = smov 0   ;;  %s1256_s0 = inlined_call_operand.vmem [shape: bf16[64,128], index: 0, kind: input, shape index: {}]   ;;  %s1257_s1 = inlined_call_operand.vmem [shape: bf16[128,1024], index: 1, kind: input, shape index: {}]   ;;  %s1258_s2 = inlined_call_operand.vmem [shape: f32[1,1024], index: 2, kind: input, shape index: {}]   ;;  %s1259_s3 = inlined_call_operand.vmem [shape: f32[64,1024], index: 3, kind: output, shape index: {}]  }
   0x1   :  { %s1018_s14 = smov 0   ;;  %s1020_s15 = smov 0  }
   0x2   :  { %s1022_s16 = smov 0  }
   0x3 LB: > { %s22_s17 = sadd.s32 1, %s987_s15  ;;  %s781_s18 = sadd.s32 4294967295, %s991_s16   ;;  %s991_s16 = sphi %s1022_s16, %s13_s16   ;;  %s987_s15 = sphi %s1020_s15, %s1264_s15   ;;  %s983_s14 = sphi %s1018_s14, %s1263_s14   ;;  %s979_s13 = sphi %s1016_s13, %s1262_s13   ;;  %s975_s12 = sphi %s1014_s12, %s1261_s12  }
   0x4   : > { %p23_p0 = scmp.ge.s32.totalorder %s22_s17, 4  ;;  %p65_p1 = scmp.ne.s32.totalorder %s979_s13, %s975_s12 }
   0x5   : > { %p66_p2 = scmp.eq.s32.totalorder %s991_s16, 0  ;;  %p123_p4 = scmp.eq.s32.totalorder %s781_s18, 3 }
   0x6   : > { %s1266_s17 = smov (%p23_p0, %s22_s17), 0  ;;  %s58_s20 = sadd.s32 1, %s979_s13 }
   0x7   : > { %p67_p3 = por %p66_p2, %p65_p1  ;;  %s55_s19 = ssub.s32 %s987_s15, %s1266_s17 }
   0x8   : > { %p56_p5 = scmp.eq.s32.totalorder %s55_s19, 0  ;;  %p1049_p6 = por %p123_p4, %p65_p1 }
   0x9   : > { %p785_p7 = scmp.ge.s32.totalorder %s991_s16, 4 }
   0xa   : > { %s1054_s22 = scalar_select %p56_p5, %s979_s13, %s58_s20  }
   0xb   : > { %154 = sbr.rel (%p785_p7) target bundleno = 36 (0x24), region = 20 }
  0x10   : > { %157 = sbr.rel (!%p67_p3) target bundleno = 36 (0x24), region = 24  ;;  %s159_s23 = sand.u32 (%p67_p3), 1, %s979_s13  }
  0x11   : > { %s834_s24 = sshll.u32 (%p67_p3), %s987_s15, 3  ;;  %s786_s25 = sshll.u32 (%p67_p3), %s159_s23, 7 }
  0x12   : > { %s1062_s28 = scalar_lea.vmem (%p67_p3), %s1257_s1, %s834_s24  ;;  %s161_s29 = scalar_lea.vmem (%p67_p3), [#allocation2], %s786_s25 }
  0x13   : > { %v223_v0 = vld [vmem:[%s1062_s28] sm:$0xff] (%p67_p3) }
  0x14   : > { %v225_v1 = vld [vmem:[%s1062_s28 + $0x20] sm:$0xff] (%p67_p3)  ;;  %224 = vst [vmem:[%s161_s29] sm:$0xff] (%p67_p3), %v223_v0 }
  0x15   : > { %v227_v2 = vld [vmem:[%s1062_s28 + $0x40] sm:$0xff]  ;;  %226 = vst [vmem:[%s161_s29 + $0x8] sm:$0xff] %v225_v1 }
  0x16   : > { %228 = vst [vmem:[%s161_s29 + $0x10] sm:$0xff] %v227_v2  ;;  %v229_v3 = vld [vmem:[%s1062_s28 + $0x60] sm:$0xff] }
  0x17   : > { %v231_v4 = vld [vmem:[%s1062_s28 + $0x80] sm:$0xff]  ;;  %230 = vst [vmem:[%s161_s29 + $0x18] sm:$0xff] %v229_v3 }
  0x18   : > { %v233_v5 = vld [vmem:[%s1062_s28 + $0xa0] sm:$0xff]  ;;  %232 = vst [vmem:[%s161_s29 + $0x20] sm:$0xff] %v231_v4 }
  0x19   : > { %234 = vst [vmem:[%s161_s29 + $0x28] sm:$0xff] %v233_v5  ;;  %v235_v6 = vld [vmem:[%s1062_s28 + $0xc0] sm:$0xff] }
  0x1a   : > { %v237_v7 = vld [vmem:[%s1062_s28 + $0xe0] sm:$0xff]  ;;  %236 = vst [vmem:[%s161_s29 + $0x30] sm:$0xff] %v235_v6 }
  0x1b   : > { %v239_v8 = vld [vmem:[%s1062_s28 + $0x100] sm:$0xff]  ;;  %238 = vst [vmem:[%s161_s29 + $0x38] sm:$0xff] %v237_v7 }
  0x1c   : > { %240 = vst [vmem:[%s161_s29 + $0x40] sm:$0xff] %v239_v8  ;;  %v241_v9 = vld [vmem:[%s1062_s28 + $0x120] sm:$0xff] }
  0x1d   : > { %v243_v10 = vld [vmem:[%s1062_s28 + $0x140] sm:$0xff]  ;;  %242 = vst [vmem:[%s161_s29 + $0x48] sm:$0xff] %v241_v9 }
  0x1e   : > { %v245_v11 = vld [vmem:[%s1062_s28 + $0x160] sm:$0xff]  ;;  %244 = vst [vmem:[%s161_s29 + $0x50] sm:$0xff] %v243_v10 }
  0x1f   : > { %246 = vst [vmem:[%s161_s29 + $0x58] sm:$0xff] %v245_v11  ;;  %v247_v12 = vld [vmem:[%s1062_s28 + $0x180] sm:$0xff] }
  0x20   : > { %v249_v13 = vld [vmem:[%s1062_s28 + $0x1a0] sm:$0xff]  ;;  %248 = vst [vmem:[%s161_s29 + $0x60] sm:$0xff] %v247_v12 }
  0x21   : > { %v251_v14 = vld [vmem:[%s1062_s28 + $0x1c0] sm:$0xff]  ;;  %250 = vst [vmem:[%s161_s29 + $0x68] sm:$0xff] %v249_v13 }
  0x22   : > { %252 = vst [vmem:[%s161_s29 + $0x70] sm:$0xff] %v251_v14  ;;  %v253_v15 = vld [vmem:[%s1062_s28 + $0x1e0] sm:$0xff] }
  0x23   : > { %254 = vst [vmem:[%s161_s29 + $0x78] sm:$0xff] %v253_v15 }
  0x24 PF: > { %p789_p8 = scmp.ge.s32.totalorder %s991_s16, 1  ;;  %p267_p9 = scmp.lt.s32.totalorder %s991_s16, 5 }
  0x26   : > { %p268_p10 = pnand %p789_p8, %p267_p9 }
  0x27   : > { %s274_s30 = sand.u32 (!%p268_p10), 1, %s975_s12   ;;  %s792_s19 = sshll.u32 (!%p268_p10), %s983_s14, 1 }
  0x28   : > { %271 = sbr.rel (%p268_p10) target bundleno = 317 (0x13d), region = 66  ;;  %s1083_s4 = sshll.u32 (!%p268_p10), %s274_s30, 7 }
  0x29   : > { %s1086_s5 = scalar_lea.vmem (!%p268_p10), [#allocation2], %s1083_s4  ;;  %p313_p11 = scmp.lt.s32.totalorder (!%p268_p10), %s792_s19, 7 }
  0x2a   : > { %s1172_s25 = scalar_lea.vmem (!%p268_p10), [#allocation3], %s1083_s4 }
  0x2d   : > { %v993_v16 = vmov 0   ;;  %v893_v17 = vld [vmem:[%s1086_s5 + $0x74] ss:$8 sps:$4 sm:$0xff]   ;;  %v895_v18 = vld [vmem:[%s1086_s5 + $0x70] ss:$8 sps:$4 sm:$0xff]   ;;  %v917_v33 = vld [vmem:[%s1256_s0] sm:$0xff]   ;;  %v346_v37 = vlaneseq }
  0x2e   : > { %492 = vmatprep.mubr.bf16.mxu0 %v993_v16  ;;  %512 = vmatprep.mubr.bf16.mxu1 %v993_v16  ;;  %v896_v19 = vld [vmem:[%s1086_s5 + $0x64] ss:$8 sps:$4 sm:$0xff]   ;;  %v898_v20 = vld [vmem:[%s1086_s5 + $0x60] ss:$8 sps:$4 sm:$0xff]   ;;  %v899_v21 = vld [vmem:[%s1086_s5 + $0x54] ss:$8 sps:$4 sm:$0xff]  }
  0x2f   : > { %460 = vmatprep.subr.bf16.mxu0 %v893_v17  ;;  %836 = vmatprep.subr.bf16.mxu1 %v893_v17  ;;  %v901_v22 = vld [vmem:[%s1086_s5 + $0x50] ss:$8 sps:$4 sm:$0xff]   ;;  %v902_v23 = vld [vmem:[%s1086_s5 + $0x44] ss:$8 sps:$4 sm:$0xff]   ;;  %v904_v24 = vld [vmem:[%s1086_s5 + $0x40] ss:$8 sps:$4 sm:$0xff]  }
  0x30   : > { %461 = vmatpush1.bf16.msra.mxu0 %v895_v18  ;;  %844 = vmatpush1.bf16.msra.mxu1 %v895_v18  ;;  %v905_v25 = vld [vmem:[%s1086_s5 + $0x34] ss:$8 sps:$4 sm:$0xff]   ;;  %v907_v26 = vld [vmem:[%s1086_s5 + $0x30] ss:$8 sps:$4 sm:$0xff]   ;;  %v908_v27 = vld [vmem:[%s1086_s5 + $0x24] ss:$8 sps:$4 sm:$0xff]  }
  0x31   : > { %462 = vmatprep.subr.bf16.mxu0 %v896_v19  ;;  %837 = vmatprep.subr.bf16.mxu1 %v896_v19  ;;  %v910_v28 = vld [vmem:[%s1086_s5 + $0x20] ss:$8 sps:$4 sm:$0xff]   ;;  %v911_v29 = vld [vmem:[%s1086_s5 + $0x14] ss:$8 sps:$4 sm:$0xff]   ;;  %v913_v30 = vld [vmem:[%s1086_s5 + $0x10] ss:$8 sps:$4 sm:$0xff]  }
  0x32   : > { %v914_v31 = vld [vmem:[%s1086_s5 + $0x4] ss:$8 sps:$4 sm:$0xff]   ;;  %v916_v32 = vld [vmem:[%s1086_s5] ss:$8 sps:$4 sm:$0xff]   ;;  %v918_v34 = vld [vmem:[%s1256_s0 + $0x10] sm:$0xff]   ;;  %s1268_s19 = smov (!%p313_p11, %s792_s19), 7 }
  0x33   : > { %v919_v35 = vld [vmem:[%s1256_s0 + $0x8] sm:$0xff]   ;;  %v920_v36 = vld [vmem:[%s1256_s0 + $0x18] sm:$0xff]   ;;  %v347_v38 = vshrl.u32 %v346_v37, 7  ;;  %s315_s24 = scalar_lea.vmem %s1258_s2, %s1268_s19  ;;  %s835_s26 = sshll.u32 (%p1049_p6), %s983_s14, 4 }
  0x34   : > { %463 = vmatpush1.bf16.msra.mxu0 %v898_v20  ;;  %845 = vmatpush1.bf16.msra.mxu1 %v898_v20  ;;  %v344_v40 = vld [vmem:[%s315_s24] sm:$0x3]  ;;  %s641_s29 = scalar_lea.vmem (%p1049_p6), %s1259_s3, %s835_s26 }
  0x35   : > { %464 = vmatprep.subr.bf16.mxu0 %v899_v21  ;;  %838 = vmatprep.subr.bf16.mxu1 %v899_v21  ;;  %v348_v39 = vsub.s32 0, %v347_v38  ;;  %v352_v41 = vsub.s32 1, %v347_v38 }
  0x37   : > { %v349_v42 = vrot.slane %v344_v40, %v348_v39  ;;  %v353_v45 = vrot.slane %v344_v40, %v352_v41 }
  0x38   : > { %465 = vmatpush1.bf16.msra.mxu0 %v901_v22  ;;  %846 = vmatpush1.bf16.msra.mxu1 %v901_v22 }
  0x39   : > { %466 = vmatprep.subr.bf16.mxu0 %v902_v23  ;;  %839 = vmatprep.subr.bf16.mxu1 %v902_v23 }
  0x3c   : > { %467 = vmatpush1.bf16.msra.mxu0 %v904_v24  ;;  %847 = vmatpush1.bf16.msra.mxu1 %v904_v24 }
  0x3d   : > { %468 = vmatprep.subr.bf16.mxu0 %v905_v25  ;;  %840 = vmatprep.subr.bf16.mxu1 %v905_v25 }
  0x40   : > { %469 = vmatpush1.bf16.msra.mxu0 %v907_v26  ;;  %848 = vmatpush1.bf16.msra.mxu1 %v907_v26 }
  0x41   : > { %470 = vmatprep.subr.bf16.mxu0 %v908_v27  ;;  %841 = vmatprep.subr.bf16.mxu1 %v908_v27 }
  0x44   : > { %471 = vmatpush1.bf16.msra.mxu0 %v910_v28  ;;  %849 = vmatpush1.bf16.msra.mxu1 %v910_v28 }
  0x45   : > { %472 = vmatprep.subr.bf16.mxu0 %v911_v29  ;;  %842 = vmatprep.subr.bf16.mxu1 %v911_v29 }
  0x48   : > { %473 = vmatpush1.bf16.msra.mxu0 %v913_v30  ;;  %850 = vmatpush1.bf16.msra.mxu1 %v913_v30 }
  0x49   : > { %474 = vmatprep.subr.bf16.mxu0 %v914_v31  ;;  %843 = vmatprep.subr.bf16.mxu1 %v914_v31 }
  0x4c   : > { %475 = vmatpush1.bf16.msra.mxu0 %v916_v32  ;;  %851 = vmatpush1.bf16.msra.mxu1 %v916_v32 }
  0x4f   : > { %493 = vmatmul.mubr.bf16.vlgmr.msra.gmra.mxu0 %v917_v33  ;;  %513 = vmatmul.mubr.bf16.vlgmr.msra.gmra.mxu1 %v918_v34 }
  0x50   : > { %502 = vmatprep.mubr.bf16.mxu0 %v993_v16  ;;  %522 = vmatprep.mubr.bf16.mxu1 %v993_v16 }
  0x57   : > { %503 = vmatmul.mubr.bf16.gmra.mxu0 %v919_v35  ;;  %523 = vmatmul.mubr.bf16.gmra.mxu1 %v920_v36 }
 0x10f   : > { %v494_v43 = vpop.f32.mrf.mxu0  ;;  %v514_v44 = vpop.f32.mrf.mxu1 }
 0x110   : > { %v1120_v46 = vadd.f32 %v494_v43, %v349_v42  ;;  %v1122_v47 = vadd.f32 %v514_v44, %v349_v42 }
 0x111   : > { %v496_v48 = vpop.f32.mrf.mxu0  ;;  %v516_v49 = vpop.f32.mrf.mxu1 }
 0x112   : > { %v549_v50 = vmul.f32 1.442695, %v1120_v46  ;;  %v565_v51 = vmul.f32 1.442695, %v1122_v47  ;;  %v1126_v52 = vadd.f32 %v496_v48, %v353_v45  ;;  %v1128_v53 = vadd.f32 %v516_v49, %v353_v45 }
 0x113   : > { %v498_v54 = vpop.f32.mrf.mxu0  ;;  %v518_v55 = vpop.f32.mrf.mxu1  ;;  %vm533_vm0 = vcmp.gt.f32.partialorder %v1120_v46, 0.0  ;;  %vm541_vm1 = vcmp.gt.f32.partialorder %v1122_v47, 0.0 }
 0x114   : > { %921 = vpow2.f32 %v549_v50  ;;  %v1130_v56 = vadd.f32 %v498_v54, %v349_v42  ;;  %v1132_v57 = vadd.f32 %v518_v55, %v349_v42  ;;  %v551_v58 = vmul.f32 1.442695, %v1126_v52 }
 0x115   : > { %923 = vpow2.f32 %v565_v51  ;;  %v500_v59 = vpop.f32.mrf.mxu0  ;;  %v520_v60 = vpop.f32.mrf.mxu1  ;;  %v567_v61 = vmul.f32 1.442695, %v1128_v53  ;;  %vm534_vm2 = vcmp.gt.f32.partialorder %v1126_v52, 0.0  ;;  %vm542_vm3 = vcmp.gt.f32.partialorder %v1128_v53, 0.0 }
 0x116   : > { %v553_v62 = vmul.f32 1.442695, %v1130_v56  ;;  %925 = vpow2.f32 %v551_v58  ;;  %v569_v63 = vmul.f32 1.442695, %v1132_v57  ;;  %v1138_v0 = vadd.f32 %v500_v59, %v353_v45 }
 0x117   : > { %v1140_v1 = vadd.f32 %v520_v60, %v353_v45  ;;  %v504_v2 = vpop.f32.mrf.mxu0  ;;  %v524_v3 = vpop.f32.mrf.mxu1  ;;  %927 = vpow2.f32 %v567_v61  ;;  %vm535_vm4 = vcmp.gt.f32.partialorder %v1130_v56, 0.0  ;;  %vm543_vm5 = vcmp.gt.f32.partialorder %v1132_v57, 0.0 }
 0x118   : > { %v1142_v4 = vadd.f32 %v504_v2, %v349_v42  ;;  %v1144_v5 = vadd.f32 %v524_v3, %v349_v42  ;;  %929 = vpow2.f32 %v553_v62  ;;  %v555_v6 = vmul.f32 1.442695, %v1138_v0 }
 0x119   : > { %v506_v7 = vpop.f32.mrf.mxu0  ;;  %v526_v8 = vpop.f32.mrf.mxu1  ;;  %931 = vpow2.f32 %v569_v63  ;;  %v571_v9 = vmul.f32 1.442695, %v1140_v1  ;;  %vm536_vm6 = vcmp.gt.f32.partialorder %v1138_v0, 0.0  ;;  %vm544_vm7 = vcmp.gt.f32.partialorder %v1140_v1, 0.0 }
 0x11a   : > { %v557_v10 = vmul.f32 1.442695, %v1142_v4  ;;  %933 = vpow2.f32 %v555_v6  ;;  %v573_v11 = vmul.f32 1.442695, %v1144_v5  ;;  %v1150_v12 = vadd.f32 %v506_v7, %v353_v45 }
 0x11b   : > { %v508_v13 = vpop.f32.mrf.mxu0  ;;  %v528_v14 = vpop.f32.mrf.mxu1  ;;  %935 = vpow2.f32 %v571_v9  ;;  %v1152_v15 = vadd.f32 %v526_v8, %v353_v45  ;;  %vm537_vm8 = vcmp.gt.f32.partialorder %v1142_v4, 0.0  ;;  %vm545_vm9 = vcmp.gt.f32.partialorder %v1144_v5, 0.0 }
 0x11c   : > { %v1154_v16 = vadd.f32 %v508_v13, %v349_v42  ;;  %v1156_v17 = vadd.f32 %v528_v14, %v349_v42  ;;  %937 = vpow2.f32 %v557_v10  ;;  %v559_v18 = vmul.f32 1.442695, %v1150_v12 }
 0x11d   : > { %v510_v19 = vpop.f32.mrf.mxu0  ;;  %v530_v20 = vpop.f32.mrf.mxu1  ;;  %939 = vpow2.f32 %v573_v11  ;;  %v575_v21 = vmul.f32 1.442695, %v1152_v15  ;;  %vm538_vm10 = vcmp.gt.f32.partialorder %v1150_v12, 0.0  ;;  %vm546_vm11 = vcmp.gt.f32.partialorder %v1152_v15, 0.0 }
 0x11e   : > { %941 = vpow2.f32 %v559_v18  ;;  %v561_v22 = vmul.f32 1.442695, %v1154_v16  ;;  %v577_v23 = vmul.f32 1.442695, %v1156_v17  ;;  %v1162_v24 = vadd.f32 %v510_v19, %v353_v45 }
 0x11f   : > { %943 = vpow2.f32 %v575_v21  ;;  %v1164_v25 = vadd.f32 %v530_v20, %v353_v45  ;;  %vm539_vm12 = vcmp.gt.f32.partialorder %v1154_v16, 0.0  ;;  %vm547_vm13 = vcmp.gt.f32.partialorder %v1156_v17, 0.0 }
 0x120   : > { %945 = vpow2.f32 %v561_v22  ;;  %v563_v29 = vmul.f32 1.442695, %v1162_v24  ;;  %vm540_vm14 = vcmp.gt.f32.partialorder %v1162_v24, 0.0 }
 0x121   : > { %v922_v26 = vpop.eup %921  ;;  %947 = vpow2.f32 %v577_v23  ;;  %v579_v31 = vmul.f32 1.442695, %v1164_v25  ;;  %vm548_vm15 = vcmp.gt.f32.partialorder %v1164_v25, 0.0 }
 0x122   : > { %v924_v27 = vpop.eup %923  ;;  %v813_v28 = vadd.f32 -1.0, %v922_v26  ;;  %949 = vpow2.f32 %v563_v29 }
 0x123   : > { %v821_v30 = vadd.f32 -1.0, %v924_v27  ;;  %v926_v32 = vpop.eup %925  ;;  %951 = vpow2.f32 %v579_v31 }
 0x124   : > { %v597_v33 = vsel %vm533_vm0, %v1120_v46, %v813_v28  ;;  %v928_v34 = vpop.eup %927  ;;  %v814_v36 = vadd.f32 -1.0, %v926_v32 }
 0x125   : > { %613 = vst [vmem:[%s1172_s25] sm:$0xff] %v597_v33  ;;  %v605_v35 = vsel %vm541_vm1, %v1122_v47, %v821_v30  ;;  %v930_v37 = vpop.eup %929  ;;  %v822_v38 = vadd.f32 -1.0, %v928_v34 }
 0x126   : > { %621 = vst [vmem:[%s1172_s25 + $0x40] sm:$0xff] %v605_v35  ;;  %v932_v39 = vpop.eup %931  ;;  %v598_v40 = vsel %vm534_vm2, %v1126_v52, %v814_v36  ;;  %v815_v41 = vadd.f32 -1.0, %v930_v37 }
 0x127   : > { %v934_v42 = vpop.eup %933  ;;  %614 = vst [vmem:[%s1172_s25 + $0x8] sm:$0xff] %v598_v40  ;;  %v606_v43 = vsel %vm542_vm3, %v1128_v53, %v822_v38  ;;  %v823_v44 = vadd.f32 -1.0, %v932_v39 }
 0x128   : > { %v936_v45 = vpop.eup %935  ;;  %622 = vst [vmem:[%s1172_s25 + $0x48] sm:$0xff] %v606_v43  ;;  %v599_v46 = vsel %vm535_vm4, %v1130_v56, %v815_v41  ;;  %v816_v47 = vadd.f32 -1.0, %v934_v42 }
 0x129   : > { %v938_v48 = vpop.eup %937  ;;  %615 = vst [vmem:[%s1172_s25 + $0x10] sm:$0xff] %v599_v46  ;;  %v607_v49 = vsel %vm543_vm5, %v1132_v57, %v823_v44  ;;  %v824_v50 = vadd.f32 -1.0, %v936_v45 }
 0x12a   : > { %v940_v51 = vpop.eup %939  ;;  %623 = vst [vmem:[%s1172_s25 + $0x50] sm:$0xff] %v607_v49  ;;  %v600_v52 = vsel %vm536_vm6, %v1138_v0, %v816_v47  ;;  %v817_v53 = vadd.f32 -1.0, %v938_v48 }
 0x12b   : > { %v942_v54 = vpop.eup %941  ;;  %616 = vst [vmem:[%s1172_s25 + $0x18] sm:$0xff] %v600_v52  ;;  %v608_v55 = vsel %vm544_vm7, %v1140_v1, %v824_v50  ;;  %v825_v56 = vadd.f32 -1.0, %v940_v51 }
 0x12c   : > { %v944_v57 = vpop.eup %943  ;;  %624 = vst [vmem:[%s1172_s25 + $0x58] sm:$0xff] %v608_v55  ;;  %v601_v58 = vsel %vm537_vm8, %v1142_v4, %v817_v53  ;;  %v818_v59 = vadd.f32 -1.0, %v942_v54 }
 0x12d   : > { %v946_v60 = vpop.eup %945  ;;  %617 = vst [vmem:[%s1172_s25 + $0x20] sm:$0xff] %v601_v58  ;;  %v609_v61 = vsel %vm545_vm9, %v1144_v5, %v825_v56  ;;  %v826_v62 = vadd.f32 -1.0, %v944_v57  ;;  %v670_v20 = vld [vmem:[%s1172_s25 + $0x40] sm:$0xff] (%p1049_p6) }
 0x12e   : > { %v948_v63 = vpop.eup %947  ;;  %625 = vst [vmem:[%s1172_s25 + $0x60] sm:$0xff] %v609_v61  ;;  %v602_v0 = vsel %vm538_vm10, %v1150_v12, %v818_v59  ;;  %v819_v1 = vadd.f32 -1.0, %v946_v60  ;;  %v654_v12 = vld [vmem:[%s1172_s25] sm:$0xff] (%p1049_p6)  ;;  %v656_v13 = vld [vmem:[%s1172_s25 + $0x8] sm:$0xff] (%p1049_p6)  ;;  %671 = vst [vmem:[%s641_s29 + $0x100] sm:$0xff] (%p1049_p6), %v670_v20 }
 0x12f   : > { %618 = vst [vmem:[%s1172_s25 + $0x28] sm:$0xff] %v602_v0  ;;  %v610_v2 = vsel %vm546_vm11, %v1152_v15, %v826_v62  ;;  %v827_v3 = vadd.f32 -1.0, %v948_v63  ;;  %v950_v4 = vpop.eup %949  ;;  %655 = vst [vmem:[%s641_s29] sm:$0xff] (%p1049_p6), %v654_v12  ;;  %v672_v21 = vld [vmem:[%s1172_s25 + $0x48] sm:$0xff] (%p1049_p6) }
 0x130   : > { %626 = vst [vmem:[%s1172_s25 + $0x68] sm:$0xff] %v610_v2  ;;  %v603_v5 = vsel %vm539_vm12, %v1154_v16, %v819_v1  ;;  %v952_v6 = vpop.eup %951  ;;  %v820_v8 = vadd.f32 -1.0, %v950_v4  ;;  %635 = sbr.rel (!%p1049_p6) target bundleno = 317 (0x13d), region = 74  ;;  %v658_v14 = vld [vmem:[%s1172_s25 + $0x10] sm:$0xff] (%p1049_p6)  ;;  %657 = vst [vmem:[%s641_s29 + $0x8] sm:$0xff] (%p1049_p6), %v656_v13 }
 0x131   : > { %619 = vst [vmem:[%s1172_s25 + $0x30] sm:$0xff] %v603_v5  ;;  %v611_v7 = vsel %vm547_vm13, %v1156_v17, %v827_v3  ;;  %v828_v9 = vadd.f32 -1.0, %v952_v6  ;;  %659 = vst [vmem:[%s641_s29 + $0x40] sm:$0xff] (%p1049_p6), %v658_v14  ;;  %v674_v22 = vld [vmem:[%s1172_s25 + $0x50] sm:$0xff] (%p1049_p6) }
 0x132   : > { %627 = vst [vmem:[%s1172_s25 + $0x70] sm:$0xff] %v611_v7  ;;  %v604_v10 = vsel %vm540_vm14, %v1162_v24, %v820_v8  ;;  %v660_v15 = vld [vmem:[%s1172_s25 + $0x18] sm:$0xff] (%p1049_p6)  ;;  %673 = vst [vmem:[%s641_s29 + $0x108] sm:$0xff] (%p1049_p6), %v672_v21 }
 0x133   : > { %620 = vst [vmem:[%s1172_s25 + $0x38] sm:$0xff] %v604_v10  ;;  %v612_v11 = vsel %vm548_vm15, %v1164_v25, %v828_v9  ;;  %661 = vst [vmem:[%s641_s29 + $0x48] sm:$0xff] (%p1049_p6), %v660_v15  ;;  %v676_v23 = vld [vmem:[%s1172_s25 + $0x58] sm:$0xff] (%p1049_p6) }
 0x134   : > { %628 = vst [vmem:[%s1172_s25 + $0x78] sm:$0xff] %v612_v11  ;;  %v662_v16 = vld [vmem:[%s1172_s25 + $0x20] sm:$0xff] (%p1049_p6)  ;;  %675 = vst [vmem:[%s641_s29 + $0x140] sm:$0xff] (%p1049_p6), %v674_v22 }
 0x135   : > { %663 = vst [vmem:[%s641_s29 + $0x80] sm:$0xff] %v662_v16  ;;  %677 = vst [vmem:[%s641_s29 + $0x148] sm:$0xff] %v676_v23  ;;  %v678_v24 = vld [vmem:[%s1172_s25 + $0x60] sm:$0xff] }
 0x136   : > { %v664_v17 = vld [vmem:[%s1172_s25 + $0x28] sm:$0xff]  ;;  %679 = vst [vmem:[%s641_s29 + $0x180] sm:$0xff] %v678_v24 }
 0x137   : > { %665 = vst [vmem:[%s641_s29 + $0x88] sm:$0xff] %v664_v17  ;;  %v680_v25 = vld [vmem:[%s1172_s25 + $0x68] sm:$0xff] }
 0x138   : > { %v666_v18 = vld [vmem:[%s1172_s25 + $0x30] sm:$0xff]  ;;  %681 = vst [vmem:[%s641_s29 + $0x188] sm:$0xff] %v680_v25 }
 0x139   : > { %667 = vst [vmem:[%s641_s29 + $0xc0] sm:$0xff] %v666_v18  ;;  %v682_v26 = vld [vmem:[%s1172_s25 + $0x70] sm:$0xff] }
 0x13a   : > { %v668_v19 = vld [vmem:[%s1172_s25 + $0x38] sm:$0xff]  ;;  %683 = vst [vmem:[%s641_s29 + $0x1c0] sm:$0xff] %v682_v26 }
 0x13b   : > { %669 = vst [vmem:[%s641_s29 + $0xc8] sm:$0xff] %v668_v19  ;;  %v684_v27 = vld [vmem:[%s1172_s25 + $0x78] sm:$0xff] }
 0x13c   : > { %685 = vst [vmem:[%s641_s29 + $0x1c8] sm:$0xff] %v684_v27 }
 0x13d PF: > { %s13_s16 = sadd.s32 1, %s991_s16   ;;  %s1261_s12 = smov %s979_s13 }
 0x13e   : > { %p10_p12 = scmp.ge.s32.totalorder %s13_s16, 6   ;;  %s1262_s13 = smov %s1054_s22 }
 0x13f   : > { %s1263_s14 = smov %s987_s15  ;;  %s1264_s15 = smov %s1266_s17 }
 0x140   :  { %12 = sbr.rel (!%p10_p12) target bundleno = 3 (0x3), region = 134 }

// kernel: encoder_forward.10
= control target key start
LH: loop header
LB: loop body
LE: loop exit
PB: predicated region body
PF: predicated region fallthrough
CT: control target
= control target key end

     0   :  { %8 = vsyncpa [#allocation4], 0  ;;  %s1859_s0 = inlined_call_operand.vmem [shape: bf16[128,128], index: 0, kind: input, shape index: {}]   ;;  %s1860_s1 = inlined_call_operand.vmem [shape: bf16[128,1024], index: 1, kind: input, shape index: {}]   ;;  %s1861_s2 = inlined_call_operand.hbm [shape: f32[1,1024], index: 2, kind: input, shape index: {}]   ;;  %s1862_s3 = inlined_call_operand.vmem [shape: f32[128,1024], index: 3, kind: output, shape index: {}]  }
   0x1   :  { %10 = vsyncpa [#allocation4 + $0x1], 0  ;;  %s1357_s12 = smov 0   ;;  %s1359_s13 = smov 0  }
   0x2   :  { %s1361_s14 = smov 0   ;;  %s1363_s15 = smov 0  }
   0x3   :  { %s1365_s16 = smov 0   ;;  %s1367_s17 = smov 0  }
   0x4 LB: > { %s1015_s18 = sadd.s32 4294967295, %s1333_s17   ;;  %s25_s19 = sadd.s32 1, %s1329_s16  ;;  %s1333_s17 = sphi %s1367_s17, %s16_s17   ;;  %s1329_s16 = sphi %s1365_s16, %s1870_s16   ;;  %s1325_s15 = sphi %s1363_s15, %s1869_s15   ;;  %s1321_s14 = sphi %s1361_s14, %s1868_s14   ;;  %s1317_s13 = sphi %s1359_s13, %s1867_s13   ;;  %s1313_s12 = sphi %s1357_s12, %s1866_s12  }
   0x5   : > { %p26_p0 = scmp.ge.s32.totalorder %s25_s19, 4  ;;  %s61_s20 = sadd.s32 1, %s1321_s14 }
   0x6   : > { %p68_p1 = scmp.ne.s32.totalorder %s1321_s14, %s1317_s13  ;;  %p69_p2 = scmp.eq.s32.totalorder %s1333_s17, 0 }
   0x7   : > { %s1872_s19 = smov (%p26_p0, %s25_s19), 0  ;;  %p100_p4 = scmp.ne.s32.totalorder %s1317_s13, %s1313_s12 }
   0x8   : > { %p1393_p3 = por %p69_p2, %p68_p1  ;;  %s58_s22 = ssub.s32 %s1329_s16, %s1872_s19 }
   0x9   : > { %p101_p5 = scmp.eq.s32.totalorder %s1015_s18, 0  ;;  %p59_p6 = scmp.eq.s32.totalorder %s58_s22, 0 }
   0xa   : > { %p126_p7 = scmp.eq.s32.totalorder %s1015_s18, 3  ;;  %p1019_p10 = scmp.ge.s32.totalorder %s1333_s17, 4 }
   0xb   : > { %p1400_p8 = por %p101_p5, %p100_p4 }
   0xc   : > { %s1405_s24 = scalar_select %p59_p6, %s1321_s14, %s61_s20  }
   0xd   : > { %p1407_p9 = por %p126_p7, %p68_p1  ;;  %157 = sbr.rel (%p1019_p10) target bundleno = 53 (0x35), region = 20 }
  0x12   : > { %160 = sbr.rel (!%p1393_p3) target bundleno = 38 (0x26), region = 24  ;;  %s162_s26 = sand.u32 (%p1393_p3), 1, %s1321_s14  }
  0x13   : > { %s1091_s27 = sshll.u32 (%p1393_p3), %s1329_s16, 3  ;;  %s1020_s28 = sshll.u32 (%p1393_p3), %s162_s26, 7 }
  0x14   : > { %s1419_s4 = scalar_lea.vmem (%p1393_p3), %s1860_s1, %s1091_s27  ;;  %s164_s5 = scalar_lea.vmem (%p1393_p3), [#allocation2], %s1020_s28 }
  0x15   : > { %v226_v0 = vld [vmem:[%s1419_s4] sm:$0xff] (%p1393_p3) }
  0x16   : > { %v228_v1 = vld [vmem:[%s1419_s4 + $0x20] sm:$0xff] (%p1393_p3)  ;;  %227 = vst [vmem:[%s164_s5] sm:$0xff] (%p1393_p3), %v226_v0 }
  0x17   : > { %v230_v2 = vld [vmem:[%s1419_s4 + $0x40] sm:$0xff]  ;;  %229 = vst [vmem:[%s164_s5 + $0x8] sm:$0xff] %v228_v1 }
  0x18   : > { %231 = vst [vmem:[%s164_s5 + $0x10] sm:$0xff] %v230_v2  ;;  %v232_v3 = vld [vmem:[%s1419_s4 + $0x60] sm:$0xff] }
  0x19   : > { %v234_v4 = vld [vmem:[%s1419_s4 + $0x80] sm:$0xff]  ;;  %233 = vst [vmem:[%s164_s5 + $0x18] sm:$0xff] %v232_v3 }
  0x1a   : > { %v236_v5 = vld [vmem:[%s1419_s4 + $0xa0] sm:$0xff]  ;;  %235 = vst [vmem:[%s164_s5 + $0x20] sm:$0xff] %v234_v4 }
  0x1b   : > { %237 = vst [vmem:[%s164_s5 + $0x28] sm:$0xff] %v236_v5  ;;  %v238_v6 = vld [vmem:[%s1419_s4 + $0xc0] sm:$0xff] }
  0x1c   : > { %v240_v7 = vld [vmem:[%s1419_s4 + $0xe0] sm:$0xff]  ;;  %239 = vst [vmem:[%s164_s5 + $0x30] sm:$0xff] %v238_v6 }
  0x1d   : > { %v242_v8 = vld [vmem:[%s1419_s4 + $0x100] sm:$0xff]  ;;  %241 = vst [vmem:[%s164_s5 + $0x38] sm:$0xff] %v240_v7 }
  0x1e   : > { %243 = vst [vmem:[%s164_s5 + $0x40] sm:$0xff] %v242_v8  ;;  %v244_v9 = vld [vmem:[%s1419_s4 + $0x120] sm:$0xff] }
  0x1f   : > { %v246_v10 = vld [vmem:[%s1419_s4 + $0x140] sm:$0xff]  ;;  %245 = vst [vmem:[%s164_s5 + $0x48] sm:$0xff] %v244_v9 }
  0x20   : > { %v248_v11 = vld [vmem:[%s1419_s4 + $0x160] sm:$0xff]  ;;  %247 = vst [vmem:[%s164_s5 + $0x50] sm:$0xff] %v246_v10 }
  0x21   : > { %249 = vst [vmem:[%s164_s5 + $0x58] sm:$0xff] %v248_v11  ;;  %v250_v12 = vld [vmem:[%s1419_s4 + $0x180] sm:$0xff] }
  0x22   : > { %v252_v13 = vld [vmem:[%s1419_s4 + $0x1a0] sm:$0xff]  ;;  %251 = vst [vmem:[%s164_s5 + $0x60] sm:$0xff] %v250_v12 }
  0x23   : > { %v254_v14 = vld [vmem:[%s1419_s4 + $0x1c0] sm:$0xff]  ;;  %253 = vst [vmem:[%s164_s5 + $0x68] sm:$0xff] %v252_v13 }
  0x24   : > { %255 = vst [vmem:[%s164_s5 + $0x70] sm:$0xff] %v254_v14  ;;  %v256_v15 = vld [vmem:[%s1419_s4 + $0x1e0] sm:$0xff] }
  0x25   : > { %257 = vst [vmem:[%s164_s5 + $0x78] sm:$0xff] %v256_v15 }
  0x26 PF: > { %s264_s6 = sand.u32 1, %s1321_s14   ;;  %s1092_s7 = sshll.u32 %s1329_s16, 5 }
  0x27   : > { %s1023_s8 = sshll.u32 %s264_s6, 1  ;;  %s274_s11 = scalar_lea.hbm %s1861_s2, %s1092_s7 }
  0x28   : > { %s268_s12 = scalar_lea.vmem [#allocation3], %s1023_s8  ;;  %s265_s20 = scalar_lea.sflag [#allocation4], %s264_s6 }
  0x29   : > { %s276_s18 = sshll.u32 %s268_s12, 4  ;;  %s1335_s26 = smov [#allocation3]   ;;  %s277_s18 = int_to_ptr.vmem [resolvable:$true] %s276_s18 }
  0x2a   : > { %s1269_s22 = scalar_lea.vmem %s277_s18, 32  ;;  %s1273_s27 = sshll.u32 %s1335_s26, 4  ;;  %s1274_s27 = int_to_ptr.vmem [resolvable:$false] %s1273_s27 }
  0x2b   : > { %p1270_p11 = scmp.ne.s32.totalorder %s277_s18, %s1269_s22  ;;  %s1275_s28 = scalar_lea.vmem %s1274_s27, 64 }
  0x2c   : > { %p1276_p0 = scmp.lt.s32.totalorder %s277_s18, %s1274_s27  ;;  %p1277_p1 = scmp.lt.s32.totalorder %s1275_s28, %s1269_s22 }
  0x2d   : > { %p1271_p12 = pnand %p1270_p11, %p1393_p3 }
  0x2e   : > { %p1278_p2 = por %p1277_p1, %p1276_p0 }
  0x2f   : > { %p1272_p13 = pneg %p1271_p12 }
  0x31   : > { %p1279_p4 = pnand %p1278_p2, %p1272_p13 }
  0x33   : > { %1282 = shalt.err (!%p1279_p4)
}
  0x34   : > { %1110 = dma.hbm_to_vmem [thread:$0]  (%p1393_p3), %s274_s11, 32, %s277_s18, %s265_s20  }
  0x35 PF: > { %p1026_p5 = scmp.ge.s32.totalorder %s1333_s17, 1  ;;  %p281_p6 = scmp.lt.s32.totalorder %s1333_s17, 5 }
  0x37   : > { %p282_p7 = pnand %p1026_p5, %p281_p6 }
  0x38   : > { %s1449_s29 = sand.u32 (!%p282_p7), 1, %s1317_s13  }
  0x39   : > { %285 = sbr.rel (%p282_p7) target bundleno = 360 (0x168), region = 66  ;;  %s1027_s30 = sshll.u32 (!%p282_p7), %s1449_s29, 7 }
  0x3a   : > { %s1028_s4 = sshll.u32 (!%p282_p7), %s1449_s29, 1  ;;  %s1453_s5 = scalar_lea.vmem (!%p282_p7), [#allocation2], %s1027_s30 }
  0x3b   : > { %s295_s21 = scalar_lea.sflag (!%p282_p7), [#allocation4], %s1449_s29  ;;  %s1456_s6 = scalar_lea.vmem (!%p282_p7), [#allocation3], %s1028_s4 }
  0x3e   : > { %1308 = dma.done.wait (%p1400_p8), %s295_s21, 32  }
  0x3f   : > { %1310 = vsyncadd (%p1400_p8), %s295_s21, 4294967264  ;;  %v1336_v16 = vmov 0   ;;  %v1161_v17 = vld [vmem:[%s1453_s5 + $0x74] ss:$8 sps:$4 sm:$0xff]   ;;  %v1163_v18 = vld [vmem:[%s1453_s5 + $0x70] ss:$8 sps:$4 sm:$0xff]   ;;  %v374_v41 = vlaneseq }
  0x40   : > { %544 = vmatprep.mubr.bf16.mxu0 %v1336_v16  ;;  %584 = vmatprep.mubr.bf16.mxu1 %v1336_v16  ;;  %v1164_v19 = vld [vmem:[%s1453_s5 + $0x64] ss:$8 sps:$4 sm:$0xff]   ;;  %v1166_v20 = vld [vmem:[%s1453_s5 + $0x60] ss:$8 sps:$4 sm:$0xff]   ;;  %v1167_v21 = vld [vmem:[%s1453_s5 + $0x54] ss:$8 sps:$4 sm:$0xff]  }
  0x41   : > { %512 = vmatprep.subr.bf16.mxu0 %v1161_v17  ;;  %1094 = vmatprep.subr.bf16.mxu1 %v1161_v17  ;;  %v1169_v22 = vld [vmem:[%s1453_s5 + $0x50] ss:$8 sps:$4 sm:$0xff]   ;;  %v1170_v23 = vld [vmem:[%s1453_s5 + $0x44] ss:$8 sps:$4 sm:$0xff]   ;;  %v1172_v24 = vld [vmem:[%s1453_s5 + $0x40] ss:$8 sps:$4 sm:$0xff]  }
  0x42   : > { %513 = vmatpush1.bf16.msra.mxu0 %v1163_v18  ;;  %1102 = vmatpush1.bf16.msra.mxu1 %v1163_v18  ;;  %v1173_v25 = vld [vmem:[%s1453_s5 + $0x34] ss:$8 sps:$4 sm:$0xff]   ;;  %v1175_v26 = vld [vmem:[%s1453_s5 + $0x30] ss:$8 sps:$4 sm:$0xff]   ;;  %v1176_v27 = vld [vmem:[%s1453_s5 + $0x24] ss:$8 sps:$4 sm:$0xff]  }
  0x43   : > { %514 = vmatprep.subr.bf16.mxu0 %v1164_v19  ;;  %1095 = vmatprep.subr.bf16.mxu1 %v1164_v19  ;;  %v1178_v28 = vld [vmem:[%s1453_s5 + $0x20] ss:$8 sps:$4 sm:$0xff]   ;;  %v1179_v29 = vld [vmem:[%s1453_s5 + $0x14] ss:$8 sps:$4 sm:$0xff]   ;;  %v1181_v30 = vld [vmem:[%s1453_s5 + $0x10] ss:$8 sps:$4 sm:$0xff]  }
  0x44   : > { %v1182_v31 = vld [vmem:[%s1453_s5 + $0x4] ss:$8 sps:$4 sm:$0xff]   ;;  %v1184_v32 = vld [vmem:[%s1453_s5] ss:$8 sps:$4 sm:$0xff]   ;;  %v1189_v37 = vld [vmem:[%s1859_s0 + $0x10] sm:$0xff]   ;;  %v375_v42 = vshrl.u32 %v374_v41, 7 }
  0x45   : > { %v1185_v33 = vld [vmem:[%s1859_s0] sm:$0xff]   ;;  %v1187_v35 = vld [vmem:[%s1859_s0 + $0x8] sm:$0xff]   ;;  %v1190_v38 = vld [vmem:[%s1859_s0 + $0x30] sm:$0xff]   ;;  %s1029_s21 = sshll.u32 %s1449_s29, 8  ;;  %s1093_s29 = sshll.u32 (%p1407_p9), %s1325_s15, 4 }
  0x46   : > { %515 = vmatpush1.bf16.msra.mxu0 %v1166_v20  ;;  %1103 = vmatpush1.bf16.msra.mxu1 %v1166_v20  ;;  %v1186_v34 = vld [vmem:[%s1859_s0 + $0x20] sm:$0xff]   ;;  %v1188_v36 = vld [vmem:[%s1859_s0 + $0x28] sm:$0xff]   ;;  %v1191_v39 = vld [vmem:[%s1859_s0 + $0x18] sm:$0xff]   ;;  %v376_v43 = vsub.s32 0, %v375_v42  ;;  %v380_v45 = vsub.s32 1, %v375_v42  ;;  %s1778_s8 = scalar_lea.vmem (%p1407_p9), %s1862_s3, %s1093_s29 }
  0x47   : > { %516 = vmatprep.subr.bf16.mxu0 %v1167_v21  ;;  %1096 = vmatprep.subr.bf16.mxu1 %v1167_v21  ;;  %v1192_v40 = vld [vmem:[%s1859_s0 + $0x38] sm:$0xff]   ;;  %v372_v44 = vld [vmem:[%s1456_s6] sm:$0x3]  ;;  %s1601_s6 = scalar_lea.vmem [#allocation5], %s1029_s21 }
  0x48   : > { %v1511_v46 = vrot.slane %v372_v44, %v376_v43  ;;  %v1513_v49 = vrot.slane %v372_v44, %v380_v45 }
  0x4a   : > { %517 = vmatpush1.bf16.msra.mxu0 %v1169_v22  ;;  %1104 = vmatpush1.bf16.msra.mxu1 %v1169_v22 }
  0x4b   : > { %518 = vmatprep.subr.bf16.mxu0 %v1170_v23  ;;  %1097 = vmatprep.subr.bf16.mxu1 %v1170_v23 }
  0x4e   : > { %519 = vmatpush1.bf16.msra.mxu0 %v1172_v24  ;;  %1105 = vmatpush1.bf16.msra.mxu1 %v1172_v24 }
  0x4f   : > { %520 = vmatprep.subr.bf16.mxu0 %v1173_v25  ;;  %1098 = vmatprep.subr.bf16.mxu1 %v1173_v25 }
  0x52   : > { %521 = vmatpush1.bf16.msra.mxu0 %v1175_v26  ;;  %1106 = vmatpush1.bf16.msra.mxu1 %v1175_v26 }
  0x53   : > { %522 = vmatprep.subr.bf16.mxu0 %v1176_v27  ;;  %1099 = vmatprep.subr.bf16.mxu1 %v1176_v27 }
  0x56   : > { %523 = vmatpush1.bf16.msra.mxu0 %v1178_v28  ;;  %1107 = vmatpush1.bf16.msra.mxu1 %v1178_v28 }
  0x57   : > { %524 = vmatprep.subr.bf16.mxu0 %v1179_v29  ;;  %1100 = vmatprep.subr.bf16.mxu1 %v1179_v29 }
  0x5a   : > { %525 = vmatpush1.bf16.msra.mxu0 %v1181_v30  ;;  %1108 = vmatpush1.bf16.msra.mxu1 %v1181_v30 }
  0x5b   : > { %526 = vmatprep.subr.bf16.mxu0 %v1182_v31  ;;  %1101 = vmatprep.subr.bf16.mxu1 %v1182_v31 }
  0x5e   : > { %527 = vmatpush1.bf16.msra.mxu0 %v1184_v32  ;;  %1109 = vmatpush1.bf16.msra.mxu1 %v1184_v32 }
  0x61   : > { %545 = vmatmul.mubr.bf16.vlgmr.msra.gmra.mxu0 %v1185_v33  ;;  %585 = vmatmul.mubr.bf16.vlgmr.msra.gmra.mxu1 %v1186_v34 }
  0x62   : > { %554 = vmatprep.mubr.bf16.mxu0 %v1336_v16  ;;  %594 = vmatprep.mubr.bf16.mxu1 %v1336_v16 }
  0x69   : > { %555 = vmatmul.mubr.bf16.gmra.mxu0 %v1187_v35  ;;  %595 = vmatmul.mubr.bf16.gmra.mxu1 %v1188_v36 }
  0x6a   : > { %564 = vmatprep.mubr.bf16.mxu0 %v1336_v16  ;;  %604 = vmatprep.mubr.bf16.mxu1 %v1336_v16 }
  0x71   : > { %565 = vmatmul.mubr.bf16.gmra.mxu0 %v1189_v37  ;;  %605 = vmatmul.mubr.bf16.gmra.mxu1 %v1190_v38 }
  0x72   : > { %574 = vmatprep.mubr.bf16.mxu0 %v1336_v16  ;;  %614 = vmatprep.mubr.bf16.mxu1 %v1336_v16 }
  0x79   : > { %575 = vmatmul.mubr.bf16.gmra.mxu0 %v1191_v39  ;;  %615 = vmatmul.mubr.bf16.gmra.mxu1 %v1192_v40 }
 0x121   : > { %v546_v47 = vpop.f32.mrf.mxu0  ;;  %v586_v48 = vpop.f32.mrf.mxu1 }
 0x122   : > { %v1516_v50 = vadd.f32 %v546_v47, %v1511_v46  ;;  %v1519_v51 = vadd.f32 %v586_v48, %v1511_v46 }
 0x123   : > { %v548_v52 = vpop.f32.mrf.mxu0  ;;  %v588_v53 = vpop.f32.mrf.mxu1 }
 0x124   : > { %v657_v54 = vmul.f32 1.442695, %v1516_v50  ;;  %v689_v55 = vmul.f32 1.442695, %v1519_v51  ;;  %v1524_v56 = vadd.f32 %v548_v52, %v1513_v49  ;;  %v1527_v57 = vadd.f32 %v588_v53, %v1513_v49 }
 0x125   : > { %v550_v58 = vpop.f32.mrf.mxu0  ;;  %v590_v59 = vpop.f32.mrf.mxu1  ;;  %vm625_vm0 = vcmp.gt.f32.partialorder %v1516_v50, 0.0  ;;  %vm641_vm1 = vcmp.gt.f32.partialorder %v1519_v51, 0.0 }
 0x126   : > { %1193 = vpow2.f32 %v657_v54  ;;  %v1530_v60 = vadd.f32 %v550_v58, %v1511_v46  ;;  %v1533_v61 = vadd.f32 %v590_v59, %v1511_v46  ;;  %v659_v62 = vmul.f32 1.442695, %v1524_v56 }
 0x127   : > { %1195 = vpow2.f32 %v689_v55  ;;  %v552_v63 = vpop.f32.mrf.mxu0  ;;  %v592_v0 = vpop.f32.mrf.mxu1  ;;  %v691_v1 = vmul.f32 1.442695, %v1527_v57  ;;  %vm626_vm2 = vcmp.gt.f32.partialorder %v1524_v56, 0.0  ;;  %vm642_vm3 = vcmp.gt.f32.partialorder %v1527_v57, 0.0 }
 0x128   : > { %v661_v2 = vmul.f32 1.442695, %v1530_v60  ;;  %1197 = vpow2.f32 %v659_v62  ;;  %v693_v3 = vmul.f32 1.442695, %v1533_v61  ;;  %v1540_v4 = vadd.f32 %v552_v63, %v1513_v49 }
 0x129   : > { %v1543_v5 = vadd.f32 %v592_v0, %v1513_v49  ;;  %v556_v6 = vpop.f32.mrf.mxu0  ;;  %v596_v7 = vpop.f32.mrf.mxu1  ;;  %1199 = vpow2.f32 %v691_v1  ;;  %vm627_vm4 = vcmp.gt.f32.partialorder %v1530_v60, 0.0  ;;  %vm643_vm5 = vcmp.gt.f32.partialorder %v1533_v61, 0.0 }
 0x12a   : > { %v1546_v8 = vadd.f32 %v556_v6, %v1511_v46  ;;  %v1549_v9 = vadd.f32 %v596_v7, %v1511_v46  ;;  %1201 = vpow2.f32 %v661_v2  ;;  %v663_v10 = vmul.f32 1.442695, %v1540_v4 }
 0x12b   : > { %v558_v11 = vpop.f32.mrf.mxu0  ;;  %v598_v12 = vpop.f32.mrf.mxu1  ;;  %1203 = vpow2.f32 %v693_v3  ;;  %v695_v13 = vmul.f32 1.442695, %v1543_v5  ;;  %vm628_vm6 = vcmp.gt.f32.partialorder %v1540_v4, 0.0  ;;  %vm644_vm7 = vcmp.gt.f32.partialorder %v1543_v5, 0.0 }
 0x12c   : > { %v665_v14 = vmul.f32 1.442695, %v1546_v8  ;;  %1205 = vpow2.f32 %v663_v10  ;;  %v697_v15 = vmul.f32 1.442695, %v1549_v9  ;;  %v1556_v16 = vadd.f32 %v558_v11, %v1513_v49 }
 0x12d   : > { %v560_v17 = vpop.f32.mrf.mxu0  ;;  %v600_v18 = vpop.f32.mrf.mxu1  ;;  %1207 = vpow2.f32 %v695_v13  ;;  %v1559_v19 = vadd.f32 %v598_v12, %v1513_v49  ;;  %vm629_vm8 = vcmp.gt.f32.partialorder %v1546_v8, 0.0  ;;  %vm645_vm9 = vcmp.gt.f32.partialorder %v1549_v9, 0.0 }
 0x12e   : > { %v1562_v20 = vadd.f32 %v560_v17, %v1511_v46  ;;  %v1565_v21 = vadd.f32 %v600_v18, %v1511_v46  ;;  %1209 = vpow2.f32 %v665_v14  ;;  %v667_v22 = vmul.f32 1.442695, %v1556_v16 }
 0x12f   : > { %v562_v23 = vpop.f32.mrf.mxu0  ;;  %v602_v24 = vpop.f32.mrf.mxu1  ;;  %1211 = vpow2.f32 %v697_v15  ;;  %v699_v25 = vmul.f32 1.442695, %v1559_v19  ;;  %vm630_vm10 = vcmp.gt.f32.partialorder %v1556_v16, 0.0  ;;  %vm646_vm11 = vcmp.gt.f32.partialorder %v1559_v19, 0.0 }
 0x130   : > { %1213 = vpow2.f32 %v667_v22  ;;  %v669_v26 = vmul.f32 1.442695, %v1562_v20  ;;  %v701_v27 = vmul.f32 1.442695, %v1565_v21  ;;  %v1576_v30 = vadd.f32 %v562_v23, %v1513_v49 }
 0x131   : > { %v566_v28 = vpop.f32.mrf.mxu0  ;;  %v606_v29 = vpop.f32.mrf.mxu1  ;;  %1215 = vpow2.f32 %v699_v25  ;;  %v1579_v31 = vadd.f32 %v602_v24, %v1513_v49  ;;  %vm631_vm12 = vcmp.gt.f32.partialorder %v1562_v20, 0.0  ;;  %vm647_vm13 = vcmp.gt.f32.partialorder %v1565_v21, 0.0 }
 0x132   : > { %v1582_v32 = vadd.f32 %v566_v28, %v1511_v46  ;;  %1217 = vpow2.f32 %v669_v26  ;;  %v1587_v34 = vadd.f32 %v606_v29, %v1511_v46  ;;  %v671_v39 = vmul.f32 1.442695, %v1576_v30 }
 0x133   : > { %v1194_v33 = vpop.eup %1193  ;;  %v568_v35 = vpop.f32.mrf.mxu0  ;;  %1219 = vpow2.f32 %v701_v27  ;;  %v703_v41 = vmul.f32 1.442695, %v1579_v31  ;;  %vm632_vm14 = vcmp.gt.f32.partialorder %v1576_v30, 0.0  ;;  %vm648_vm15 = vcmp.gt.f32.partialorder %v1579_v31, 0.0 }
 0x134   : > { %v608_v36 = vpop.f32.mrf.mxu1  ;;  %v1196_v37 = vpop.eup %1195  ;;  %v1054_v38 = vadd.f32 -1.0, %v1194_v33  ;;  %1221 = vpow2.f32 %v671_v39  ;;  %v673_v45 = vmul.f32 1.442695, %v1582_v32  ;;  %v1610_v59 = vadd.f32 %v568_v35, %v1513_v49 }
 0x135   : > { %v1070_v40 = vadd.f32 -1.0, %v1196_v37  ;;  %v570_v42 = vpop.f32.mrf.mxu0  ;;  %v1198_v43 = vpop.eup %1197  ;;  %1223 = vpow2.f32 %v703_v41  ;;  %v1613_v62 = vadd.f32 %v608_v36, %v1513_v49 }
 0x136   : > { %v753_v44 = vsel %vm625_vm0, %v1516_v50, %v1054_v38  ;;  %v610_v47 = vpop.f32.mrf.mxu1  ;;  %v1200_v48 = vpop.eup %1199  ;;  %v1055_v53 = vadd.f32 -1.0, %v1198_v43  ;;  %v705_v50 = vmul.f32 1.442695, %v1587_v34  ;;  %1225 = vpow2.f32 %v673_v45 }
 0x137   : > { %785 = vst [vmem:[%s1601_s6] sm:$0xff] %v753_v44  ;;  %v769_v52 = vsel %vm641_vm1, %v1519_v51, %v1070_v40  ;;  %v572_v54 = vpop.f32.mrf.mxu0  ;;  %v1202_v55 = vpop.eup %1201  ;;  %v1071_v58 = vadd.f32 -1.0, %v1200_v48  ;;  %v1619_v1 = vadd.f32 %v570_v42, %v1511_v46  ;;  %v675_v7 = vmul.f32 1.442695, %v1610_v59 }
 0x138   : > { %801 = vst [vmem:[%s1601_s6 + $0x80] sm:$0xff] %v769_v52  ;;  %v1204_v63 = vpop.eup %1203  ;;  %v754_v51 = vsel %vm626_vm2, %v1524_v56, %v1055_v53  ;;  %v1056_v0 = vadd.f32 -1.0, %v1202_v55  ;;  %1227 = vpow2.f32 %v705_v50  ;;  %v612_v10 = vpop.f32.mrf.mxu1  ;;  %v1648_v26 = vadd.f32 %v610_v47, %v1511_v46 }
 0x139   : > { %v1206_v2 = vpop.eup %1205  ;;  %786 = vst [vmem:[%s1601_s6 + $0x8] sm:$0xff] %v754_v51  ;;  %v770_v3 = vsel %vm642_vm3, %v1527_v57, %v1071_v58  ;;  %v1072_v6 = vadd.f32 -1.0, %v1204_v63  ;;  %v576_v56 = vpop.f32.mrf.mxu0  ;;  %v707_v57 = vmul.f32 1.442695, %v1613_v62  ;;  %1229 = vpow2.f32 %v675_v7 }
 0x13a   : > { %v1208_v11 = vpop.eup %1207  ;;  %802 = vst [vmem:[%s1601_s6 + $0x88] sm:$0xff] %v770_v3  ;;  %v755_v12 = vsel %vm627_vm4, %v1530_v60, %v1056_v0  ;;  %v1057_v13 = vadd.f32 -1.0, %v1206_v2  ;;  %v677_v23 = vmul.f32 1.442695, %v1619_v1  ;;  %v1651_v27 = vadd.f32 %v572_v54, %v1513_v49 }
 0x13b   : > { %v1210_v14 = vpop.eup %1209  ;;  %787 = vst [vmem:[%s1601_s6 + $0x10] sm:$0xff] %v755_v12  ;;  %v771_v15 = vsel %vm643_vm5, %v1533_v61, %v1072_v6  ;;  %v1073_v17 = vadd.f32 -1.0, %v1208_v11  ;;  %1231 = vpow2.f32 %v707_v57  ;;  %v578_v28 = vpop.f32.mrf.mxu0  ;;  %v709_v39 = vmul.f32 1.442695, %v1648_v26 }
 0x13c   : > { %v1212_v18 = vpop.eup %1211  ;;  %803 = vst [vmem:[%s1601_s6 + $0x90] sm:$0xff] %v771_v15  ;;  %v756_v60 = vsel %vm628_vm6, %v1540_v4, %v1057_v13  ;;  %v1058_v22 = vadd.f32 -1.0, %v1210_v14  ;;  %v616_v4 = vpop.f32.mrf.mxu1  ;;  %1233 = vpow2.f32 %v677_v23  ;;  %v679_v42 = vmul.f32 1.442695, %v1651_v27 }
 0x13d   : > { %v1214_v24 = vpop.eup %1213  ;;  %788 = vst [vmem:[%s1601_s6 + $0x18] sm:$0xff] %v756_v60  ;;  %v772_v61 = vsel %vm644_vm7, %v1543_v5, %v1073_v17  ;;  %v1074_v25 = vadd.f32 -1.0, %v1212_v18  ;;  %v1658_v5 = vadd.f32 %v612_v10, %v1513_v49  ;;  %1235 = vpow2.f32 %v709_v39  ;;  %v580_v45 = vpop.f32.mrf.mxu0 }
 0x13e   : > { %v1216_v29 = vpop.eup %1215  ;;  %804 = vst [vmem:[%s1601_s6 + $0x98] sm:$0xff] %v772_v61  ;;  %v757_v33 = vsel %vm629_vm8, %v1546_v8, %v1058_v22  ;;  %v1059_v35 = vadd.f32 -1.0, %v1214_v24  ;;  %v618_v44 = vpop.f32.mrf.mxu1  ;;  %1237 = vpow2.f32 %v679_v42  ;;  %v1683_v52 = vadd.f32 %v576_v56, %v1511_v46 }
 0x13f   : > { %v1218_v36 = vpop.eup %1217  ;;  %789 = vst [vmem:[%s1601_s6 + $0x20] sm:$0xff] %v757_v33  ;;  %v773_v37 = vsel %vm645_vm9, %v1549_v9, %v1074_v25  ;;  %v1075_v38 = vadd.f32 -1.0, %v1216_v29  ;;  %v711_v48 = vmul.f32 1.442695, %v1658_v5  ;;  %v1690_v54 = vadd.f32 %v616_v4, %v1511_v46  ;;  %v582_v6 = vpop.f32.mrf.mxu0 }
 0x140   : > { %v1220_v40 = vpop.eup %1219  ;;  %805 = vst [vmem:[%s1601_s6 + $0xa0] sm:$0xff] %v773_v37  ;;  %v758_v8 = vsel %vm630_vm10, %v1556_v16, %v1059_v35  ;;  %v1060_v41 = vadd.f32 -1.0, %v1218_v36  ;;  %v1693_v55 = vadd.f32 %v578_v28, %v1513_v49  ;;  %v681_v63 = vmul.f32 1.442695, %v1683_v52  ;;  %v620_v3 = vpop.f32.mrf.mxu1 }
 0x141   : > { %790 = vst [vmem:[%s1601_s6 + $0x28] sm:$0xff] %v758_v8  ;;  %v774_v9 = vsel %vm646_vm11, %v1559_v19, %v1075_v38  ;;  %v1076_v43 = vadd.f32 -1.0, %v1220_v40  ;;  %v1222_v47 = vpop.eup %1221  ;;  %1239 = vpow2.f32 %v711_v48  ;;  %vm633_vm0 = vcmp.gt.f32.partialorder %v1582_v32, 0.0 }
 0x142   : > { %806 = vst [vmem:[%s1601_s6 + $0xa8] sm:$0xff] %v774_v9  ;;  %v759_v16 = vsel %vm631_vm12, %v1562_v20, %v1060_v41  ;;  %v1224_v19 = vpop.eup %1223  ;;  %v1061_v50 = vadd.f32 -1.0, %v1222_v47  ;;  %v713_v2 = vmul.f32 1.442695, %v1690_v54  ;;  %vm649_vm1 = vcmp.gt.f32.partialorder %v1587_v34, 0.0  ;;  %v622_v60 = vpop.f32.mrf.mxu1 }
 0x143   : > { %791 = vst [vmem:[%s1601_s6 + $0x30] sm:$0xff] %v759_v16  ;;  %v775_v53 = vsel %vm647_vm13, %v1565_v21, %v1076_v43  ;;  %v1226_v20 = vpop.eup %1225  ;;  %v1077_v58 = vadd.f32 -1.0, %v1224_v19  ;;  %1241 = vpow2.f32 %v681_v63  ;;  %v1710_v11 = vadd.f32 %v618_v44, %v1513_v49 }
 0x144   : > { %807 = vst [vmem:[%s1601_s6 + $0xb0] sm:$0xff] %v775_v53  ;;  %v760_v21 = vsel %vm632_vm14, %v1576_v30, %v1061_v50  ;;  %v1062_v0 = vadd.f32 -1.0, %v1226_v20  ;;  %1243 = vpow2.f32 %v713_v2  ;;  %v683_v30 = vmul.f32 1.442695, %v1693_v55  ;;  %v848_v2 = vld [vmem:[%s1601_s6 + $0x18] sm:$0xff] (%p1407_p9) }
 0x145   : > { %v1228_v51 = vpop.eup %1227  ;;  %792 = vst [vmem:[%s1601_s6 + $0x38] sm:$0xff] %v760_v21  ;;  %v776_v7 = vsel %vm648_vm15, %v1579_v31, %v1077_v58  ;;  %v1715_v31 = vadd.f32 %v580_v45, %v1511_v46  ;;  %v1718_v57 = vadd.f32 %v620_v3, %v1511_v46  ;;  %v1721_v14 = vadd.f32 %v582_v6, %v1513_v49  ;;  %v844_v21 = vld [vmem:[%s1601_s6 + $0x8] sm:$0xff] (%p1407_p9) }
 0x146   : > { %v1078_v10 = vadd.f32 -1.0, %v1228_v51  ;;  %808 = vst [vmem:[%s1601_s6 + $0xb8] sm:$0xff] %v776_v7  ;;  %v761_v56 = vsel %vm633_vm0, %v1582_v32, %v1062_v0  ;;  %v1230_v12 = vpop.eup %1229  ;;  %1245 = vpow2.f32 %v683_v30  ;;  %v715_v17 = vmul.f32 1.442695, %v1710_v11  ;;  %v842_v51 = vld [vmem:[%s1601_s6] sm:$0xff] (%p1407_p9)  ;;  %v846_v0 = vld [vmem:[%s1601_s6 + $0x10] sm:$0xff] (%p1407_p9) }
 0x147   : > { %793 = vst [vmem:[%s1601_s6 + $0x40] sm:$0xff] %v761_v56  ;;  %v1063_v15 = vadd.f32 -1.0, %v1230_v12  ;;  %vm634_vm2 = vcmp.gt.f32.partialorder %v1610_v59, 0.0  ;;  %v685_v18 = vmul.f32 1.442695, %v1715_v31  ;;  %vm650_vm3 = vcmp.gt.f32.partialorder %v1613_v62, 0.0  ;;  %843 = vst [vmem:[%s1778_s8] sm:$0xff] (%p1407_p9), %v842_v51 }
 0x148   : > { %v777_v13 = vsel %vm649_vm1, %v1587_v34, %v1078_v10  ;;  %v1232_v32 = vpop.eup %1231  ;;  %1247 = vpow2.f32 %v715_v17  ;;  %v717_v23 = vmul.f32 1.442695, %v1718_v57  ;;  %v687_v25 = vmul.f32 1.442695, %v1721_v14  ;;  %v850_v3 = vld [vmem:[%s1601_s6 + $0x20] sm:$0xff] (%p1407_p9)  ;;  %v852_v6 = vld [vmem:[%s1601_s6 + $0x28] sm:$0xff] (%p1407_p9) }
 0x149   : > { %809 = vst [vmem:[%s1601_s6 + $0xc0] sm:$0xff] %v777_v13  ;;  %v1079_v34 = vadd.f32 -1.0, %v1232_v32  ;;  %v1234_v22 = vpop.eup %1233  ;;  %v762_v46 = vsel %vm634_vm2, %v1610_v59, %v1063_v15  ;;  %1249 = vpow2.f32 %v685_v18  ;;  %vm635_vm4 = vcmp.gt.f32.partialorder %v1619_v1, 0.0  ;;  %845 = vst [vmem:[%s1778_s8 + $0x8] sm:$0xff] (%p1407_p9), %v844_v21  ;;  %v874_v32 = vld [vmem:[%s1601_s6 + $0x80] sm:$0xff] (%p1407_p9)  ;;  %v876_v15 = vld [vmem:[%s1601_s6 + $0x88] sm:$0xff] (%p1407_p9) }
 0x14a   : > { %794 = vst [vmem:[%s1601_s6 + $0x48] sm:$0xff] %v762_v46  ;;  %v1064_v61 = vadd.f32 -1.0, %v1234_v22  ;;  %1251 = vpow2.f32 %v717_v23  ;;  %v623_v59 = vadd.f32 %v622_v60, %v1513_v49  ;;  %v1236_v4 = vpop.eup %1235  ;;  %vm651_vm5 = vcmp.gt.f32.partialorder %v1648_v26, 0.0  ;;  %847 = vst [vmem:[%s1778_s8 + $0x40] sm:$0xff] (%p1407_p9), %v846_v0  ;;  %v854_v7 = vld [vmem:[%s1601_s6 + $0x30] sm:$0xff] (%p1407_p9)  ;;  %v882_v18 = vld [vmem:[%s1601_s6 + $0xa0] sm:$0xff] (%p1407_p9) }
 0x14b   : > { %v778_v24 = vsel %vm650_vm3, %v1613_v62, %v1079_v34  ;;  %1253 = vpow2.f32 %v687_v25  ;;  %v1238_v29 = vpop.eup %1237  ;;  %v1080_v33 = vadd.f32 -1.0, %v1236_v4  ;;  %vm636_vm6 = vcmp.gt.f32.partialorder %v1651_v27, 0.0  ;;  %849 = vst [vmem:[%s1778_s8 + $0x48] sm:$0xff] (%p1407_p9), %v848_v2  ;;  %851 = vst [vmem:[%s1778_s8 + $0x80] sm:$0xff] (%p1407_p9), %v850_v3  ;;  %v878_v17 = vld [vmem:[%s1601_s6 + $0x90] sm:$0xff] (%p1407_p9)  ;;  %v880_v34 = vld [vmem:[%s1601_s6 + $0x98] sm:$0xff] (%p1407_p9) }
 0x14c   : > { %810 = vst [vmem:[%s1601_s6 + $0xc8] sm:$0xff] %v778_v24  ;;  %v763_v28 = vsel %vm635_vm4, %v1619_v1, %v1064_v61  ;;  %v719_v62 = vmul.f32 1.442695, %v623_v59  ;;  %v1065_v35 = vadd.f32 -1.0, %v1238_v29  ;;  %vm652_vm7 = vcmp.gt.f32.partialorder %v1658_v5, 0.0  ;;  %853 = vst [vmem:[%s1778_s8 + $0x88] sm:$0xff] (%p1407_p9), %v852_v6 }
 0x14d   : > { %795 = vst [vmem:[%s1601_s6 + $0x50] sm:$0xff] %v763_v28  ;;  %v779_v37 = vsel %vm651_vm5, %v1648_v26, %v1080_v33  ;;  %vm637_vm8 = vcmp.gt.f32.partialorder %v1683_v52, 0.0  ;;  %vm653_vm9 = vcmp.gt.f32.partialorder %v1690_v54, 0.0  ;;  %vm638_vm10 = vcmp.gt.f32.partialorder %v1693_v55, 0.0  ;;  %v856_v10 = vld [vmem:[%s1601_s6 + $0x38] sm:$0xff] (%p1407_p9)  ;;  %855 = vst [vmem:[%s1778_s8 + $0xc0] sm:$0xff] (%p1407_p9), %v854_v7 }
 0x14e   : > { %v1240_v36 = vpop.eup %1239  ;;  %1255 = vpow2.f32 %v719_v62  ;;  %811 = vst [vmem:[%s1601_s6 + $0xd0] sm:$0xff] %v779_v37  ;;  %v764_v49 = vsel %vm636_vm6, %v1651_v27, %v1065_v35  ;;  %vm654_vm11 = vcmp.gt.f32.partialorder %v1710_v11, 0.0  ;;  %vm639_vm12 = vcmp.gt.f32.partialorder %v1715_v31, 0.0  ;;  %v858_v56 = vld [vmem:[%s1601_s6 + $0x40] sm:$0xff] (%p1407_p9)  ;;  %857 = vst [vmem:[%s1778_s8 + $0xc8] sm:$0xff] (%p1407_p9), %v856_v10  ;;  %v884_v60 = vld [vmem:[%s1601_s6 + $0xa8] sm:$0xff] (%p1407_p9) }
 0x14f   : > { %v1081_v1 = vadd.f32 -1.0, %v1240_v36  ;;  %796 = vst [vmem:[%s1601_s6 + $0x58] sm:$0xff] %v764_v49  ;;  %vm655_vm13 = vcmp.gt.f32.partialorder %v1718_v57, 0.0  ;;  %vm640_vm14 = vcmp.gt.f32.partialorder %v1721_v14, 0.0  ;;  %vm656_vm15 = vcmp.gt.f32.partialorder %v623_v59, 0.0  ;;  %859 = vst [vmem:[%s1778_s8 + $0x100] sm:$0xff] (%p1407_p9), %v858_v56 }
 0x150   : > { %v1242_v38 = vpop.eup %1241  ;;  %875 = vst [vmem:[%s1778_s8 + $0x200] sm:$0xff] (%p1407_p9), %v874_v32  ;;  %877 = vst [vmem:[%s1778_s8 + $0x208] sm:$0xff] (%p1407_p9), %v876_v15  ;;  %v886_v22 = vld [vmem:[%s1601_s6 + $0xb0] sm:$0xff] (%p1407_p9)  ;;  %v888_v46 = vld [vmem:[%s1601_s6 + $0xb8] sm:$0xff] (%p1407_p9) }
 0x151   : > { %v1244_v39 = vpop.eup %1243  ;;  %v780_v40 = vsel %vm652_vm7, %v1658_v5, %v1081_v1  ;;  %v1066_v8 = vadd.f32 -1.0, %v1242_v38  ;;  %v860_v30 = vld [vmem:[%s1601_s6 + $0x48] sm:$0xff] (%p1407_p9)  ;;  %879 = vst [vmem:[%s1778_s8 + $0x240] sm:$0xff] (%p1407_p9), %v878_v17  ;;  %881 = vst [vmem:[%s1778_s8 + $0x248] sm:$0xff] (%p1407_p9), %v880_v34  ;;  %v890_v23 = vld [vmem:[%s1601_s6 + $0xc0] sm:$0xff] (%p1407_p9) }
 0x152   : > { %812 = vst [vmem:[%s1601_s6 + $0xd8] sm:$0xff] %v780_v40  ;;  %v1082_v26 = vadd.f32 -1.0, %v1244_v39  ;;  %861 = vst [vmem:[%s1778_s8 + $0x108] sm:$0xff] (%p1407_p9), %v860_v30 }
 0x153   : > { %v1246_v41 = vpop.eup %1245  ;;  %v765_v42 = vsel %vm637_vm8, %v1683_v52, %v1066_v8  ;;  %883 = vst [vmem:[%s1778_s8 + $0x280] sm:$0xff] (%p1407_p9), %v882_v18  ;;  %885 = vst [vmem:[%s1778_s8 + $0x288] sm:$0xff] (%p1407_p9), %v884_v60  ;;  %v892_v24 = vld [vmem:[%s1601_s6 + $0xc8] sm:$0xff] (%p1407_p9) }
 0x154   : > { %797 = vst [vmem:[%s1601_s6 + $0x60] sm:$0xff] %v765_v42  ;;  %v781_v27 = vsel %vm653_vm9, %v1690_v54, %v1082_v26  ;;  %v1067_v9 = vadd.f32 -1.0, %v1246_v41  ;;  %887 = vst [vmem:[%s1778_s8 + $0x2c0] sm:$0xff] (%p1407_p9), %v886_v22 }
 0x155   : > { %v1248_v43 = vpop.eup %1247  ;;  %813 = vst [vmem:[%s1601_s6 + $0xe0] sm:$0xff] %v781_v27  ;;  %889 = vst [vmem:[%s1778_s8 + $0x2c8] sm:$0xff] (%p1407_p9), %v888_v46  ;;  %v894_v61 = vld [vmem:[%s1601_s6 + $0xd0] sm:$0xff] (%p1407_p9) }
 0x156   : > { %v1250_v5 = vpop.eup %1249  ;;  %v766_v44 = vsel %vm638_vm10, %v1693_v55, %v1067_v9  ;;  %v1083_v45 = vadd.f32 -1.0, %v1248_v43  ;;  %v864_v12 = vld [vmem:[%s1601_s6 + $0x58] sm:$0xff] (%p1407_p9)  ;;  %891 = vst [vmem:[%s1778_s8 + $0x300] sm:$0xff] (%p1407_p9), %v890_v23  ;;  %893 = vst [vmem:[%s1778_s8 + $0x308] sm:$0xff] (%p1407_p9), %v892_v24 }
 0x157   : > { %v1252_v47 = vpop.eup %1251  ;;  %798 = vst [vmem:[%s1601_s6 + $0x68] sm:$0xff] %v766_v44  ;;  %v1068_v16 = vadd.f32 -1.0, %v1250_v5  ;;  %865 = vst [vmem:[%s1778_s8 + $0x148] sm:$0xff] (%p1407_p9), %v864_v12 }
 0x158   : > { %v1254_v48 = vpop.eup %1253  ;;  %v782_v52 = vsel %vm654_vm11, %v1710_v11, %v1083_v45  ;;  %v1084_v19 = vadd.f32 -1.0, %v1252_v47  ;;  %v862_v11 = vld [vmem:[%s1601_s6 + $0x50] sm:$0xff] (%p1407_p9)  ;;  %895 = vst [vmem:[%s1778_s8 + $0x340] sm:$0xff] (%p1407_p9), %v894_v61 }
 0x159   : > { %814 = vst [vmem:[%s1601_s6 + $0xe8] sm:$0xff] %v782_v52  ;;  %v767_v53 = vsel %vm639_vm12, %v1715_v31, %v1068_v16  ;;  %v1069_v50 = vadd.f32 -1.0, %v1254_v48  ;;  %863 = vst [vmem:[%s1778_s8 + $0x140] sm:$0xff] (%p1407_p9), %v862_v11  ;;  %v896_v25 = vld [vmem:[%s1601_s6 + $0xd8] sm:$0xff] (%p1407_p9) }
 0x15a   : > { %799 = vst [vmem:[%s1601_s6 + $0x70] sm:$0xff] %v767_v53  ;;  %v783_v54 = vsel %vm655_vm13, %v1718_v57, %v1084_v19  ;;  %897 = vst [vmem:[%s1778_s8 + $0x348] sm:$0xff] (%p1407_p9), %v896_v25 }
 0x15b   : > { %v1256_v55 = vpop.eup %1255  ;;  %815 = vst [vmem:[%s1601_s6 + $0xf0] sm:$0xff] %v783_v54  ;;  %v768_v20 = vsel %vm640_vm14, %v1721_v14, %v1069_v50  ;;  %823 = sbr.rel (!%p1407_p9) target bundleno = 360 (0x168), region = 78  ;;  %v866_v13 = vld [vmem:[%s1601_s6 + $0x60] sm:$0xff] (%p1407_p9) }
 0x15c   : > { %800 = vst [vmem:[%s1601_s6 + $0x78] sm:$0xff] %v768_v20  ;;  %v1085_v58 = vadd.f32 -1.0, %v1256_v55  ;;  %867 = vst [vmem:[%s1778_s8 + $0x180] sm:$0xff] (%p1407_p9), %v866_v13 }
 0x15e   : > { %v784_v63 = vsel %vm656_vm15, %v623_v59, %v1085_v58  ;;  %v868_v31 = vld [vmem:[%s1601_s6 + $0x68] sm:$0xff] (%p1407_p9)  ;;  %v898_v59 = vld [vmem:[%s1601_s6 + $0xe0] sm:$0xff] (%p1407_p9) }
 0x15f   : > { %816 = vst [vmem:[%s1601_s6 + $0xf8] sm:$0xff] %v784_v63  ;;  %869 = vst [vmem:[%s1778_s8 + $0x188] sm:$0xff] (%p1407_p9), %v868_v31 }
 0x160   : > { %v900_v4 = vld [vmem:[%s1601_s6 + $0xe8] sm:$0xff]  ;;  %899 = vst [vmem:[%s1778_s8 + $0x380] sm:$0xff] %v898_v59 }
 0x161   : > { %v870_v57 = vld [vmem:[%s1601_s6 + $0x70] sm:$0xff]  ;;  %901 = vst [vmem:[%s1778_s8 + $0x388] sm:$0xff] %v900_v4 }
 0x162   : > { %871 = vst [vmem:[%s1778_s8 + $0x1c0] sm:$0xff] %v870_v57  ;;  %v902_v28 = vld [vmem:[%s1601_s6 + $0xf0] sm:$0xff] }
 0x163   : > { %v872_v14 = vld [vmem:[%s1601_s6 + $0x78] sm:$0xff]  ;;  %903 = vst [vmem:[%s1778_s8 + $0x3c0] sm:$0xff] %v902_v28 }
 0x164   : > { %873 = vst [vmem:[%s1778_s8 + $0x1c8] sm:$0xff] %v872_v14 }
 0x166   : > { %v904_v29 = vld [vmem:[%s1601_s6 + $0xf8] sm:$0xff] }
 0x167   : > { %905 = vst [vmem:[%s1778_s8 + $0x3c8] sm:$0xff] %v904_v29 }
 0x168 PF: > { %s16_s17 = sadd.s32 1, %s1333_s17   ;;  %s1866_s12 = smov %s1317_s13 }
 0x169   : > { %p13_p3 = scmp.ge.s32.totalorder %s16_s17, 6   ;;  %s1867_s13 = smov %s1321_s14 }
 0x16a   : > { %s1868_s14 = smov %s1405_s24  ;;  %s1869_s15 = smov %s1329_s16 }
 0x16b   : > { %s1870_s16 = smov %s1872_s19  ;;  %15 = sbr.rel (!%p13_p3) target bundleno = 4 (0x4), region = 144 }
 0x170   :  { %921 = vsyncpa [#allocation4], 1 }
 0x171   :  { %923 = vsyncpa [#allocation4 + $0x1], 1 }

// kernel: encoder_forward.12
= control target key start
LH: loop header
LB: loop body
LE: loop exit
PB: predicated region body
PF: predicated region fallthrough
CT: control target
= control target key end

     0   :  { %s3452_s0 = inlined_call_operand.vmem [shape: bf16[256,1024], index: 0, kind: input, shape index: {}]   ;;  %s3453_s1 = inlined_call_operand.vmem [shape: bf16[1024,512], index: 1, kind: input, shape index: {}]   ;;  %s3454_s2 = inlined_call_operand.vmem [shape: f32[1,512], index: 2, kind: input, shape index: {}]   ;;  %s3455_s3 = inlined_call_operand.vmem [shape: f32[256,512], index: 3, kind: output, shape index: {}]  }
   0x1   :  { %3458 = sst [smem:[#allocation9_spill]] %s3452_s0 }
   0x2   :  { %3459 = sst [smem:[#allocation10_spill]] %s3455_s3 }
   0x3   :  { %s2616_s12 = smov 0   ;;  %s2618_s13 = smov 0  }
   0x4   :  { %s2620_s14 = smov 0   ;;  %s2622_s15 = smov 0  }
   0x5   :  { %s2624_s16 = smov 0   ;;  %s2626_s17 = smov 0  }
   0x6   :  { %s2628_s18 = smov 0   ;;  %s2630_s19 = smov 0  }
   0x7   :  { %s2632_s20 = smov 0   ;;  %s2634_s21 = smov 0  }
   0x8   :  { %s2636_s22 = smov 0   ;;  %s2638_s23 = smov 0  }
   0x9   :  { %s2640_s24 = smov 0  }
   0xa LB: > { %3460 = sst [smem:[#allocation6_spill]] %s2577_s20  ;;  %s25_s26 = sadd.s32 1, %s2581_s21  ;;  %s2593_s24 = sphi %s2640_s24, %s13_s24   ;;  %s2589_s23 = sphi %s2638_s23, %s3484_s23   ;;  %s2585_s22 = sphi %s2636_s22, %s3483_s22   ;;  %s2581_s21 = sphi %s2634_s21, %s3482_s21   ;;  %s2577_s20 = sphi %s2632_s20, %s3481_s20   ;;  %s2573_s19 = sphi %s2630_s19, %s3480_s19   ;;  %s2569_s18 = sphi %s2628_s18, %s3479_s18   ;;  %s2565_s17 = sphi %s2626_s17, %s3478_s17   ;;  %s2561_s16 = sphi %s2624_s16, %s3477_s16   ;;  %s2557_s15 = sphi %s2622_s15, %s3476_s15   ;;  %s2553_s14 = sphi %s2620_s14, %s3475_s14   ;;  %s2549_s13 = sphi %s2618_s13, %s3474_s13   ;;  %s2545_s12 = sphi %s2616_s12, %s3473_s12  }
   0xb   : > { %p26_p0 = scmp.ge.s32.totalorder %s25_s26, 2  ;;  %s28_s27 = sadd.s32 1, %s2585_s22 }
   0xc   : > { %s32_s28 = sadd.s32 1, %s2589_s23  ;;  %s41_s29 = sadd.s32 1, %s2565_s17 }
   0xd   : > { %s3486_s26 = smov (%p26_p0, %s25_s26), 0  ;;  %s3488_s27 = smov (!%p26_p0, %s28_s27), %s2585_s22 }
   0xe   : > { %3461 = sst [smem:[#allocation7_spill]] %s3486_s26  ;;  %s37_s30 = ssub.s32 %s2581_s21, %s3486_s26 }
   0xf   : > { %p48_p1 = scmp.ne.s32.totalorder %s2565_s17, %s2561_s16  ;;  %p30_p2 = scmp.ge.s32.totalorder %s3488_s27, 2 }
  0x10   : > { %p49_p3 = scmp.eq.s32.totalorder %s2593_s24, 0  ;;  %s69_s4 = sadd.s32 1, %s2557_s15 }
  0x11   : > { %p76_p4 = scmp.ne.s32.totalorder %s2557_s15, %s2553_s14  ;;  %s3490_s27 = smov (%p30_p2, %s3488_s27), 0 }
  0x12   : > { %3462 = sst [smem:[#allocation8_spill]] %s3490_s27  ;;  %s3492_s28 = smov (!%p30_p2, %s32_s28), %s2589_s23 }
  0x13   : > { %p2700_p5 = por %p49_p3, %p48_p1  ;;  %s65_s6 = ssub.s32 %s2585_s22, %s3490_s27 }
  0x14   : > { %p34_p6 = scmp.ge.s32.totalorder %s3492_s28, 2  ;;  %s66_s7 = sor.u32 %s65_s6, %s37_s30 }
  0x15   : > { %p67_p7 = scmp.eq.s32.totalorder %s66_s7, 0  ;;  %p2706_p8 = por %p76_p4, %p49_p3 }
  0x16   : > { %s3494_s28 = smov (%p34_p6, %s3492_s28), 0  ;;  %s123_s11 = sadd.s32 1, %s2549_s13 }
  0x17   : > { %s2713_s9 = scalar_select %p67_p7, %s2557_s15, %s69_s4  }
  0x18   : > { %s36_s10 = ssub.s32 %s2589_s23, %s3494_s28  ;;  %p133_p11 = scmp.ne.s32.totalorder %s2549_s13, %s2545_s12 }
  0x19   : > { %s38_s25 = sor.u32 %s37_s30, %s36_s10  ;;  %s120_s26 = sor.u32 %s65_s6, %s36_s10 }
  0x1a   : > { %p39_p9 = scmp.eq.s32.totalorder %s38_s25, 0  ;;  %p121_p10 = scmp.eq.s32.totalorder %s120_s26, 0 }
  0x1b   : > { %s3465_s27 = sadd.s32 4294967295, %s2593_s24   ;;  %p2022_p0 = scmp.ge.s32.totalorder %s2593_s24, 8 }
  0x1c   : > { %p134_p12 = scmp.eq.s32.totalorder %s3465_s27, 7 }
  0x1d   : > { %s2723_s3 = scalar_select %p39_p9, %s2565_s17, %s41_s29  }
  0x1e   : > { %s2726_s7 = scalar_select %p121_p10, %s2549_s13, %s123_s11  }
  0x1f   : > { %p2728_p13 = por %p134_p12, %p133_p11  ;;  %156 = sbr.rel (%p2022_p0) target bundleno = 101 (0x65), region = 16 }
  0x24   : > { %159 = sbr.rel (!%p2700_p5) target bundleno = 62 (0x3e), region = 20  ;;  %s161_s25 = sand.u32 (%p2700_p5), 1, %s2565_s17  }
  0x25   : > { %s2025_s26 = sshll.u32 (%p2700_p5), %s2581_s21, 2  ;;  %s2023_s27 = sshll.u32 (%p2700_p5), %s161_s25, 8 }
  0x26   : > { %s2175_s29 = sshll.u32 (%p2700_p5), %s2589_s23, 7  ;;  %s3467_s0 = sld [smem:[#allocation9_spill]] (%p2700_p5) }
  0x27   : > { %s167_s30 = sadd.s32 (%p2700_p5), %s2175_s29, %s2025_s26  ;;  %s2746_s5 = scalar_lea.vmem (%p2700_p5), [#allocation3], %s2023_s27 }
  0x28   : > { %s2027_s4 = sshll.u32 (%p2700_p5), %s167_s30, 2 }
  0x2c   : > { %s2741_s11 = scalar_lea.vmem %s3467_s0, %s2027_s4 }
  0x2d   : > { %v182_v0 = vld [vmem:[%s2741_s11] sm:$0xff]  ;;  %v184_v1 = vld [vmem:[%s2741_s11 + $0x8] sm:$0xff] }
  0x2e   : > { %v186_v2 = vld [vmem:[%s2741_s11 + $0x20] sm:$0xff]  ;;  %183 = vst [vmem:[%s2746_s5] sm:$0xff] %v182_v0  ;;  %185 = vst [vmem:[%s2746_s5 + $0x8] sm:$0xff] %v184_v1  ;;  %v188_v3 = vld [vmem:[%s2741_s11 + $0x28] sm:$0xff] }
  0x2f   : > { %187 = vst [vmem:[%s2746_s5 + $0x10] sm:$0xff] %v186_v2  ;;  %v190_v4 = vld [vmem:[%s2741_s11 + $0x40] sm:$0xff]  ;;  %v192_v5 = vld [vmem:[%s2741_s11 + $0x48] sm:$0xff]  ;;  %189 = vst [vmem:[%s2746_s5 + $0x18] sm:$0xff] %v188_v3 }
  0x30   : > { %191 = vst [vmem:[%s2746_s5 + $0x20] sm:$0xff] %v190_v4  ;;  %193 = vst [vmem:[%s2746_s5 + $0x28] sm:$0xff] %v192_v5  ;;  %v194_v6 = vld [vmem:[%s2741_s11 + $0x60] sm:$0xff]  ;;  %v196_v7 = vld [vmem:[%s2741_s11 + $0x68] sm:$0xff] }
  0x31   : > { %v198_v8 = vld [vmem:[%s2741_s11 + $0x80] sm:$0xff]  ;;  %195 = vst [vmem:[%s2746_s5 + $0x30] sm:$0xff] %v194_v6  ;;  %197 = vst [vmem:[%s2746_s5 + $0x38] sm:$0xff] %v196_v7  ;;  %v200_v9 = vld [vmem:[%s2741_s11 + $0x88] sm:$0xff] }
  0x32   : > { %199 = vst [vmem:[%s2746_s5 + $0x40] sm:$0xff] %v198_v8  ;;  %v202_v10 = vld [vmem:[%s2741_s11 + $0xa0] sm:$0xff]  ;;  %v204_v11 = vld [vmem:[%s2741_s11 + $0xa8] sm:$0xff]  ;;  %201 = vst [vmem:[%s2746_s5 + $0x48] sm:$0xff] %v200_v9 }
  0x33   : > { %203 = vst [vmem:[%s2746_s5 + $0x50] sm:$0xff] %v202_v10  ;;  %205 = vst [vmem:[%s2746_s5 + $0x58] sm:$0xff] %v204_v11  ;;  %v206_v12 = vld [vmem:[%s2741_s11 + $0xc0] sm:$0xff]  ;;  %v208_v13 = vld [vmem:[%s2741_s11 + $0xc8] sm:$0xff] }
  0x34   : > { %v210_v14 = vld [vmem:[%s2741_s11 + $0xe0] sm:$0xff]  ;;  %207 = vst [vmem:[%s2746_s5 + $0x60] sm:$0xff] %v206_v12  ;;  %209 = vst [vmem:[%s2746_s5 + $0x68] sm:$0xff] %v208_v13  ;;  %v212_v15 = vld [vmem:[%s2741_s11 + $0xe8] sm:$0xff] }
  0x35   : > { %211 = vst [vmem:[%s2746_s5 + $0x70] sm:$0xff] %v210_v14  ;;  %v214_v16 = vld [vmem:[%s2741_s11 + $0x100] sm:$0xff]  ;;  %v216_v17 = vld [vmem:[%s2741_s11 + $0x108] sm:$0xff]  ;;  %213 = vst [vmem:[%s2746_s5 + $0x78] sm:$0xff] %v212_v15 }
  0x36   : > { %215 = vst [vmem:[%s2746_s5 + $0x80] sm:$0xff] %v214_v16  ;;  %217 = vst [vmem:[%s2746_s5 + $0x88] sm:$0xff] %v216_v17  ;;  %v218_v18 = vld [vmem:[%s2741_s11 + $0x120] sm:$0xff]  ;;  %v220_v19 = vld [vmem:[%s2741_s11 + $0x128] sm:$0xff] }
  0x37   : > { %v222_v20 = vld [vmem:[%s2741_s11 + $0x140] sm:$0xff]  ;;  %219 = vst [vmem:[%s2746_s5 + $0x90] sm:$0xff] %v218_v18  ;;  %221 = vst [vmem:[%s2746_s5 + $0x98] sm:$0xff] %v220_v19  ;;  %v224_v21 = vld [vmem:[%s2741_s11 + $0x148] sm:$0xff] }
  0x38   : > { %223 = vst [vmem:[%s2746_s5 + $0xa0] sm:$0xff] %v222_v20  ;;  %v226_v22 = vld [vmem:[%s2741_s11 + $0x160] sm:$0xff]  ;;  %v228_v23 = vld [vmem:[%s2741_s11 + $0x168] sm:$0xff]  ;;  %225 = vst [vmem:[%s2746_s5 + $0xa8] sm:$0xff] %v224_v21 }
  0x39   : > { %227 = vst [vmem:[%s2746_s5 + $0xb0] sm:$0xff] %v226_v22  ;;  %229 = vst [vmem:[%s2746_s5 + $0xb8] sm:$0xff] %v228_v23  ;;  %v230_v24 = vld [vmem:[%s2741_s11 + $0x180] sm:$0xff]  ;;  %v232_v25 = vld [vmem:[%s2741_s11 + $0x188] sm:$0xff] }
  0x3a   : > { %v234_v26 = vld [vmem:[%s2741_s11 + $0x1a0] sm:$0xff]  ;;  %231 = vst [vmem:[%s2746_s5 + $0xc0] sm:$0xff] %v230_v24  ;;  %233 = vst [vmem:[%s2746_s5 + $0xc8] sm:$0xff] %v232_v25  ;;  %v236_v27 = vld [vmem:[%s2741_s11 + $0x1a8] sm:$0xff] }
  0x3b   : > { %235 = vst [vmem:[%s2746_s5 + $0xd0] sm:$0xff] %v234_v26  ;;  %v238_v28 = vld [vmem:[%s2741_s11 + $0x1c0] sm:$0xff]  ;;  %v240_v29 = vld [vmem:[%s2741_s11 + $0x1c8] sm:$0xff]  ;;  %237 = vst [vmem:[%s2746_s5 + $0xd8] sm:$0xff] %v236_v27 }
  0x3c   : > { %239 = vst [vmem:[%s2746_s5 + $0xe0] sm:$0xff] %v238_v28  ;;  %241 = vst [vmem:[%s2746_s5 + $0xe8] sm:$0xff] %v240_v29  ;;  %v242_v30 = vld [vmem:[%s2741_s11 + $0x1e0] sm:$0xff]  ;;  %v244_v31 = vld [vmem:[%s2741_s11 + $0x1e8] sm:$0xff] }
  0x3d   : > { %243 = vst [vmem:[%s2746_s5 + $0xf0] sm:$0xff] %v242_v30  ;;  %245 = vst [vmem:[%s2746_s5 + $0xf8] sm:$0xff] %v244_v31 }
  0x3e PF: > { %251 = sbr.rel (!%p2706_p8) target bundleno = 101 (0x65), region = 43  ;;  %s253_s25 = sand.u32 (%p2706_p8), 1, %s2557_s15  }
  0x3f   : > { %s2030_s26 = sshll.u32 (%p2706_p8), %s2585_s22, 1  ;;  %s2028_s27 = sshll.u32 (%p2706_p8), %s253_s25, 9 }
  0x40   : > { %s2176_s29 = sshll.u32 (%p2706_p8), %s2581_s21, 8  ;;  %s2822_s8 = scalar_lea.vmem (%p2706_p8), [#allocation4], %s2028_s27 }
  0x41   : > { %s259_s30 = sadd.s32 (%p2706_p8), %s2176_s29, %s2030_s26 }
  0x42   : > { %s2032_s4 = sshll.u32 (%p2706_p8), %s259_s30, 2 }
  0x43   : > { %s2817_s0 = scalar_lea.vmem %s3453_s1, %s2032_s4 }
  0x44   : > { %v416_v32 = vld [vmem:[%s2817_s0] sm:$0xff]  ;;  %v418_v33 = vld [vmem:[%s2817_s0 + $0x10] sm:$0xff] }
  0x45   : > { %v420_v34 = vld [vmem:[%s2817_s0 + $0x20] sm:$0xff]  ;;  %417 = vst [vmem:[%s2822_s8] sm:$0xff] %v416_v32  ;;  %419 = vst [vmem:[%s2822_s8 + $0x8] sm:$0xff] %v418_v33  ;;  %v422_v35 = vld [vmem:[%s2817_s0 + $0x30] sm:$0xff] }
  0x46   : > { %421 = vst [vmem:[%s2822_s8 + $0x10] sm:$0xff] %v420_v34  ;;  %v424_v36 = vld [vmem:[%s2817_s0 + $0x40] sm:$0xff]  ;;  %v426_v37 = vld [vmem:[%s2817_s0 + $0x50] sm:$0xff]  ;;  %423 = vst [vmem:[%s2822_s8 + $0x18] sm:$0xff] %v422_v35 }
  0x47   : > { %425 = vst [vmem:[%s2822_s8 + $0x20] sm:$0xff] %v424_v36  ;;  %427 = vst [vmem:[%s2822_s8 + $0x28] sm:$0xff] %v426_v37  ;;  %v428_v38 = vld [vmem:[%s2817_s0 + $0x60] sm:$0xff]  ;;  %v430_v39 = vld [vmem:[%s2817_s0 + $0x70] sm:$0xff] }
  0x48   : > { %v432_v40 = vld [vmem:[%s2817_s0 + $0x80] sm:$0xff]  ;;  %429 = vst [vmem:[%s2822_s8 + $0x30] sm:$0xff] %v428_v38  ;;  %431 = vst [vmem:[%s2822_s8 + $0x38] sm:$0xff] %v430_v39  ;;  %v434_v41 = vld [vmem:[%s2817_s0 + $0x90] sm:$0xff] }
  0x49   : > { %433 = vst [vmem:[%s2822_s8 + $0x40] sm:$0xff] %v432_v40  ;;  %v436_v42 = vld [vmem:[%s2817_s0 + $0xa0] sm:$0xff]  ;;  %v438_v43 = vld [vmem:[%s2817_s0 + $0xb0] sm:$0xff]  ;;  %435 = vst [vmem:[%s2822_s8 + $0x48] sm:$0xff] %v434_v41 }
  0x4a   : > { %437 = vst [vmem:[%s2822_s8 + $0x50] sm:$0xff] %v436_v42  ;;  %439 = vst [vmem:[%s2822_s8 + $0x58] sm:$0xff] %v438_v43  ;;  %v440_v44 = vld [vmem:[%s2817_s0 + $0xc0] sm:$0xff]  ;;  %v442_v45 = vld [vmem:[%s2817_s0 + $0xd0] sm:$0xff] }
  0x4b   : > { %v444_v46 = vld [vmem:[%s2817_s0 + $0xe0] sm:$0xff]  ;;  %441 = vst [vmem:[%s2822_s8 + $0x60] sm:$0xff] %v440_v44  ;;  %443 = vst [vmem:[%s2822_s8 + $0x68] sm:$0xff] %v442_v45  ;;  %v446_v47 = vld [vmem:[%s2817_s0 + $0xf0] sm:$0xff] }
  0x4c   : > { %445 = vst [vmem:[%s2822_s8 + $0x70] sm:$0xff] %v444_v46  ;;  %v448_v48 = vld [vmem:[%s2817_s0 + $0x100] sm:$0xff]  ;;  %v450_v49 = vld [vmem:[%s2817_s0 + $0x110] sm:$0xff]  ;;  %447 = vst [vmem:[%s2822_s8 + $0x78] sm:$0xff] %v446_v47 }
  0x4d   : > { %449 = vst [vmem:[%s2822_s8 + $0x80] sm:$0xff] %v448_v48  ;;  %451 = vst [vmem:[%s2822_s8 + $0x88] sm:$0xff] %v450_v49  ;;  %v452_v50 = vld [vmem:[%s2817_s0 + $0x120] sm:$0xff]  ;;  %v454_v51 = vld [vmem:[%s2817_s0 + $0x130] sm:$0xff] }
  0x4e   : > { %v456_v52 = vld [vmem:[%s2817_s0 + $0x140] sm:$0xff]  ;;  %453 = vst [vmem:[%s2822_s8 + $0x90] sm:$0xff] %v452_v50  ;;  %455 = vst [vmem:[%s2822_s8 + $0x98] sm:$0xff] %v454_v51  ;;  %v458_v53 = vld [vmem:[%s2817_s0 + $0x150] sm:$0xff] }
  0x4f   : > { %457 = vst [vmem:[%s2822_s8 + $0xa0] sm:$0xff] %v456_v52  ;;  %v460_v54 = vld [vmem:[%s2817_s0 + $0x160] sm:$0xff]  ;;  %v462_v55 = vld [vmem:[%s2817_s0 + $0x170] sm:$0xff]  ;;  %459 = vst [vmem:[%s2822_s8 + $0xa8] sm:$0xff] %v458_v53 }
  0x50   : > { %461 = vst [vmem:[%s2822_s8 + $0xb0] sm:$0xff] %v460_v54  ;;  %463 = vst [vmem:[%s2822_s8 + $0xb8] sm:$0xff] %v462_v55  ;;  %v464_v56 = vld [vmem:[%s2817_s0 + $0x180] sm:$0xff]  ;;  %v466_v57 = vld [vmem:[%s2817_s0 + $0x190] sm:$0xff] }
  0x51   : > { %v468_v58 = vld [vmem:[%s2817_s0 + $0x1a0] sm:$0xff]  ;;  %465 = vst [vmem:[%s2822_s8 + $0xc0] sm:$0xff] %v464_v56  ;;  %467 = vst [vmem:[%s2822_s8 + $0xc8] sm:$0xff] %v466_v57  ;;  %v470_v59 = vld [vmem:[%s2817_s0 + $0x1b0] sm:$0xff] }
  0x52   : > { %469 = vst [vmem:[%s2822_s8 + $0xd0] sm:$0xff] %v468_v58  ;;  %v472_v60 = vld [vmem:[%s2817_s0 + $0x1c0] sm:$0xff]  ;;  %v474_v61 = vld [vmem:[%s2817_s0 + $0x1d0] sm:$0xff]  ;;  %471 = vst [vmem:[%s2822_s8 + $0xd8] sm:$0xff] %v470_v59 }
  0x53   : > { %473 = vst [vmem:[%s2822_s8 + $0xe0] sm:$0xff] %v472_v60  ;;  %475 = vst [vmem:[%s2822_s8 + $0xe8] sm:$0xff] %v474_v61  ;;  %v476_v62 = vld [vmem:[%s2817_s0 + $0x1e0] sm:$0xff]  ;;  %v478_v63 = vld [vmem:[%s2817_s0 + $0x1f0] sm:$0xff] }
  0x54   : > { %v480_v0 = vld [vmem:[%s2817_s0 + $0x200] sm:$0xff]  ;;  %477 = vst [vmem:[%s2822_s8 + $0xf0] sm:$0xff] %v476_v62  ;;  %479 = vst [vmem:[%s2822_s8 + $0xf8] sm:$0xff] %v478_v63  ;;  %v482_v1 = vld [vmem:[%s2817_s0 + $0x210] sm:$0xff] }
  0x55   : > { %481 = vst [vmem:[%s2822_s8 + $0x100] sm:$0xff] %v480_v0  ;;  %v484_v2 = vld [vmem:[%s2817_s0 + $0x220] sm:$0xff]  ;;  %v486_v3 = vld [vmem:[%s2817_s0 + $0x230] sm:$0xff]  ;;  %483 = vst [vmem:[%s2822_s8 + $0x108] sm:$0xff] %v482_v1 }
  0x56   : > { %485 = vst [vmem:[%s2822_s8 + $0x110] sm:$0xff] %v484_v2  ;;  %487 = vst [vmem:[%s2822_s8 + $0x118] sm:$0xff] %v486_v3  ;;  %v488_v4 = vld [vmem:[%s2817_s0 + $0x240] sm:$0xff]  ;;  %v490_v5 = vld [vmem:[%s2817_s0 + $0x250] sm:$0xff] }
  0x57   : > { %v492_v6 = vld [vmem:[%s2817_s0 + $0x260] sm:$0xff]  ;;  %489 = vst [vmem:[%s2822_s8 + $0x120] sm:$0xff] %v488_v4  ;;  %491 = vst [vmem:[%s2822_s8 + $0x128] sm:$0xff] %v490_v5  ;;  %v494_v7 = vld [vmem:[%s2817_s0 + $0x270] sm:$0xff] }
  0x58   : > { %493 = vst [vmem:[%s2822_s8 + $0x130] sm:$0xff] %v492_v6  ;;  %v496_v8 = vld [vmem:[%s2817_s0 + $0x280] sm:$0xff]  ;;  %v498_v9 = vld [vmem:[%s2817_s0 + $0x290] sm:$0xff]  ;;  %495 = vst [vmem:[%s2822_s8 + $0x138] sm:$0xff] %v494_v7 }
  0x59   : > { %497 = vst [vmem:[%s2822_s8 + $0x140] sm:$0xff] %v496_v8  ;;  %499 = vst [vmem:[%s2822_s8 + $0x148] sm:$0xff] %v498_v9  ;;  %v500_v10 = vld [vmem:[%s2817_s0 + $0x2a0] sm:$0xff]  ;;  %v502_v11 = vld [vmem:[%s2817_s0 + $0x2b0] sm:$0xff] }
  0x5a   : > { %v504_v12 = vld [vmem:[%s2817_s0 + $0x2c0] sm:$0xff]  ;;  %501 = vst [vmem:[%s2822_s8 + $0x150] sm:$0xff] %v500_v10  ;;  %503 = vst [vmem:[%s2822_s8 + $0x158] sm:$0xff] %v502_v11  ;;  %v506_v13 = vld [vmem:[%s2817_s0 + $0x2d0] sm:$0xff] }
  0x5b   : > { %505 = vst [vmem:[%s2822_s8 + $0x160] sm:$0xff] %v504_v12  ;;  %v508_v14 = vld [vmem:[%s2817_s0 + $0x2e0] sm:$0xff]  ;;  %v510_v15 = vld [vmem:[%s2817_s0 + $0x2f0] sm:$0xff]  ;;  %507 = vst [vmem:[%s2822_s8 + $0x168] sm:$0xff] %v506_v13 }
  0x5c   : > { %509 = vst [vmem:[%s2822_s8 + $0x170] sm:$0xff] %v508_v14  ;;  %511 = vst [vmem:[%s2822_s8 + $0x178] sm:$0xff] %v510_v15  ;;  %v512_v16 = vld [vmem:[%s2817_s0 + $0x300] sm:$0xff]  ;;  %v514_v17 = vld [vmem:[%s2817_s0 + $0x310] sm:$0xff] }
  0x5d   : > { %v516_v18 = vld [vmem:[%s2817_s0 + $0x320] sm:$0xff]  ;;  %513 = vst [vmem:[%s2822_s8 + $0x180] sm:$0xff] %v512_v16  ;;  %515 = vst [vmem:[%s2822_s8 + $0x188] sm:$0xff] %v514_v17  ;;  %v518_v19 = vld [vmem:[%s2817_s0 + $0x330] sm:$0xff] }
  0x5e   : > { %517 = vst [vmem:[%s2822_s8 + $0x190] sm:$0xff] %v516_v18  ;;  %v520_v20 = vld [vmem:[%s2817_s0 + $0x340] sm:$0xff]  ;;  %v522_v21 = vld [vmem:[%s2817_s0 + $0x350] sm:$0xff]  ;;  %519 = vst [vmem:[%s2822_s8 + $0x198] sm:$0xff] %v518_v19 }
  0x5f   : > { %521 = vst [vmem:[%s2822_s8 + $0x1a0] sm:$0xff] %v520_v20  ;;  %523 = vst [vmem:[%s2822_s8 + $0x1a8] sm:$0xff] %v522_v21  ;;  %v524_v22 = vld [vmem:[%s2817_s0 + $0x360] sm:$0xff]  ;;  %v526_v23 = vld [vmem:[%s2817_s0 + $0x370] sm:$0xff] }
  0x60   : > { %v528_v24 = vld [vmem:[%s2817_s0 + $0x380] sm:$0xff]  ;;  %525 = vst [vmem:[%s2822_s8 + $0x1b0] sm:$0xff] %v524_v22  ;;  %527 = vst [vmem:[%s2822_s8 + $0x1b8] sm:$0xff] %v526_v23  ;;  %v530_v25 = vld [vmem:[%s2817_s0 + $0x390] sm:$0xff] }
  0x61   : > { %529 = vst [vmem:[%s2822_s8 + $0x1c0] sm:$0xff] %v528_v24  ;;  %v532_v26 = vld [vmem:[%s2817_s0 + $0x3a0] sm:$0xff]  ;;  %v534_v27 = vld [vmem:[%s2817_s0 + $0x3b0] sm:$0xff]  ;;  %531 = vst [vmem:[%s2822_s8 + $0x1c8] sm:$0xff] %v530_v25 }
  0x62   : > { %533 = vst [vmem:[%s2822_s8 + $0x1d0] sm:$0xff] %v532_v26  ;;  %535 = vst [vmem:[%s2822_s8 + $0x1d8] sm:$0xff] %v534_v27  ;;  %v536_v28 = vld [vmem:[%s2817_s0 + $0x3c0] sm:$0xff]  ;;  %v538_v29 = vld [vmem:[%s2817_s0 + $0x3d0] sm:$0xff] }
  0x63   : > { %v540_v30 = vld [vmem:[%s2817_s0 + $0x3e0] sm:$0xff]  ;;  %537 = vst [vmem:[%s2822_s8 + $0x1e0] sm:$0xff] %v536_v28  ;;  %539 = vst [vmem:[%s2822_s8 + $0x1e8] sm:$0xff] %v538_v29  ;;  %v542_v31 = vld [vmem:[%s2817_s0 + $0x3f0] sm:$0xff] }
  0x64   : > { %541 = vst [vmem:[%s2822_s8 + $0x1f0] sm:$0xff] %v540_v30  ;;  %543 = vst [vmem:[%s2822_s8 + $0x1f8] sm:$0xff] %v542_v31 }
  0x65 PF: > { %p2033_p1 = scmp.ge.s32.totalorder %s2593_s24, 1  ;;  %p556_p2 = scmp.lt.s32.totalorder %s2593_s24, 9 }
  0x67   : > { %p557_p3 = pnand %p2033_p1, %p556_p2 }
  0x68   : > { %s563_s11 = sand.u32 (!%p557_p3), 1, %s2561_s16   ;;  %s570_s5 = sand.u32 (!%p557_p3), 1, %s2553_s14  }
  0x69   : > { %560 = sbr.rel (%p557_p3) target bundleno = 556 (0x22c), region = 85  ;;  %s2034_s25 = sshll.u32 (!%p557_p3), %s563_s11, 8 }
  0x6a   : > { %s2035_s26 = sshll.u32 (!%p557_p3), %s570_s5, 9  ;;  %s597_s27 = sand.u32 (!%p557_p3), 1, %s2545_s12  }
  0x6b   : > { %s2955_s29 = sshll.u32 (!%p557_p3), %s2573_s19, 1  ;;  %s2036_s0 = sshll.u32 (!%p557_p3), %s597_s27, 8 }
  0x6c   : > { %p605_p4 = scmp.lt.s32.totalorder (!%p557_p3), %s2955_s29, 3  ;;  %s2965_s8 = scalar_lea.vmem (!%p557_p3), [#allocation3], %s2034_s25 }
  0x6d   : > { %s2967_s16 = scalar_lea.vmem (!%p557_p3), [#allocation4], %s2035_s26  ;;  %s2969_s14 = scalar_lea.vmem (!%p557_p3), [#allocation5], %s2036_s0 }
  0x6e   : > { %s2959_s30 = scalar_select %p605_p4, %s2955_s29, 3 }
  0x6f   : > { %p2038_p5 = scmp.ne.s32.totalorder %s2569_s18, 0 }
  0x70   : > { %s607_s10 = scalar_lea.vmem %s3454_s2, %s2959_s30 }
  0x71   : > { %614 = sbr.rel (%p2038_p5) target bundleno = 135 (0x87), region = 97 }
  0x76   : > { %v2595_v32 = vmov 0.0  }
  0x77   : > { %615 = vst [vmem:[#allocation2 + $0xb0] sm:$0xff] %v2595_v32  ;;  %616 = vst [vmem:[#allocation2] sm:$0xff] %v2595_v32 }
  0x78   : > { %617 = vst [vmem:[#allocation2 + $0xd8] sm:$0xff] %v2595_v32  ;;  %618 = vst [vmem:[#allocation2 + $0x18] sm:$0xff] %v2595_v32 }
  0x79   : > { %619 = vst [vmem:[#allocation2 + $0x50] sm:$0xff] %v2595_v32  ;;  %620 = vst [vmem:[#allocation2 + $0x68] sm:$0xff] %v2595_v32 }
  0x7a   : > { %621 = vst [vmem:[#allocation2 + $0x30] sm:$0xff] %v2595_v32  ;;  %622 = vst [vmem:[#allocation2 + $0x48] sm:$0xff] %v2595_v32 }
  0x7b   : > { %623 = vst [vmem:[#allocation2 + $0x80] sm:$0xff] %v2595_v32  ;;  %624 = vst [vmem:[#allocation2 + $0x88] sm:$0xff] %v2595_v32 }
  0x7c   : > { %625 = vst [vmem:[#allocation2 + $0xe8] sm:$0xff] %v2595_v32  ;;  %626 = vst [vmem:[#allocation2 + $0xb8] sm:$0xff] %v2595_v32 }
  0x7d   : > { %627 = vst [vmem:[#allocation2 + $0x60] sm:$0xff] %v2595_v32  ;;  %628 = vst [vmem:[#allocation2 + $0xf0] sm:$0xff] %v2595_v32 }
  0x7e   : > { %629 = vst [vmem:[#allocation2 + $0x8] sm:$0xff] %v2595_v32  ;;  %630 = vst [vmem:[#allocation2 + $0x78] sm:$0xff] %v2595_v32 }
  0x7f   : > { %631 = vst [vmem:[#allocation2 + $0x38] sm:$0xff] %v2595_v32  ;;  %632 = vst [vmem:[#allocation2 + $0x58] sm:$0xff] %v2595_v32 }
  0x80   : > { %633 = vst [vmem:[#allocation2 + $0x40] sm:$0xff] %v2595_v32  ;;  %634 = vst [vmem:[#allocation2 + $0xc8] sm:$0xff] %v2595_v32 }
  0x81   : > { %635 = vst [vmem:[#allocation2 + $0xe0] sm:$0xff] %v2595_v32  ;;  %636 = vst [vmem:[#allocation2 + $0x90] sm:$0xff] %v2595_v32 }
  0x82   : > { %637 = vst [vmem:[#allocation2 + $0x70] sm:$0xff] %v2595_v32  ;;  %638 = vst [vmem:[#allocation2 + $0xc0] sm:$0xff] %v2595_v32 }
  0x83   : > { %639 = vst [vmem:[#allocation2 + $0xa8] sm:$0xff] %v2595_v32  ;;  %640 = vst [vmem:[#allocation2 + $0xd0] sm:$0xff] %v2595_v32 }
  0x84   : > { %641 = vst [vmem:[#allocation2 + $0x10] sm:$0xff] %v2595_v32  ;;  %642 = vst [vmem:[#allocation2 + $0x28] sm:$0xff] %v2595_v32 }
  0x85   : > { %643 = vst [vmem:[#allocation2 + $0xa0] sm:$0xff] %v2595_v32  ;;  %644 = vst [vmem:[#allocation2 + $0xf8] sm:$0xff] %v2595_v32 }
  0x86   : > { %645 = vst [vmem:[#allocation2 + $0x20] sm:$0xff] %v2595_v32  ;;  %646 = vst [vmem:[#allocation2 + $0x98] sm:$0xff] %v2595_v32 }
  0x87 PF: > { %v2283_v33 = vld [vmem:[%s2967_s16 + $0x74] ss:$8 sps:$4 sm:$0xff]   ;;  %v2287_v35 = vld [vmem:[%s2967_s16 + $0x70] ss:$8 sps:$4 sm:$0xff]   ;;  %v2289_v37 = vld [vmem:[%s2967_s16 + $0x64] ss:$8 sps:$4 sm:$0xff]  }
  0x88   : > { %v2285_v34 = vld [vmem:[%s2967_s16 + $0x174] ss:$8 sps:$4 sm:$0xff]   ;;  %1255 = vmatprep.subr.bf16.mxu0 %v2283_v33  ;;  %v2288_v36 = vld [vmem:[%s2967_s16 + $0x170] ss:$8 sps:$4 sm:$0xff]   ;;  %v2291_v38 = vld [vmem:[%s2967_s16 + $0x164] ss:$8 sps:$4 sm:$0xff]  }
  0x89   : > { %1368 = vmatprep.subr.bf16.mxu1 %v2285_v34  ;;  %1256 = vmatpush1.bf16.msra.mxu0 %v2287_v35  ;;  %v2293_v39 = vld [vmem:[%s2967_s16 + $0x60] ss:$8 sps:$4 sm:$0xff]   ;;  %v2295_v41 = vld [vmem:[%s2967_s16 + $0x54] ss:$8 sps:$4 sm:$0xff]   ;;  %v2299_v43 = vld [vmem:[%s2967_s16 + $0x50] ss:$8 sps:$4 sm:$0xff]  }
  0x8a   : > { %1369 = vmatpush1.bf16.msra.mxu1 %v2288_v36  ;;  %1257 = vmatprep.subr.bf16.mxu0 %v2289_v37  ;;  %v2294_v40 = vld [vmem:[%s2967_s16 + $0x160] ss:$8 sps:$4 sm:$0xff]   ;;  %v2297_v42 = vld [vmem:[%s2967_s16 + $0x154] ss:$8 sps:$4 sm:$0xff]   ;;  %v2300_v44 = vld [vmem:[%s2967_s16 + $0x150] ss:$8 sps:$4 sm:$0xff]  }
  0x8b   : > { %1370 = vmatprep.subr.bf16.mxu1 %v2291_v38  ;;  %v2301_v45 = vld [vmem:[%s2967_s16 + $0x44] ss:$8 sps:$4 sm:$0xff]   ;;  %v2305_v47 = vld [vmem:[%s2967_s16 + $0x40] ss:$8 sps:$4 sm:$0xff]   ;;  %v2307_v49 = vld [vmem:[%s2967_s16 + $0x34] ss:$8 sps:$4 sm:$0xff]  }
  0x8c   : > { %v2303_v46 = vld [vmem:[%s2967_s16 + $0x144] ss:$8 sps:$4 sm:$0xff]   ;;  %v2306_v48 = vld [vmem:[%s2967_s16 + $0x140] ss:$8 sps:$4 sm:$0xff]   ;;  %v2309_v50 = vld [vmem:[%s2967_s16 + $0x134] ss:$8 sps:$4 sm:$0xff]  }
  0x8d   : > { %1258 = vmatpush1.bf16.msra.mxu0 %v2293_v39  ;;  %v2311_v51 = vld [vmem:[%s2967_s16 + $0x30] ss:$8 sps:$4 sm:$0xff]   ;;  %v2313_v53 = vld [vmem:[%s2967_s16 + $0x24] ss:$8 sps:$4 sm:$0xff]   ;;  %v2317_v55 = vld [vmem:[%s2967_s16 + $0x20] ss:$8 sps:$4 sm:$0xff]  }
  0x8e   : > { %1371 = vmatpush1.bf16.msra.mxu1 %v2294_v40  ;;  %1259 = vmatprep.subr.bf16.mxu0 %v2295_v41  ;;  %v2312_v52 = vld [vmem:[%s2967_s16 + $0x130] ss:$8 sps:$4 sm:$0xff]   ;;  %v2315_v54 = vld [vmem:[%s2967_s16 + $0x124] ss:$8 sps:$4 sm:$0xff]   ;;  %v2318_v56 = vld [vmem:[%s2967_s16 + $0x120] ss:$8 sps:$4 sm:$0xff]  }
  0x8f   : > { %1372 = vmatprep.subr.bf16.mxu1 %v2297_v42  ;;  %v2319_v57 = vld [vmem:[%s2967_s16 + $0x14] ss:$8 sps:$4 sm:$0xff]   ;;  %v2323_v59 = vld [vmem:[%s2967_s16 + $0x10] ss:$8 sps:$4 sm:$0xff]   ;;  %v2325_v61 = vld [vmem:[%s2967_s16 + $0x4] ss:$8 sps:$4 sm:$0xff]  }
  0x90   : > { %v2321_v58 = vld [vmem:[%s2967_s16 + $0x114] ss:$8 sps:$4 sm:$0xff]   ;;  %v2324_v60 = vld [vmem:[%s2967_s16 + $0x110] ss:$8 sps:$4 sm:$0xff]   ;;  %v2327_v62 = vld [vmem:[%s2967_s16 + $0x104] ss:$8 sps:$4 sm:$0xff]  }
  0x91   : > { %1260 = vmatpush1.bf16.msra.mxu0 %v2299_v43  ;;  %v2329_v63 = vld [vmem:[%s2967_s16] ss:$8 sps:$4 sm:$0xff]   ;;  %v2331_v1 = vld [vmem:[%s2967_s16 + $0xf4] ss:$8 sps:$4 sm:$0xff]   ;;  %v2335_v3 = vld [vmem:[%s2967_s16 + $0xf0] ss:$8 sps:$4 sm:$0xff]  }
  0x92   : > { %1373 = vmatpush1.bf16.msra.mxu1 %v2300_v44  ;;  %1261 = vmatprep.subr.bf16.mxu0 %v2301_v45  ;;  %v2330_v0 = vld [vmem:[%s2967_s16 + $0x100] ss:$8 sps:$4 sm:$0xff]   ;;  %v2333_v2 = vld [vmem:[%s2967_s16 + $0x1f4] ss:$8 sps:$4 sm:$0xff]   ;;  %v2336_v4 = vld [vmem:[%s2967_s16 + $0x1f0] ss:$8 sps:$4 sm:$0xff]  }
  0x93   : > { %1374 = vmatprep.subr.bf16.mxu1 %v2303_v46  ;;  %v2337_v5 = vld [vmem:[%s2967_s16 + $0xe4] ss:$8 sps:$4 sm:$0xff]   ;;  %v2341_v7 = vld [vmem:[%s2967_s16 + $0xe0] ss:$8 sps:$4 sm:$0xff]   ;;  %v2343_v9 = vld [vmem:[%s2967_s16 + $0xd4] ss:$8 sps:$4 sm:$0xff]  }
  0x94   : > { %v2339_v6 = vld [vmem:[%s2967_s16 + $0x1e4] ss:$8 sps:$4 sm:$0xff]   ;;  %v2342_v8 = vld [vmem:[%s2967_s16 + $0x1e0] ss:$8 sps:$4 sm:$0xff]   ;;  %v2345_v10 = vld [vmem:[%s2967_s16 + $0x1d4] ss:$8 sps:$4 sm:$0xff]  }
  0x95   : > { %1262 = vmatpush1.bf16.msra.mxu0 %v2305_v47  ;;  %v2347_v11 = vld [vmem:[%s2967_s16 + $0xd0] ss:$8 sps:$4 sm:$0xff]   ;;  %v2349_v13 = vld [vmem:[%s2967_s16 + $0xc4] ss:$8 sps:$4 sm:$0xff]   ;;  %v2353_v15 = vld [vmem:[%s2967_s16 + $0xc0] ss:$8 sps:$4 sm:$0xff]  }
  0x96   : > { %1375 = vmatpush1.bf16.msra.mxu1 %v2306_v48  ;;  %1263 = vmatprep.subr.bf16.mxu0 %v2307_v49  ;;  %v2348_v12 = vld [vmem:[%s2967_s16 + $0x1d0] ss:$8 sps:$4 sm:$0xff]   ;;  %v2351_v14 = vld [vmem:[%s2967_s16 + $0x1c4] ss:$8 sps:$4 sm:$0xff]   ;;  %v2354_v16 = vld [vmem:[%s2967_s16 + $0x1c0] ss:$8 sps:$4 sm:$0xff]  }
  0x97   : > { %1376 = vmatprep.subr.bf16.mxu1 %v2309_v50  ;;  %v2355_v17 = vld [vmem:[%s2967_s16 + $0xb4] ss:$8 sps:$4 sm:$0xff]   ;;  %v2359_v21 = vld [vmem:[%s2967_s16 + $0xb0] ss:$8 sps:$4 sm:$0xff]   ;;  %v2361_v23 = vld [vmem:[%s2967_s16 + $0xa4] ss:$8 sps:$4 sm:$0xff]  }
  0x98   : > { %v2381_v18 = vld [vmem:[%s2965_s8 + $0x4] ss:$16 sps:$4 sm:$0xff]   ;;  %v2384_v20 = vld [vmem:[%s2965_s8 + $0xc] ss:$16 sps:$4 sm:$0xff]   ;;  %v2360_v22 = vld [vmem:[%s2967_s16 + $0x1b0] ss:$8 sps:$4 sm:$0xff]  }
  0x99   : > { %1264 = vmatpush1.bf16.msra.mxu0 %v2311_v51  ;;  %v2357_v19 = vld [vmem:[%s2967_s16 + $0x1b4] ss:$8 sps:$4 sm:$0xff]   ;;  %1287 = vmatprep.mubr.bf16.mxu0 %v2381_v18  ;;  %v2363_v24 = vld [vmem:[%s2967_s16 + $0x1a4] ss:$8 sps:$4 sm:$0xff]   ;;  %v2365_v25 = vld [vmem:[%s2967_s16 + $0xa0] ss:$8 sps:$4 sm:$0xff]  }
  0x9a   : > { %1377 = vmatpush1.bf16.msra.mxu1 %v2312_v52  ;;  %1265 = vmatprep.subr.bf16.mxu0 %v2313_v53  ;;  %v2366_v26 = vld [vmem:[%s2967_s16 + $0x1a0] ss:$8 sps:$4 sm:$0xff]   ;;  %v2367_v27 = vld [vmem:[%s2967_s16 + $0x94] ss:$8 sps:$4 sm:$0xff]   ;;  %v2371_v29 = vld [vmem:[%s2967_s16 + $0x90] ss:$8 sps:$4 sm:$0xff]  }
  0x9b   : > { %1378 = vmatprep.subr.bf16.mxu1 %v2315_v54  ;;  %1400 = vmatprep.mubr.bf16.mxu1 %v2384_v20  ;;  %v2369_v28 = vld [vmem:[%s2967_s16 + $0x194] ss:$8 sps:$4 sm:$0xff]   ;;  %v2372_v30 = vld [vmem:[%s2967_s16 + $0x190] ss:$8 sps:$4 sm:$0xff]   ;;  %v2373_v31 = vld [vmem:[%s2967_s16 + $0x84] ss:$8 sps:$4 sm:$0xff]  }
  0x9c   : > { %v2375_v32 = vld [vmem:[%s2967_s16 + $0x184] ss:$8 sps:$4 sm:$0xff]   ;;  %v2377_v33 = vld [vmem:[%s2967_s16 + $0x80] ss:$8 sps:$4 sm:$0xff]   ;;  %p2135_p6 = scmp.ne.s32.totalorder %s2569_s18, 1 }
  0x9d   : > { %1266 = vmatpush1.bf16.msra.mxu0 %v2317_v55  ;;  %v2378_v34 = vld [vmem:[%s2967_s16 + $0x180] ss:$8 sps:$4 sm:$0xff]   ;;  %v2385_v37 = vld [vmem:[%s2965_s8 + $0x24] ss:$16 sps:$4 sm:$0xff]   ;;  %v2387_v38 = vld [vmem:[%s2965_s8 + $0x2c] ss:$16 sps:$4 sm:$0xff]  }
  0x9e   : > { %1379 = vmatpush1.bf16.msra.mxu1 %v2318_v56  ;;  %1267 = vmatprep.subr.bf16.mxu0 %v2319_v57  ;;  %v2379_v35 = vld [vmem:[%s2965_s8] ss:$16 sps:$4 sm:$0xff]   ;;  %v2382_v36 = vld [vmem:[%s2965_s8 + $0x8] ss:$16 sps:$4 sm:$0xff]   ;;  %v2391_v41 = vld [vmem:[%s2965_s8 + $0x44] ss:$16 sps:$4 sm:$0xff]  }
  0x9f   : > { %1380 = vmatprep.subr.bf16.mxu1 %v2321_v58  ;;  %v2389_v39 = vld [vmem:[%s2965_s8 + $0x20] ss:$16 sps:$4 sm:$0xff]   ;;  %v2390_v40 = vld [vmem:[%s2965_s8 + $0x28] ss:$16 sps:$4 sm:$0xff]   ;;  %v2393_v42 = vld [vmem:[%s2965_s8 + $0x4c] ss:$16 sps:$4 sm:$0xff]  }
  0xa0   : > { %v2395_v43 = vld [vmem:[%s2965_s8 + $0x40] ss:$16 sps:$4 sm:$0xff]   ;;  %v2396_v44 = vld [vmem:[%s2965_s8 + $0x48] ss:$16 sps:$4 sm:$0xff]   ;;  %v2397_v45 = vld [vmem:[%s2965_s8 + $0x64] ss:$16 sps:$4 sm:$0xff]  }
  0xa1   : > { %1268 = vmatpush1.bf16.msra.mxu0 %v2323_v59  ;;  %v2399_v46 = vld [vmem:[%s2965_s8 + $0x6c] ss:$16 sps:$4 sm:$0xff]   ;;  %v2401_v47 = vld [vmem:[%s2965_s8 + $0x60] ss:$16 sps:$4 sm:$0xff]   ;;  %v2402_v48 = vld [vmem:[%s2965_s8 + $0x68] ss:$16 sps:$4 sm:$0xff]  }
  0xa2   : > { %1381 = vmatpush1.bf16.msra.mxu1 %v2324_v60  ;;  %1269 = vmatprep.subr.bf16.mxu0 %v2325_v61  ;;  %v2403_v49 = vld [vmem:[%s2965_s8 + $0x84] ss:$16 sps:$4 sm:$0xff]   ;;  %v2405_v50 = vld [vmem:[%s2965_s8 + $0x8c] ss:$16 sps:$4 sm:$0xff]   ;;  %v2407_v51 = vld [vmem:[%s2965_s8 + $0x80] ss:$16 sps:$4 sm:$0xff]  }
  0xa3   : > { %1382 = vmatprep.subr.bf16.mxu1 %v2327_v62  ;;  %v2408_v52 = vld [vmem:[%s2965_s8 + $0x88] ss:$16 sps:$4 sm:$0xff]   ;;  %v2409_v53 = vld [vmem:[%s2965_s8 + $0xa4] ss:$16 sps:$4 sm:$0xff]   ;;  %v2411_v54 = vld [vmem:[%s2965_s8 + $0xac] ss:$16 sps:$4 sm:$0xff]  }
  0xa4   : > { %v2413_v55 = vld [vmem:[%s2965_s8 + $0xa0] ss:$16 sps:$4 sm:$0xff]   ;;  %v2414_v56 = vld [vmem:[%s2965_s8 + $0xa8] ss:$16 sps:$4 sm:$0xff]   ;;  %v2415_v57 = vld [vmem:[%s2965_s8 + $0xc4] ss:$16 sps:$4 sm:$0xff]  }
  0xa5   : > { %1270 = vmatpush1.bf16.msra.mxu0 %v2329_v63  ;;  %v2417_v58 = vld [vmem:[%s2965_s8 + $0xcc] ss:$16 sps:$4 sm:$0xff]   ;;  %v2419_v59 = vld [vmem:[%s2965_s8 + $0xc0] ss:$16 sps:$4 sm:$0xff]   ;;  %v2420_v60 = vld [vmem:[%s2965_s8 + $0xc8] ss:$16 sps:$4 sm:$0xff]  }
  0xa6   : > { %1383 = vmatpush1.bf16.msra.mxu1 %v2330_v0  ;;  %1271 = vmatprep.subr.bf16.mxu0 %v2331_v1  ;;  %v2421_v61 = vld [vmem:[%s2965_s8 + $0xe4] ss:$16 sps:$4 sm:$0xff]   ;;  %v2423_v62 = vld [vmem:[%s2965_s8 + $0xec] ss:$16 sps:$4 sm:$0xff]   ;;  %v2425_v63 = vld [vmem:[%s2965_s8 + $0xe0] ss:$16 sps:$4 sm:$0xff]  }
  0xa7   : > { %1384 = vmatprep.subr.bf16.mxu1 %v2333_v2  ;;  %v2426_v0 = vld [vmem:[%s2965_s8 + $0xe8] ss:$16 sps:$4 sm:$0xff]   ;;  %v647_v2 = vld [vmem:[#allocation2 + $0xb0] sm:$0xff] }
  0xa9   : > { %1272 = vmatpush2.bf16.msra.mxu0 %v2335_v3 }
  0xaa   : > { %1385 = vmatpush2.bf16.msra.mxu1 %v2336_v4  ;;  %1273 = vmatprep.subr.bf16.mxu0 %v2337_v5 }
  0xab   : > { %1386 = vmatprep.subr.bf16.mxu1 %v2339_v6  ;;  %v648_v6 = vld [vmem:[#allocation2] sm:$0xff] }
  0xad   : > { %1274 = vmatpush2.bf16.msra.mxu0 %v2341_v7 }
  0xae   : > { %1387 = vmatpush2.bf16.msra.mxu1 %v2342_v8  ;;  %1275 = vmatprep.subr.bf16.mxu0 %v2343_v9 }
  0xaf   : > { %1388 = vmatprep.subr.bf16.mxu1 %v2345_v10 }
  0xb1   : > { %1276 = vmatpush2.bf16.msra.mxu0 %v2347_v11  ;;  %v649_v11 = vld [vmem:[#allocation2 + $0xd8] sm:$0xff] }
  0xb2   : > { %1389 = vmatpush2.bf16.msra.mxu1 %v2348_v12  ;;  %1277 = vmatprep.subr.bf16.mxu0 %v2349_v13 }
  0xb3   : > { %1390 = vmatprep.subr.bf16.mxu1 %v2351_v14 }
  0xb5   : > { %1278 = vmatpush2.bf16.msra.mxu0 %v2353_v15 }
  0xb6   : > { %1391 = vmatpush2.bf16.msra.mxu1 %v2354_v16  ;;  %1279 = vmatprep.subr.bf16.mxu0 %v2355_v17  ;;  %v650_v16 = vld [vmem:[#allocation2 + $0x18] sm:$0xff] }
  0xb7   : > { %1392 = vmatprep.subr.bf16.mxu1 %v2357_v19 }
  0xb9   : > { %1280 = vmatpush2.bf16.msra.mxu0 %v2359_v21  ;;  %v651_v21 = vld [vmem:[#allocation2 + $0x50] sm:$0xff] }
  0xba   : > { %1393 = vmatpush2.bf16.msra.mxu1 %v2360_v22  ;;  %1281 = vmatprep.subr.bf16.mxu0 %v2361_v23 }
  0xbb   : > { %1394 = vmatprep.subr.bf16.mxu1 %v2363_v24 }
  0xbd   : > { %1282 = vmatpush2.bf16.msra.mxu0 %v2365_v25 }
  0xbe   : > { %1395 = vmatpush2.bf16.msra.mxu1 %v2366_v26  ;;  %1283 = vmatprep.subr.bf16.mxu0 %v2367_v27  ;;  %v652_v26 = vld [vmem:[#allocation2 + $0x68] sm:$0xff] }
  0xbf   : > { %1396 = vmatprep.subr.bf16.mxu1 %v2369_v28 }
  0xc1   : > { %1284 = vmatpush2.bf16.msra.mxu0 %v2371_v29 }
  0xc2   : > { %1397 = vmatpush2.bf16.msra.mxu1 %v2372_v30  ;;  %1285 = vmatprep.subr.bf16.mxu0 %v2373_v31  ;;  %v653_v31 = vld [vmem:[#allocation2 + $0x30] sm:$0xff] }
  0xc3   : > { %1398 = vmatprep.subr.bf16.mxu1 %v2375_v32 }
  0xc5   : > { %1286 = vmatpush2.bf16.msra.mxu0 %v2377_v33 }
  0xc6   : > { %1399 = vmatpush2.bf16.msra.mxu1 %v2378_v34 }
  0xc8   : > { %1288 = vmatmul.mubr.bf16.vlgmr.msra.gmra.mxu0 %v2379_v35 }
  0xc9   : > { %1401 = vmatmul.mubr.bf16.vlgmr.msra.gmra.mxu1 %v2382_v36  ;;  %1297 = vmatprep.mubr.bf16.mxu0 %v2385_v37  ;;  %v654_v36 = vld [vmem:[#allocation2 + $0x48] sm:$0xff] }
  0xca   : > { %1410 = vmatprep.mubr.bf16.mxu1 %v2387_v38 }
  0xd0   : > { %1298 = vmatmul.mubr.bf16.gmra.mxu0 %v2389_v39 }
  0xd1   : > { %1411 = vmatmul.mubr.bf16.gmra.mxu1 %v2390_v40  ;;  %1307 = vmatprep.mubr.bf16.mxu0 %v2391_v41  ;;  %v655_v41 = vld [vmem:[#allocation2 + $0x80] sm:$0xff] }
  0xd2   : > { %1420 = vmatprep.mubr.bf16.mxu1 %v2393_v42 }
  0xd8   : > { %1308 = vmatmul.mubr.bf16.gmra.mxu0 %v2395_v43 }
  0xd9   : > { %1421 = vmatmul.mubr.bf16.gmra.mxu1 %v2396_v44  ;;  %1317 = vmatprep.mubr.bf16.mxu0 %v2397_v45 }
  0xda   : > { %1430 = vmatprep.mubr.bf16.mxu1 %v2399_v46  ;;  %v656_v46 = vld [vmem:[#allocation2 + $0x88] sm:$0xff] }
  0xe0   : > { %1318 = vmatmul.mubr.bf16.gmra.mxu0 %v2401_v47 }
  0xe1   : > { %1431 = vmatmul.mubr.bf16.gmra.mxu1 %v2402_v48  ;;  %1327 = vmatprep.mubr.bf16.mxu0 %v2403_v49 }
  0xe2   : > { %1440 = vmatprep.mubr.bf16.mxu1 %v2405_v50 }
  0xe8   : > { %1328 = vmatmul.mubr.bf16.gmra.mxu0 %v2407_v51  ;;  %v657_v51 = vld [vmem:[#allocation2 + $0xe8] sm:$0xff] }
  0xe9   : > { %1441 = vmatmul.mubr.bf16.gmra.mxu1 %v2408_v52  ;;  %1337 = vmatprep.mubr.bf16.mxu0 %v2409_v53 }
  0xea   : > { %1450 = vmatprep.mubr.bf16.mxu1 %v2411_v54 }
  0xf0   : > { %1338 = vmatmul.mubr.bf16.gmra.mxu0 %v2413_v55 }
  0xf1   : > { %1451 = vmatmul.mubr.bf16.gmra.mxu1 %v2414_v56  ;;  %1347 = vmatprep.mubr.bf16.mxu0 %v2415_v57  ;;  %v658_v56 = vld [vmem:[#allocation2 + $0xb8] sm:$0xff] }
  0xf2   : > { %1460 = vmatprep.mubr.bf16.mxu1 %v2417_v58 }
  0xf8   : > { %1348 = vmatmul.mubr.bf16.gmra.mxu0 %v2419_v59 }
  0xf9   : > { %1461 = vmatmul.mubr.bf16.gmra.mxu1 %v2420_v60  ;;  %1357 = vmatprep.mubr.bf16.mxu0 %v2421_v61  ;;  %v659_v61 = vld [vmem:[#allocation2 + $0x60] sm:$0xff] }
  0xfa   : > { %1470 = vmatprep.mubr.bf16.mxu1 %v2423_v62 }
 0x100   : > { %1358 = vmatmul.mubr.bf16.gmra.mxu0 %v2425_v63 }
 0x101   : > { %1471 = vmatmul.mubr.bf16.gmra.mxu1 %v2426_v0 }
 0x188   : > { %v1289_v1 = vpop.f32.mrf.mxu0 }
 0x189   : > { %v1402_v3 = vpop.f32.mrf.mxu1 }
 0x18a   : > { %v1403_v4 = vadd.f32 %v1402_v3, %v1289_v1  ;;  %v1291_v5 = vpop.f32.mrf.mxu0 }
 0x18b   : > { %v1404_v7 = vpop.f32.mrf.mxu1 }
 0x18c   : > { %v1481_v8 = vadd.f32 %v1403_v4, %v647_v2  ;;  %v1405_v9 = vadd.f32 %v1404_v7, %v1291_v5  ;;  %v1293_v10 = vpop.f32.mrf.mxu0  ;;  %v660_v2 = vld [vmem:[#allocation2 + $0xf0] sm:$0xff]  ;;  %v661_v7 = vld [vmem:[#allocation2 + $0x8] sm:$0xff] }
 0x18d   : > { %v1406_v12 = vpop.f32.mrf.mxu1 }
 0x18e   : > { %1513 = vst [vmem:[#allocation2 + $0xb0] sm:$0xff] %v1481_v8  ;;  %v1482_v13 = vadd.f32 %v1405_v9, %v648_v6  ;;  %v1407_v14 = vadd.f32 %v1406_v12, %v1293_v10  ;;  %v1295_v15 = vpop.f32.mrf.mxu0  ;;  %v662_v12 = vld [vmem:[#allocation2 + $0x78] sm:$0xff] }
 0x18f   : > { %v1408_v17 = vpop.f32.mrf.mxu1 }
 0x190   : > { %1514 = vst [vmem:[#allocation2] sm:$0xff] %v1482_v13  ;;  %v1483_v18 = vadd.f32 %v1407_v14, %v649_v11  ;;  %v1409_v19 = vadd.f32 %v1408_v17, %v1295_v15  ;;  %v1299_v20 = vpop.f32.mrf.mxu0  ;;  %v663_v17 = vld [vmem:[#allocation2 + $0x38] sm:$0xff] }
 0x191   : > { %v1412_v22 = vpop.f32.mrf.mxu1 }
 0x192   : > { %1515 = vst [vmem:[#allocation2 + $0xd8] sm:$0xff] %v1483_v18  ;;  %v1484_v23 = vadd.f32 %v1409_v19, %v650_v16  ;;  %v1413_v24 = vadd.f32 %v1412_v22, %v1299_v20  ;;  %v1301_v25 = vpop.f32.mrf.mxu0  ;;  %v664_v22 = vld [vmem:[#allocation2 + $0x58] sm:$0xff] }
 0x193   : > { %v1414_v27 = vpop.f32.mrf.mxu1 }
 0x194   : > { %1516 = vst [vmem:[#allocation2 + $0x18] sm:$0xff] %v1484_v23  ;;  %v1485_v28 = vadd.f32 %v1413_v24, %v651_v21  ;;  %v1415_v29 = vadd.f32 %v1414_v27, %v1301_v25  ;;  %v1303_v30 = vpop.f32.mrf.mxu0  ;;  %v665_v27 = vld [vmem:[#allocation2 + $0x40] sm:$0xff] }
 0x195   : > { %v1416_v32 = vpop.f32.mrf.mxu1 }
 0x196   : > { %1517 = vst [vmem:[#allocation2 + $0x50] sm:$0xff] %v1485_v28  ;;  %v1486_v33 = vadd.f32 %v1415_v29, %v652_v26  ;;  %v1417_v34 = vadd.f32 %v1416_v32, %v1303_v30  ;;  %v1305_v35 = vpop.f32.mrf.mxu0  ;;  %v666_v32 = vld [vmem:[#allocation2 + $0xc8] sm:$0xff] }
 0x197   : > { %v1418_v37 = vpop.f32.mrf.mxu1 }
 0x198   : > { %1518 = vst [vmem:[#allocation2 + $0x68] sm:$0xff] %v1486_v33  ;;  %v1487_v38 = vadd.f32 %v1417_v34, %v653_v31  ;;  %v1419_v39 = vadd.f32 %v1418_v37, %v1305_v35  ;;  %v1309_v40 = vpop.f32.mrf.mxu0  ;;  %v667_v37 = vld [vmem:[#allocation2 + $0xe0] sm:$0xff] }
 0x199   : > { %v1422_v42 = vpop.f32.mrf.mxu1 }
 0x19a   : > { %1519 = vst [vmem:[#allocation2 + $0x30] sm:$0xff] %v1487_v38  ;;  %v1488_v43 = vadd.f32 %v1419_v39, %v654_v36  ;;  %v1423_v44 = vadd.f32 %v1422_v42, %v1309_v40  ;;  %v1311_v45 = vpop.f32.mrf.mxu0  ;;  %v668_v42 = vld [vmem:[#allocation2 + $0x90] sm:$0xff] }
 0x19b   : > { %v1424_v47 = vpop.f32.mrf.mxu1 }
 0x19c   : > { %1520 = vst [vmem:[#allocation2 + $0x48] sm:$0xff] %v1488_v43  ;;  %v1489_v48 = vadd.f32 %v1423_v44, %v655_v41  ;;  %v1425_v49 = vadd.f32 %v1424_v47, %v1311_v45  ;;  %v1313_v50 = vpop.f32.mrf.mxu0  ;;  %v669_v47 = vld [vmem:[#allocation2 + $0x70] sm:$0xff] }
 0x19d   : > { %v1426_v52 = vpop.f32.mrf.mxu1 }
 0x19e   : > { %1521 = vst [vmem:[#allocation2 + $0x80] sm:$0xff] %v1489_v48  ;;  %v1490_v53 = vadd.f32 %v1425_v49, %v656_v46  ;;  %v1427_v54 = vadd.f32 %v1426_v52, %v1313_v50  ;;  %v1315_v55 = vpop.f32.mrf.mxu0  ;;  %v670_v52 = vld [vmem:[#allocation2 + $0xc0] sm:$0xff] }
 0x19f   : > { %v1428_v57 = vpop.f32.mrf.mxu1 }
 0x1a0   : > { %1522 = vst [vmem:[#allocation2 + $0x88] sm:$0xff] %v1490_v53  ;;  %v1491_v58 = vadd.f32 %v1427_v54, %v657_v51  ;;  %v1429_v59 = vadd.f32 %v1428_v57, %v1315_v55  ;;  %v1319_v60 = vpop.f32.mrf.mxu0  ;;  %v671_v57 = vld [vmem:[#allocation2 + $0xa8] sm:$0xff] }
 0x1a1   : > { %v1432_v62 = vpop.f32.mrf.mxu1 }
 0x1a2   : > { %1523 = vst [vmem:[#allocation2 + $0xe8] sm:$0xff] %v1491_v58  ;;  %v1492_v63 = vadd.f32 %v1429_v59, %v658_v56  ;;  %v1433_v0 = vadd.f32 %v1432_v62, %v1319_v60  ;;  %v1321_v1 = vpop.f32.mrf.mxu0  ;;  %v672_v62 = vld [vmem:[#allocation2 + $0xd0] sm:$0xff] }
 0x1a3   : > { %v1434_v3 = vpop.f32.mrf.mxu1 }
 0x1a4   : > { %1524 = vst [vmem:[#allocation2 + $0xb8] sm:$0xff] %v1492_v63  ;;  %v1493_v4 = vadd.f32 %v1433_v0, %v659_v61  ;;  %v1435_v5 = vadd.f32 %v1434_v3, %v1321_v1  ;;  %v1323_v6 = vpop.f32.mrf.mxu0  ;;  %v673_v3 = vld [vmem:[#allocation2 + $0x10] sm:$0xff] }
 0x1a5   : > { %v1436_v8 = vpop.f32.mrf.mxu1 }
 0x1a6   : > { %1525 = vst [vmem:[#allocation2 + $0x60] sm:$0xff] %v1493_v4  ;;  %v1494_v9 = vadd.f32 %v1435_v5, %v660_v2  ;;  %v1437_v10 = vadd.f32 %v1436_v8, %v1323_v6  ;;  %v1325_v11 = vpop.f32.mrf.mxu0  ;;  %v674_v8 = vld [vmem:[#allocation2 + $0x28] sm:$0xff] }
 0x1a7   : > { %v1438_v13 = vpop.f32.mrf.mxu1 }
 0x1a8   : > { %1526 = vst [vmem:[#allocation2 + $0xf0] sm:$0xff] %v1494_v9  ;;  %v1495_v14 = vadd.f32 %v1437_v10, %v661_v7  ;;  %v1439_v15 = vadd.f32 %v1438_v13, %v1325_v11  ;;  %v1329_v16 = vpop.f32.mrf.mxu0  ;;  %v675_v13 = vld [vmem:[#allocation2 + $0xa0] sm:$0xff] }
 0x1a9   : > { %v1442_v18 = vpop.f32.mrf.mxu1 }
 0x1aa   : > { %1527 = vst [vmem:[#allocation2 + $0x8] sm:$0xff] %v1495_v14  ;;  %v1496_v19 = vadd.f32 %v1439_v15, %v662_v12  ;;  %v1443_v20 = vadd.f32 %v1442_v18, %v1329_v16  ;;  %v1331_v21 = vpop.f32.mrf.mxu0  ;;  %v676_v18 = vld [vmem:[#allocation2 + $0xf8] sm:$0xff] }
 0x1ab   : > { %v1444_v23 = vpop.f32.mrf.mxu1 }
 0x1ac   : > { %1528 = vst [vmem:[#allocation2 + $0x78] sm:$0xff] %v1496_v19  ;;  %v1497_v24 = vadd.f32 %v1443_v20, %v663_v17  ;;  %v1445_v25 = vadd.f32 %v1444_v23, %v1331_v21  ;;  %v1333_v26 = vpop.f32.mrf.mxu0  ;;  %v677_v23 = vld [vmem:[#allocation2 + $0x20] sm:$0xff] }
 0x1ad   : > { %v1446_v28 = vpop.f32.mrf.mxu1 }
 0x1ae   : > { %1529 = vst [vmem:[#allocation2 + $0x38] sm:$0xff] %v1497_v24  ;;  %v1498_v29 = vadd.f32 %v1445_v25, %v664_v22  ;;  %v1447_v30 = vadd.f32 %v1446_v28, %v1333_v26  ;;  %v1335_v31 = vpop.f32.mrf.mxu0  ;;  %v678_v28 = vld [vmem:[#allocation2 + $0x98] sm:$0xff] }
 0x1af   : > { %v1448_v33 = vpop.f32.mrf.mxu1 }
 0x1b0   : > { %1530 = vst [vmem:[#allocation2 + $0x58] sm:$0xff] %v1498_v29  ;;  %v1499_v34 = vadd.f32 %v1447_v30, %v665_v27  ;;  %v1449_v35 = vadd.f32 %v1448_v33, %v1335_v31  ;;  %v1339_v36 = vpop.f32.mrf.mxu0 }
 0x1b1   : > { %v1452_v38 = vpop.f32.mrf.mxu1 }
 0x1b2   : > { %1531 = vst [vmem:[#allocation2 + $0x40] sm:$0xff] %v1499_v34  ;;  %v1500_v39 = vadd.f32 %v1449_v35, %v666_v32  ;;  %v1453_v40 = vadd.f32 %v1452_v38, %v1339_v36  ;;  %v1341_v41 = vpop.f32.mrf.mxu0 }
 0x1b3   : > { %v1454_v43 = vpop.f32.mrf.mxu1 }
 0x1b4   : > { %1532 = vst [vmem:[#allocation2 + $0xc8] sm:$0xff] %v1500_v39  ;;  %v1501_v44 = vadd.f32 %v1453_v40, %v667_v37  ;;  %v1455_v45 = vadd.f32 %v1454_v43, %v1341_v41  ;;  %v1343_v46 = vpop.f32.mrf.mxu0 }
 0x1b5   : > { %v1456_v48 = vpop.f32.mrf.mxu1 }
 0x1b6   : > { %1533 = vst [vmem:[#allocation2 + $0xe0] sm:$0xff] %v1501_v44  ;;  %v1502_v49 = vadd.f32 %v1455_v45, %v668_v42  ;;  %v1457_v50 = vadd.f32 %v1456_v48, %v1343_v46  ;;  %v1345_v51 = vpop.f32.mrf.mxu0 }
 0x1b7   : > { %v1458_v53 = vpop.f32.mrf.mxu1 }
 0x1b8   : > { %1534 = vst [vmem:[#allocation2 + $0x90] sm:$0xff] %v1502_v49  ;;  %v1503_v54 = vadd.f32 %v1457_v50, %v669_v47  ;;  %v1459_v55 = vadd.f32 %v1458_v53, %v1345_v51  ;;  %v1349_v56 = vpop.f32.mrf.mxu0 }
 0x1b9   : > { %v1462_v58 = vpop.f32.mrf.mxu1 }
 0x1ba   : > { %1535 = vst [vmem:[#allocation2 + $0x70] sm:$0xff] %v1503_v54  ;;  %v1504_v59 = vadd.f32 %v1459_v55, %v670_v52  ;;  %v1463_v60 = vadd.f32 %v1462_v58, %v1349_v56  ;;  %v1351_v61 = vpop.f32.mrf.mxu0 }
 0x1bb   : > { %v1464_v63 = vpop.f32.mrf.mxu1 }
 0x1bc   : > { %1536 = vst [vmem:[#allocation2 + $0xc0] sm:$0xff] %v1504_v59  ;;  %v1505_v0 = vadd.f32 %v1463_v60, %v671_v57  ;;  %v1465_v1 = vadd.f32 %v1464_v63, %v1351_v61  ;;  %v1353_v2 = vpop.f32.mrf.mxu0 }
 0x1bd   : > { %v1466_v4 = vpop.f32.mrf.mxu1 }
 0x1be   : > { %1537 = vst [vmem:[#allocation2 + $0xa8] sm:$0xff] %v1505_v0  ;;  %v1506_v5 = vadd.f32 %v1465_v1, %v672_v62  ;;  %v1467_v6 = vadd.f32 %v1466_v4, %v1353_v2  ;;  %v1355_v7 = vpop.f32.mrf.mxu0 }
 0x1bf   : > { %v1468_v9 = vpop.f32.mrf.mxu1 }
 0x1c0   : > { %1538 = vst [vmem:[#allocation2 + $0xd0] sm:$0xff] %v1506_v5  ;;  %v1507_v10 = vadd.f32 %v1467_v6, %v673_v3  ;;  %v1469_v11 = vadd.f32 %v1468_v9, %v1355_v7  ;;  %v1359_v12 = vpop.f32.mrf.mxu0 }
 0x1c1   : > { %v1472_v14 = vpop.f32.mrf.mxu1 }
 0x1c2   : > { %1539 = vst [vmem:[#allocation2 + $0x10] sm:$0xff] %v1507_v10  ;;  %v1508_v15 = vadd.f32 %v1469_v11, %v674_v8  ;;  %v1473_v16 = vadd.f32 %v1472_v14, %v1359_v12  ;;  %v1361_v17 = vpop.f32.mrf.mxu0 }
 0x1c3   : > { %v1474_v19 = vpop.f32.mrf.mxu1 }
 0x1c4   : > { %1540 = vst [vmem:[#allocation2 + $0x28] sm:$0xff] %v1508_v15  ;;  %v1509_v20 = vadd.f32 %v1473_v16, %v675_v13  ;;  %v1475_v21 = vadd.f32 %v1474_v19, %v1361_v17  ;;  %v1363_v22 = vpop.f32.mrf.mxu0 }
 0x1c5   : > { %v1476_v24 = vpop.f32.mrf.mxu1 }
 0x1c6   : > { %1541 = vst [vmem:[#allocation2 + $0xa0] sm:$0xff] %v1509_v20  ;;  %v1510_v25 = vadd.f32 %v1475_v21, %v676_v18  ;;  %v1477_v26 = vadd.f32 %v1476_v24, %v1363_v22  ;;  %v1365_v27 = vpop.f32.mrf.mxu0 }
 0x1c7   : > { %v1478_v29 = vpop.f32.mrf.mxu1 }
 0x1c8   : > { %1542 = vst [vmem:[#allocation2 + $0xf8] sm:$0xff] %v1510_v25  ;;  %v1511_v30 = vadd.f32 %v1477_v26, %v677_v23  ;;  %v1479_v31 = vadd.f32 %v1478_v29, %v1365_v27  ;;  %1548 = sbr.rel (%p2135_p6) target bundleno = 530 (0x212), region = 101 }
 0x1ca   : > { %1543 = vst [vmem:[#allocation2 + $0x20] sm:$0xff] %v1511_v30  ;;  %v1512_v32 = vadd.f32 %v1479_v31, %v678_v28 }
 0x1cc   : > { %1544 = vst [vmem:[#allocation2 + $0x98] sm:$0xff] %v1512_v32 }
 0x1cd   : > { %v1583_v33 = vlaneseq  ;;  %v1581_v35 = vld [vmem:[%s607_s10] sm:$0x3]  ;;  %v1549_v36 = vld [vmem:[#allocation2 + $0xb0] sm:$0xff]  ;;  %v1551_v40 = vld [vmem:[#allocation2 + $0xd8] sm:$0xff] }
 0x1ce   : > { %v1550_v39 = vld [vmem:[#allocation2] sm:$0xff]  ;;  %v1552_v41 = vld [vmem:[#allocation2 + $0x18] sm:$0xff]  ;;  %v1553_v44 = vld [vmem:[#allocation2 + $0x50] sm:$0xff] }
 0x1cf   : > { %v1584_v34 = vshrl.u32 %v1583_v33, 7  ;;  %v1554_v45 = vld [vmem:[#allocation2 + $0x68] sm:$0xff]  ;;  %v1555_v46 = vld [vmem:[#allocation2 + $0x30] sm:$0xff]  ;;  %v1557_v60 = vld [vmem:[#allocation2 + $0x80] sm:$0xff] }
 0x1d0   : > { %v1556_v47 = vld [vmem:[#allocation2 + $0x48] sm:$0xff]  ;;  %v1560_v0 = vld [vmem:[#allocation2 + $0xb8] sm:$0xff]  ;;  %v1561_v2 = vld [vmem:[#allocation2 + $0x60] sm:$0xff] }
 0x1d1   : > { %v1585_v37 = vsub.s32 0, %v1584_v34  ;;  %v1589_v38 = vsub.s32 1, %v1584_v34  ;;  %v1558_v62 = vld [vmem:[#allocation2 + $0x88] sm:$0xff]  ;;  %v1562_v11 = vld [vmem:[#allocation2 + $0xf0] sm:$0xff]  ;;  %v1564_v14 = vld [vmem:[#allocation2 + $0x78] sm:$0xff] }
 0x1d2   : > { %v1559_v63 = vld [vmem:[#allocation2 + $0xe8] sm:$0xff]  ;;  %v1565_v15 = vld [vmem:[#allocation2 + $0x38] sm:$0xff]  ;;  %v1567_v26 = vld [vmem:[#allocation2 + $0x40] sm:$0xff] }
 0x1d3   : > { %v3074_v42 = vrot.slane %v1581_v35, %v1585_v37  ;;  %v3076_v43 = vrot.slane %v1581_v35, %v1589_v38  ;;  %v1563_v13 = vld [vmem:[#allocation2 + $0x8] sm:$0xff]  ;;  %v1566_v17 = vld [vmem:[#allocation2 + $0x58] sm:$0xff]  ;;  %v1569_v29 = vld [vmem:[#allocation2 + $0xe0] sm:$0xff] }
 0x1d4   : > { %v1568_v28 = vld [vmem:[#allocation2 + $0xc8] sm:$0xff]  ;;  %v1570_v33 = vld [vmem:[#allocation2 + $0x90] sm:$0xff] }
 0x1d5   : > { %v3079_v48 = vadd.f32 %v3074_v42, %v1549_v36  ;;  %v3082_v49 = vadd.f32 %v3076_v43, %v1550_v39  ;;  %v3085_v50 = vadd.f32 %v3074_v42, %v1551_v40  ;;  %v3088_v51 = vadd.f32 %v3076_v43, %v1552_v41 }
 0x1d6   : > { %v3091_v52 = vadd.f32 %v3074_v42, %v1553_v44  ;;  %v3094_v53 = vadd.f32 %v3076_v43, %v1554_v45  ;;  %v3099_v56 = vadd.f32 %v3074_v42, %v1555_v46  ;;  %v3102_v57 = vadd.f32 %v3076_v43, %v1556_v47 }
 0x1d7   : > { %v1657_v54 = vmul.f32 1.442695, %v3079_v48  ;;  %v1659_v55 = vmul.f32 1.442695, %v3082_v49  ;;  %v1661_v58 = vmul.f32 1.442695, %v3085_v50  ;;  %v3111_v5 = vadd.f32 %v3074_v42, %v1557_v60 }
 0x1d8   : > { %v1663_v59 = vmul.f32 1.442695, %v3088_v51  ;;  %v1665_v61 = vmul.f32 1.442695, %v3091_v52  ;;  %v1667_v1 = vmul.f32 1.442695, %v3094_v53  ;;  %v3114_v6 = vadd.f32 %v3076_v43, %v1558_v62 }
 0x1d9   : > { %2427 = vpow2.f32 %v1657_v54  ;;  %v1669_v3 = vmul.f32 1.442695, %v3099_v56  ;;  %v1671_v4 = vmul.f32 1.442695, %v3102_v57  ;;  %v3117_v7 = vadd.f32 %v3074_v42, %v1559_v63  ;;  %v1571_v62 = vld [vmem:[#allocation2 + $0x70] sm:$0xff] }
 0x1da   : > { %2429 = vpow2.f32 %v1659_v55  ;;  %v3120_v8 = vadd.f32 %v3076_v43, %v1560_v0  ;;  %v1673_v9 = vmul.f32 1.442695, %v3111_v5  ;;  %v3124_v10 = vadd.f32 %v3074_v42, %v1561_v2 }
 0x1db   : > { %2431 = vpow2.f32 %v1661_v58  ;;  %v1675_v12 = vmul.f32 1.442695, %v3114_v6  ;;  %vm1625_vm0 = vcmp.gt.f32.partialorder %v3079_v48, 0.0  ;;  %vm1626_vm1 = vcmp.gt.f32.partialorder %v3082_v49, 0.0 }
 0x1dc   : > { %2433 = vpow2.f32 %v1663_v59  ;;  %v1677_v16 = vmul.f32 1.442695, %v3117_v7  ;;  %v1679_v18 = vmul.f32 1.442695, %v3120_v8  ;;  %v1681_v19 = vmul.f32 1.442695, %v3124_v10 }
 0x1dd   : > { %2435 = vpow2.f32 %v1665_v61  ;;  %v3133_v20 = vadd.f32 %v3076_v43, %v1562_v11  ;;  %v3136_v21 = vadd.f32 %v3074_v42, %v1563_v13  ;;  %v3139_v22 = vadd.f32 %v3076_v43, %v1564_v14 }
 0x1de   : > { %2437 = vpow2.f32 %v1667_v1  ;;  %v3142_v23 = vadd.f32 %v3074_v42, %v1565_v15  ;;  %vm1627_vm2 = vcmp.gt.f32.partialorder %v3085_v50, 0.0  ;;  %v3147_v25 = vadd.f32 %v3076_v43, %v1566_v17 }
 0x1df   : > { %2439 = vpow2.f32 %v1669_v3  ;;  %v1683_v24 = vmul.f32 1.442695, %v3133_v20  ;;  %vm1628_vm3 = vcmp.gt.f32.partialorder %v3088_v51, 0.0  ;;  %vm1629_vm4 = vcmp.gt.f32.partialorder %v3091_v52, 0.0 }
 0x1e0   : > { %2441 = vpow2.f32 %v1671_v4  ;;  %v1685_v27 = vmul.f32 1.442695, %v3136_v21  ;;  %vm1630_vm5 = vcmp.gt.f32.partialorder %v3094_v53, 0.0  ;;  %vm1631_vm6 = vcmp.gt.f32.partialorder %v3099_v56, 0.0 }
 0x1e1   : > { %2443 = vpow2.f32 %v1673_v9  ;;  %v1687_v30 = vmul.f32 1.442695, %v3139_v22  ;;  %vm1632_vm7 = vcmp.gt.f32.partialorder %v3102_v57, 0.0  ;;  %v1689_v31 = vmul.f32 1.442695, %v3142_v23 }
 0x1e2   : > { %2445 = vpow2.f32 %v1675_v12  ;;  %v3158_v32 = vadd.f32 %v3074_v42, %v1567_v26  ;;  %vm1633_vm8 = vcmp.gt.f32.partialorder %v3111_v5, 0.0  ;;  %v1691_v35 = vmul.f32 1.442695, %v3147_v25 }
 0x1e3   : > { %2447 = vpow2.f32 %v1677_v16  ;;  %v3163_v36 = vadd.f32 %v3076_v43, %v1568_v28  ;;  %v3166_v37 = vadd.f32 %v3074_v42, %v1569_v29  ;;  %vm1634_vm9 = vcmp.gt.f32.partialorder %v3114_v6, 0.0  ;;  %v1573_v16 = vld [vmem:[#allocation2 + $0xa8] sm:$0xff] }
 0x1e4   : > { %2449 = vpow2.f32 %v1679_v18  ;;  %v1693_v40 = vmul.f32 1.442695, %v3158_v32  ;;  %vm1635_vm10 = vcmp.gt.f32.partialorder %v3117_v7, 0.0  ;;  %v3173_v46 = vadd.f32 %v3076_v43, %v1570_v33 }
 0x1e5   : > { %2451 = vpow2.f32 %v1681_v19  ;;  %v1695_v45 = vmul.f32 1.442695, %v3163_v36  ;;  %vm1636_vm11 = vcmp.gt.f32.partialorder %v3120_v8, 0.0  ;;  %vm1637_vm12 = vcmp.gt.f32.partialorder %v3124_v10, 0.0 }
 0x1e6   : > { %v2428_v34 = vpop.eup %2427  ;;  %2453 = vpow2.f32 %v1683_v24  ;;  %v1697_v61 = vmul.f32 1.442695, %v3166_v37  ;;  %vm1638_vm13 = vcmp.gt.f32.partialorder %v3133_v20, 0.0  ;;  %vm1639_vm14 = vcmp.gt.f32.partialorder %v3136_v21, 0.0 }
 0x1e7   : > { %v2430_v38 = vpop.eup %2429  ;;  %v2136_v39 = vadd.f32 -1.0, %v2428_v34  ;;  %2455 = vpow2.f32 %v1685_v27  ;;  %v1699_v4 = vmul.f32 1.442695, %v3173_v46  ;;  %v3201_v12 = vadd.f32 %v3074_v42, %v1571_v62 }
 0x1e8   : > { %v2432_v41 = vpop.eup %2431  ;;  %v2137_v44 = vadd.f32 -1.0, %v2430_v38  ;;  %2457 = vpow2.f32 %v1687_v30  ;;  %vm1640_vm15 = vcmp.gt.f32.partialorder %v3139_v22, 0.0  ;;  %v1575_v38 = vld [vmem:[#allocation2 + $0x10] sm:$0xff] }
 0x1e9   : > { %v2434_v47 = vpop.eup %2433  ;;  %v1753_v54 = vsel %vm1625_vm0, %v3079_v48, %v2136_v39  ;;  %v2138_v55 = vadd.f32 -1.0, %v2432_v41  ;;  %2459 = vpow2.f32 %v1689_v31  ;;  %v1701_v19 = vmul.f32 1.442695, %v3201_v12 }
 0x1ea   : > { %v2436_v58 = vpop.eup %2435  ;;  %1785 = vst [vmem:[%s2969_s14] sm:$0xff] %v1753_v54  ;;  %v1754_v59 = vsel %vm1626_vm1, %v3082_v49, %v2137_v44  ;;  %v2139_v60 = vadd.f32 -1.0, %v2434_v47  ;;  %2461 = vpow2.f32 %v1691_v35  ;;  %v1572_v49 = vld [vmem:[#allocation2 + $0xc0] sm:$0xff]  ;;  %vm1641_vm0 = vcmp.gt.f32.partialorder %v3142_v23, 0.0 }
 0x1eb   : > { %v2438_v48 = vpop.eup %2437  ;;  %1786 = vst [vmem:[%s2969_s14 + $0x8] sm:$0xff] %v1754_v59  ;;  %v1755_v63 = vsel %vm1627_vm2, %v3085_v50, %v2138_v55  ;;  %v2140_v0 = vadd.f32 -1.0, %v2436_v58  ;;  %2463 = vpow2.f32 %v1693_v40  ;;  %v3208_v15 = vadd.f32 %v3076_v43, %v1572_v49 }
 0x1ec   : > { %v2440_v1 = vpop.eup %2439  ;;  %1787 = vst [vmem:[%s2969_s14 + $0x10] sm:$0xff] %v1755_v63  ;;  %v1756_v2 = vsel %vm1628_vm3, %v3088_v51, %v2139_v60  ;;  %v2141_v3 = vadd.f32 -1.0, %v2438_v48  ;;  %2465 = vpow2.f32 %v1695_v45  ;;  %v3227_v31 = vadd.f32 %v3074_v42, %v1573_v16  ;;  %v1577_v48 = vld [vmem:[#allocation2 + $0xa0] sm:$0xff] }
 0x1ed   : > { %v2442_v50 = vpop.eup %2441  ;;  %1788 = vst [vmem:[%s2969_s14 + $0x18] sm:$0xff] %v1756_v2  ;;  %v1757_v9 = vsel %vm1629_vm4, %v3091_v52, %v2140_v0  ;;  %v2142_v11 = vadd.f32 -1.0, %v2440_v1  ;;  %2467 = vpow2.f32 %v1697_v61  ;;  %v1703_v28 = vmul.f32 1.442695, %v3208_v15  ;;  %v1579_v16 = vld [vmem:[#allocation2 + $0x20] sm:$0xff] }
 0x1ee   : > { %v2444_v51 = vpop.eup %2443  ;;  %1789 = vst [vmem:[%s2969_s14 + $0x20] sm:$0xff] %v1757_v9  ;;  %v1758_v13 = vsel %vm1630_vm5, %v3094_v53, %v2141_v3  ;;  %v2143_v14 = vadd.f32 -1.0, %v2442_v50  ;;  %2469 = vpow2.f32 %v1699_v4  ;;  %v1574_v53 = vld [vmem:[#allocation2 + $0xd0] sm:$0xff]  ;;  %vm1642_vm1 = vcmp.gt.f32.partialorder %v3147_v25, 0.0 }
 0x1ef   : > { %v2446_v52 = vpop.eup %2445  ;;  %1790 = vst [vmem:[%s2969_s14 + $0x28] sm:$0xff] %v1758_v13  ;;  %v1759_v17 = vsel %vm1631_vm6, %v3099_v56, %v2142_v11  ;;  %v2144_v18 = vadd.f32 -1.0, %v2444_v51  ;;  %2471 = vpow2.f32 %v1701_v19  ;;  %v3234_v35 = vadd.f32 %v3076_v43, %v1574_v53 }
 0x1f0   : > { %v2448_v24 = vpop.eup %2447  ;;  %1791 = vst [vmem:[%s2969_s14 + $0x30] sm:$0xff] %v1759_v17  ;;  %v1760_v26 = vsel %vm1632_vm7, %v3102_v57, %v2143_v14  ;;  %v2145_v27 = vadd.f32 -1.0, %v2446_v52  ;;  %2473 = vpow2.f32 %v1703_v28  ;;  %v1705_v41 = vmul.f32 1.442695, %v3227_v31 }
 0x1f1   : > { %v2450_v56 = vpop.eup %2449  ;;  %1792 = vst [vmem:[%s2969_s14 + $0x38] sm:$0xff] %v1760_v26  ;;  %v1761_v29 = vsel %vm1633_vm8, %v3111_v5, %v2144_v18  ;;  %v2146_v30 = vadd.f32 -1.0, %v2448_v24  ;;  %vm1643_vm2 = vcmp.gt.f32.partialorder %v3158_v32, 0.0  ;;  %v1707_v54 = vmul.f32 1.442695, %v3234_v35 }
 0x1f2   : > { %v2452_v33 = vpop.eup %2451  ;;  %1793 = vst [vmem:[%s2969_s14 + $0x40] sm:$0xff] %v1761_v29  ;;  %v1762_v57 = vsel %vm1634_vm9, %v3114_v6, %v2145_v27  ;;  %v2147_v34 = vadd.f32 -1.0, %v2450_v56  ;;  %v1576_v6 = vld [vmem:[#allocation2 + $0x28] sm:$0xff]  ;;  %2475 = vpow2.f32 %v1705_v41  ;;  %v3253_v59 = vadd.f32 %v3074_v42, %v1575_v38 }
 0x1f3   : > { %v2454_v5 = vpop.eup %2453  ;;  %1794 = vst [vmem:[%s2969_s14 + $0x48] sm:$0xff] %v1762_v57  ;;  %v1763_v39 = vsel %vm1635_vm10, %v3117_v7, %v2146_v30  ;;  %v2148_v40 = vadd.f32 -1.0, %v2452_v33  ;;  %2477 = vpow2.f32 %v1707_v54  ;;  %v3260_v62 = vadd.f32 %v3076_v43, %v1576_v6 }
 0x1f4   : > { %v2456_v44 = vpop.eup %2455  ;;  %1795 = vst [vmem:[%s2969_s14 + $0x50] sm:$0xff] %v1763_v39  ;;  %v1764_v45 = vsel %vm1636_vm11, %v3120_v8, %v2147_v34  ;;  %v2149_v47 = vadd.f32 -1.0, %v2454_v5  ;;  %vm1644_vm3 = vcmp.gt.f32.partialorder %v3163_v36, 0.0  ;;  %v1709_v49 = vmul.f32 1.442695, %v3253_v59 }
 0x1f5   : > { %v2458_v7 = vpop.eup %2457  ;;  %1796 = vst [vmem:[%s2969_s14 + $0x58] sm:$0xff] %v1764_v45  ;;  %v1765_v55 = vsel %vm1637_vm12, %v3124_v10, %v2148_v40  ;;  %v2150_v58 = vadd.f32 -1.0, %v2456_v44  ;;  %vm1645_vm4 = vcmp.gt.f32.partialorder %v3166_v37, 0.0  ;;  %v1711_v4 = vmul.f32 1.442695, %v3260_v62 }
 0x1f6   : > { %v2460_v60 = vpop.eup %2459  ;;  %1797 = vst [vmem:[%s2969_s14 + $0x60] sm:$0xff] %v1765_v55  ;;  %v1766_v8 = vsel %vm1638_vm13, %v3133_v20, %v2149_v47  ;;  %v2151_v61 = vadd.f32 -1.0, %v2458_v7  ;;  %v1578_v20 = vld [vmem:[#allocation2 + $0xf8] sm:$0xff]  ;;  %2479 = vpow2.f32 %v1709_v49  ;;  %v3279_v11 = vadd.f32 %v3074_v42, %v1577_v48 }
 0x1f7   : > { %v2462_v10 = vpop.eup %2461  ;;  %1798 = vst [vmem:[%s2969_s14 + $0x68] sm:$0xff] %v1766_v8  ;;  %v1767_v63 = vsel %vm1639_vm14, %v3136_v21, %v2150_v58  ;;  %v2152_v0 = vadd.f32 -1.0, %v2460_v60  ;;  %2481 = vpow2.f32 %v1711_v4  ;;  %v3286_v14 = vadd.f32 %v3076_v43, %v1578_v20 }
 0x1f8   : > { %v2464_v1 = vpop.eup %2463  ;;  %1799 = vst [vmem:[%s2969_s14 + $0x70] sm:$0xff] %v1767_v63  ;;  %v1768_v2 = vsel %vm1640_vm15, %v3139_v22, %v2151_v61  ;;  %v2153_v3 = vadd.f32 -1.0, %v2462_v10  ;;  %vm1646_vm5 = vcmp.gt.f32.partialorder %v3173_v46, 0.0  ;;  %vm1647_vm6 = vcmp.gt.f32.partialorder %v3201_v12, 0.0 }
 0x1f9   : > { %v2466_v21 = vpop.eup %2465  ;;  %1800 = vst [vmem:[%s2969_s14 + $0x78] sm:$0xff] %v1768_v2  ;;  %v1769_v50 = vsel %vm1641_vm0, %v3142_v23, %v2152_v0  ;;  %v2154_v9 = vadd.f32 -1.0, %v2464_v1  ;;  %v1580_v23 = vld [vmem:[#allocation2 + $0x98] sm:$0xff]  ;;  %v1715_v24 = vmul.f32 1.442695, %v3286_v14  ;;  %vm1648_vm7 = vcmp.gt.f32.partialorder %v3208_v15, 0.0 }
 0x1fa   : > { %v2468_v51 = vpop.eup %2467  ;;  %1801 = vst [vmem:[%s2969_s14 + $0x80] sm:$0xff] %v1769_v50  ;;  %v1770_v22 = vsel %vm1642_vm1, %v3147_v25, %v2153_v3  ;;  %v2155_v13 = vadd.f32 -1.0, %v2466_v21  ;;  %v1713_v25 = vmul.f32 1.442695, %v3279_v11  ;;  %v1624_v27 = vadd.f32 %v3076_v43, %v1580_v23 }
 0x1fb   : > { %v2470_v52 = vpop.eup %2469  ;;  %1802 = vst [vmem:[%s2969_s14 + $0x88] sm:$0xff] %v1770_v22  ;;  %v1771_v17 = vsel %vm1643_vm2, %v3158_v32, %v2154_v9  ;;  %v2156_v18 = vadd.f32 -1.0, %v2468_v51  ;;  %v1623_v32 = vadd.f32 %v3074_v42, %v1579_v16  ;;  %vm1649_vm8 = vcmp.gt.f32.partialorder %v3227_v31, 0.0 }
 0x1fc   : > { %1803 = vst [vmem:[%s2969_s14 + $0x90] sm:$0xff] %v1771_v17  ;;  %v1772_v19 = vsel %vm1644_vm3, %v3163_v36, %v2155_v13  ;;  %v2157_v53 = vadd.f32 -1.0, %v2470_v52  ;;  %2483 = vpow2.f32 %v1713_v25  ;;  %v2472_v28 = vpop.eup %2471  ;;  %v1719_v42 = vmul.f32 1.442695, %v1624_v27 }
 0x1fd   : > { %1804 = vst [vmem:[%s2969_s14 + $0x98] sm:$0xff] %v1772_v19  ;;  %v1773_v26 = vsel %vm1645_vm4, %v3166_v37, %v2156_v18  ;;  %2485 = vpow2.f32 %v1715_v24  ;;  %v2474_v36 = vpop.eup %2473  ;;  %v2158_v29 = vadd.f32 -1.0, %v2472_v28  ;;  %v1717_v37 = vmul.f32 1.442695, %v1623_v32 }
 0x1fe   : > { %1805 = vst [vmem:[%s2969_s14 + $0xa0] sm:$0xff] %v1773_v26  ;;  %v1774_v56 = vsel %vm1646_vm5, %v3173_v46, %v2157_v53  ;;  %v2159_v30 = vadd.f32 -1.0, %v2474_v36  ;;  %vm1650_vm9 = vcmp.gt.f32.partialorder %v3234_v35, 0.0  ;;  %vm1651_vm10 = vcmp.gt.f32.partialorder %v3253_v59, 0.0 }
 0x1ff   : > { %1806 = vst [vmem:[%s2969_s14 + $0xa8] sm:$0xff] %v1774_v56  ;;  %v1775_v43 = vsel %vm1647_vm6, %v3201_v12, %v2158_v29  ;;  %2487 = vpow2.f32 %v1717_v37  ;;  %v2476_v33 = vpop.eup %2475  ;;  %vm1652_vm11 = vcmp.gt.f32.partialorder %v3260_v62, 0.0  ;;  %vm1653_vm12 = vcmp.gt.f32.partialorder %v3279_v11, 0.0 }
 0x200   : > { %1807 = vst [vmem:[%s2969_s14 + $0xb0] sm:$0xff] %v1775_v43  ;;  %v1776_v46 = vsel %vm1648_vm7, %v3208_v15, %v2159_v30  ;;  %2489 = vpow2.f32 %v1719_v42  ;;  %v2478_v57 = vpop.eup %2477  ;;  %v2160_v34 = vadd.f32 -1.0, %v2476_v33  ;;  %vm1654_vm13 = vcmp.gt.f32.partialorder %v3286_v14, 0.0 }
 0x201   : > { %1808 = vst [vmem:[%s2969_s14 + $0xb8] sm:$0xff] %v1776_v46  ;;  %v2161_v38 = vadd.f32 -1.0, %v2478_v57  ;;  %vm1655_vm14 = vcmp.gt.f32.partialorder %v1623_v32, 0.0  ;;  %vm1656_vm15 = vcmp.gt.f32.partialorder %v1624_v27, 0.0 }
 0x202   : > { %v1777_v5 = vsel %vm1649_vm8, %v3227_v31, %v2160_v34 }
 0x203   : > { %v2480_v12 = vpop.eup %2479  ;;  %1809 = vst [vmem:[%s2969_s14 + $0xc0] sm:$0xff] %v1777_v5  ;;  %v1778_v39 = vsel %vm1650_vm9, %v3234_v35, %v2161_v38 }
 0x204   : > { %v2482_v15 = vpop.eup %2481  ;;  %1810 = vst [vmem:[%s2969_s14 + $0xc8] sm:$0xff] %v1778_v39  ;;  %v2162_v40 = vadd.f32 -1.0, %v2480_v12 }
 0x205   : > { %v2163_v41 = vadd.f32 -1.0, %v2482_v15 }
 0x206   : > { %v1779_v6 = vsel %vm1651_vm10, %v3253_v59, %v2162_v40 }
 0x207   : > { %1811 = vst [vmem:[%s2969_s14 + $0xd0] sm:$0xff] %v1779_v6  ;;  %v1780_v31 = vsel %vm1652_vm11, %v3260_v62, %v2163_v41 }
 0x208   : > { %1812 = vst [vmem:[%s2969_s14 + $0xd8] sm:$0xff] %v1780_v31 }
 0x209   : > { %v2484_v44 = vpop.eup %2483 }
 0x20a   : > { %v2486_v45 = vpop.eup %2485  ;;  %v2164_v35 = vadd.f32 -1.0, %v2484_v44 }
 0x20b   : > { %v2165_v47 = vadd.f32 -1.0, %v2486_v45 }
 0x20c   : > { %v1781_v54 = vsel %vm1653_vm12, %v3279_v11, %v2164_v35  ;;  %v2488_v7 = vpop.eup %2487 }
 0x20d   : > { %1813 = vst [vmem:[%s2969_s14 + $0xe0] sm:$0xff] %v1781_v54  ;;  %v1782_v55 = vsel %vm1654_vm13, %v3286_v14, %v2165_v47  ;;  %v2490_v58 = vpop.eup %2489  ;;  %v2166_v59 = vadd.f32 -1.0, %v2488_v7 }
 0x20e   : > { %1814 = vst [vmem:[%s2969_s14 + $0xe8] sm:$0xff] %v1782_v55  ;;  %v2167_v60 = vadd.f32 -1.0, %v2490_v58 }
 0x20f   : > { %v1783_v8 = vsel %vm1655_vm14, %v1623_v32, %v2166_v59 }
 0x210   : > { %1815 = vst [vmem:[%s2969_s14 + $0xf0] sm:$0xff] %v1783_v8  ;;  %v1784_v61 = vsel %vm1656_vm15, %v1624_v27, %v2167_v60 }
 0x211   : > { %1816 = vst [vmem:[%s2969_s14 + $0xf8] sm:$0xff] %v1784_v61 }
 0x212 PF: > { %1823 = sbr.rel (!%p2728_p13) target bundleno = 556 (0x22c), region = 105  ;;  %s3468_s18 = sld [smem:[#allocation6_spill]] (%p2728_p13)  ;;  %v1842_v62 = vld [vmem:[%s2969_s14] sm:$0xff] (%p2728_p13)  ;;  %v1844_v48 = vld [vmem:[%s2969_s14 + $0x8] sm:$0xff] (%p2728_p13)  ;;  %v1846_v10 = vld [vmem:[%s2969_s14 + $0x10] sm:$0xff] (%p2728_p13) }
 0x213   : > { %v1848_v63 = vld [vmem:[%s2969_s14 + $0x18] sm:$0xff] (%p2728_p13)  ;;  %v1850_v0 = vld [vmem:[%s2969_s14 + $0x20] sm:$0xff] (%p2728_p13)  ;;  %v1852_v49 = vld [vmem:[%s2969_s14 + $0x28] sm:$0xff] (%p2728_p13)  ;;  %s3469_s27 = sld [smem:[#allocation10_spill]] (%p2728_p13) }
 0x214   : > { %v1854_v20 = vld [vmem:[%s2969_s14 + $0x30] sm:$0xff] (%p2728_p13)  ;;  %v1856_v1 = vld [vmem:[%s2969_s14 + $0x38] sm:$0xff] (%p2728_p13)  ;;  %v1858_v2 = vld [vmem:[%s2969_s14 + $0x40] sm:$0xff] (%p2728_p13) }
 0x215   : > { %v1860_v3 = vld [vmem:[%s2969_s14 + $0x48] sm:$0xff] (%p2728_p13)  ;;  %v1862_v4 = vld [vmem:[%s2969_s14 + $0x50] sm:$0xff] (%p2728_p13)  ;;  %v1864_v21 = vld [vmem:[%s2969_s14 + $0x58] sm:$0xff] (%p2728_p13) }
 0x216   : > { %v1866_v50 = vld [vmem:[%s2969_s14 + $0x60] sm:$0xff] (%p2728_p13)  ;;  %v1868_v9 = vld [vmem:[%s2969_s14 + $0x68] sm:$0xff] (%p2728_p13)  ;;  %v1870_v11 = vld [vmem:[%s2969_s14 + $0x70] sm:$0xff] (%p2728_p13) }
 0x217   : > { %v1872_v51 = vld [vmem:[%s2969_s14 + $0x78] sm:$0xff]  ;;  %v1874_v22 = vld [vmem:[%s2969_s14 + $0x80] sm:$0xff]  ;;  %v1876_v13 = vld [vmem:[%s2969_s14 + $0x88] sm:$0xff] }
 0x218   : > { %s2177_s11 = sshll.u32 %s3468_s18, 6  ;;  %v1878_v14 = vld [vmem:[%s2969_s14 + $0x90] sm:$0xff]  ;;  %v1880_v16 = vld [vmem:[%s2969_s14 + $0x98] sm:$0xff]  ;;  %v1882_v23 = vld [vmem:[%s2969_s14 + $0xa0] sm:$0xff] }
 0x219   : > { %s1827_s20 = sadd.s32 %s2177_s11, %s2955_s29  ;;  %v1884_v52 = vld [vmem:[%s2969_s14 + $0xa8] sm:$0xff]  ;;  %v1886_v17 = vld [vmem:[%s2969_s14 + $0xb0] sm:$0xff]  ;;  %v1888_v18 = vld [vmem:[%s2969_s14 + $0xb8] sm:$0xff] }
 0x21a   : > { %s2172_s5 = sshll.u32 %s1827_s20, 3  ;;  %v1890_v25 = vld [vmem:[%s2969_s14 + $0xc0] sm:$0xff]  ;;  %v1892_v19 = vld [vmem:[%s2969_s14 + $0xc8] sm:$0xff]  ;;  %v1894_v53 = vld [vmem:[%s2969_s14 + $0xd0] sm:$0xff] }
 0x21b   : > { %s3350_s0 = scalar_lea.vmem %s3469_s27, %s2172_s5  ;;  %v1896_v24 = vld [vmem:[%s2969_s14 + $0xd8] sm:$0xff]  ;;  %v1898_v26 = vld [vmem:[%s2969_s14 + $0xe0] sm:$0xff]  ;;  %v1900_v32 = vld [vmem:[%s2969_s14 + $0xe8] sm:$0xff] }
 0x21c   : > { %1843 = vst [vmem:[%s3350_s0] sm:$0xff] %v1842_v62  ;;  %1845 = vst [vmem:[%s3350_s0 + $0x8] sm:$0xff] %v1844_v48  ;;  %v1902_v27 = vld [vmem:[%s2969_s14 + $0xf0] sm:$0xff]  ;;  %v1904_v28 = vld [vmem:[%s2969_s14 + $0xf8] sm:$0xff] }
 0x21d   : > { %1847 = vst [vmem:[%s3350_s0 + $0x20] sm:$0xff] %v1846_v10  ;;  %1849 = vst [vmem:[%s3350_s0 + $0x28] sm:$0xff] %v1848_v63 }
 0x21e   : > { %1851 = vst [vmem:[%s3350_s0 + $0x40] sm:$0xff] %v1850_v0  ;;  %1853 = vst [vmem:[%s3350_s0 + $0x48] sm:$0xff] %v1852_v49 }
 0x21f   : > { %1855 = vst [vmem:[%s3350_s0 + $0x60] sm:$0xff] %v1854_v20  ;;  %1857 = vst [vmem:[%s3350_s0 + $0x68] sm:$0xff] %v1856_v1 }
 0x220   : > { %1859 = vst [vmem:[%s3350_s0 + $0x80] sm:$0xff] %v1858_v2  ;;  %1861 = vst [vmem:[%s3350_s0 + $0x88] sm:$0xff] %v1860_v3 }
 0x221   : > { %1863 = vst [vmem:[%s3350_s0 + $0xa0] sm:$0xff] %v1862_v4  ;;  %1865 = vst [vmem:[%s3350_s0 + $0xa8] sm:$0xff] %v1864_v21 }
 0x222   : > { %1867 = vst [vmem:[%s3350_s0 + $0xc0] sm:$0xff] %v1866_v50  ;;  %1869 = vst [vmem:[%s3350_s0 + $0xc8] sm:$0xff] %v1868_v9 }
 0x223   : > { %1871 = vst [vmem:[%s3350_s0 + $0xe0] sm:$0xff] %v1870_v11  ;;  %1873 = vst [vmem:[%s3350_s0 + $0xe8] sm:$0xff] %v1872_v51 }
 0x224   : > { %1875 = vst [vmem:[%s3350_s0 + $0x100] sm:$0xff] %v1874_v22  ;;  %1877 = vst [vmem:[%s3350_s0 + $0x108] sm:$0xff] %v1876_v13 }
 0x225   : > { %1879 = vst [vmem:[%s3350_s0 + $0x120] sm:$0xff] %v1878_v14  ;;  %1881 = vst [vmem:[%s3350_s0 + $0x128] sm:$0xff] %v1880_v16 }
 0x226   : > { %1883 = vst [vmem:[%s3350_s0 + $0x140] sm:$0xff] %v1882_v23  ;;  %1885 = vst [vmem:[%s3350_s0 + $0x148] sm:$0xff] %v1884_v52 }
 0x227   : > { %1887 = vst [vmem:[%s3350_s0 + $0x160] sm:$0xff] %v1886_v17  ;;  %1889 = vst [vmem:[%s3350_s0 + $0x168] sm:$0xff] %v1888_v18 }
 0x228   : > { %1891 = vst [vmem:[%s3350_s0 + $0x180] sm:$0xff] %v1890_v25  ;;  %1893 = vst [vmem:[%s3350_s0 + $0x188] sm:$0xff] %v1892_v19 }
 0x229   : > { %1895 = vst [vmem:[%s3350_s0 + $0x1a0] sm:$0xff] %v1894_v53  ;;  %1897 = vst [vmem:[%s3350_s0 + $0x1a8] sm:$0xff] %v1896_v24 }
 0x22a   : > { %1899 = vst [vmem:[%s3350_s0 + $0x1c0] sm:$0xff] %v1898_v26  ;;  %1901 = vst [vmem:[%s3350_s0 + $0x1c8] sm:$0xff] %v1900_v32 }
 0x22b   : > { %1903 = vst [vmem:[%s3350_s0 + $0x1e0] sm:$0xff] %v1902_v27  ;;  %1905 = vst [vmem:[%s3350_s0 + $0x1e8] sm:$0xff] %v1904_v28 }
 0x22c PF: > { %s13_s24 = sadd.s32 1, %s2593_s24   ;;  %s3471_s30 = sld [smem:[#allocation7_spill]] }
 0x22d   : > { %p3408_p7 = scmp.ge.s32.totalorder %s13_s24, 10   ;;  %s3472_s4 = sld [smem:[#allocation8_spill]] }
 0x22e   : > { %s3473_s12 = smov %s2549_s13  ;;  %s3474_s13 = smov %s2726_s7 }
 0x22f   : > { %s3475_s14 = smov %s2557_s15  ;;  %s3476_s15 = smov %s2713_s9 }
 0x230   : > { %s3477_s16 = smov %s2565_s17  ;;  %s3478_s17 = smov %s2723_s3 }
 0x231   : > { %s3479_s18 = smov %s2581_s21  ;;  %s3480_s19 = smov %s2585_s22 }
 0x232   : > { %s3481_s20 = smov %s2589_s23  ;;  %s3482_s21 = smov %s3471_s30 }
 0x233   : > { %s3483_s22 = smov %s3472_s4  ;;  %s3484_s23 = smov %s3494_s28 }
 0x234   :  { %12 = sbr.rel (!%p3408_p7) target bundleno = 10 (0xa), region = 170 }

// kernel: encoder_forward.13
= control target key start
LH: loop header
LB: loop body
LE: loop exit
PB: predicated region body
PF: predicated region fallthrough
CT: control target
= control target key end

     0   :  { %s1291_s12 = smov 0   ;;  %s1567_s0 = inlined_call_operand.vmem [shape: bf16[192,512], index: 0, kind: input, shape index: {}]   ;;  %s1568_s1 = inlined_call_operand.vmem [shape: bf16[512,256], index: 1, kind: input, shape index: {}]   ;;  %s1569_s2 = inlined_call_operand.vmem [shape: bf16[64,64], index: 2, kind: input, shape index: {}]   ;;  %s1570_s3 = inlined_call_operand.vmem [shape: f32[192,256], index: 3, kind: output, shape index: {}]  }
   0x1 LB: > { %s1018_s13 = sadd.s32 4294967295, %s1268_s12   ;;  %p1022_p0 = scmp.ge.s32.totalorder %s1268_s12, 1  ;;  %s1268_s12 = sphi %s1291_s12, %s13_s12  }
   0x2   : > { %p139_p1 = scmp.lt.s32.totalorder %s1268_s12, 4 }
   0x4   : > { %p140_p2 = pnand %p1022_p0, %p139_p1 }
   0x5   : > { %s1023_s24 = sshll.u32 (!%p140_p2), %s1018_s13, 3 }
   0x6   : > { %143 = sbr.rel (%p140_p2) target bundleno = 530 (0x212), region = 32  ;;  %p166_p3 = scmp.lt.s32.totalorder (!%p140_p2), %s1023_s24, 23 }
   0xb   : > { %v1138_v0 = vld [vmem:[%s1568_s1 + $0x74] ss:$8 sps:$4 sm:$0xff]   ;;  %v1142_v2 = vld [vmem:[%s1568_s1 + $0x70] ss:$8 sps:$4 sm:$0xff]   ;;  %v1144_v4 = vld [vmem:[%s1568_s1 + $0x64] ss:$8 sps:$4 sm:$0xff]  }
   0xc   : > { %v1140_v1 = vld [vmem:[%s1568_s1 + $0x174] ss:$8 sps:$4 sm:$0xff]   ;;  %660 = vmatprep.subr.bf16.mxu0 %v1138_v0  ;;  %v1143_v3 = vld [vmem:[%s1568_s1 + $0x170] ss:$8 sps:$4 sm:$0xff]   ;;  %v1146_v5 = vld [vmem:[%s1568_s1 + $0x164] ss:$8 sps:$4 sm:$0xff]  }
   0xd   : > { %733 = vmatprep.subr.bf16.mxu1 %v1140_v1  ;;  %661 = vmatpush1.bf16.msra.mxu0 %v1142_v2  ;;  %v1148_v6 = vld [vmem:[%s1568_s1 + $0x60] ss:$8 sps:$4 sm:$0xff]   ;;  %v1150_v8 = vld [vmem:[%s1568_s1 + $0x54] ss:$8 sps:$4 sm:$0xff]   ;;  %v1154_v10 = vld [vmem:[%s1568_s1 + $0x50] ss:$8 sps:$4 sm:$0xff]  }
   0xe   : > { %734 = vmatpush1.bf16.msra.mxu1 %v1143_v3  ;;  %662 = vmatprep.subr.bf16.mxu0 %v1144_v4  ;;  %v1149_v7 = vld [vmem:[%s1568_s1 + $0x160] ss:$8 sps:$4 sm:$0xff]   ;;  %v1152_v9 = vld [vmem:[%s1568_s1 + $0x154] ss:$8 sps:$4 sm:$0xff]   ;;  %v1155_v11 = vld [vmem:[%s1568_s1 + $0x150] ss:$8 sps:$4 sm:$0xff]  }
   0xf   : > { %735 = vmatprep.subr.bf16.mxu1 %v1146_v5  ;;  %v1156_v12 = vld [vmem:[%s1568_s1 + $0x44] ss:$8 sps:$4 sm:$0xff]   ;;  %v1160_v14 = vld [vmem:[%s1568_s1 + $0x40] ss:$8 sps:$4 sm:$0xff]   ;;  %v1162_v16 = vld [vmem:[%s1568_s1 + $0x34] ss:$8 sps:$4 sm:$0xff]  }
  0x10   : > { %v1158_v13 = vld [vmem:[%s1568_s1 + $0x144] ss:$8 sps:$4 sm:$0xff]   ;;  %v1161_v15 = vld [vmem:[%s1568_s1 + $0x140] ss:$8 sps:$4 sm:$0xff]   ;;  %v1164_v17 = vld [vmem:[%s1568_s1 + $0x134] ss:$8 sps:$4 sm:$0xff]  }
  0x11   : > { %663 = vmatpush1.bf16.msra.mxu0 %v1148_v6  ;;  %v1166_v18 = vld [vmem:[%s1568_s1 + $0x30] ss:$8 sps:$4 sm:$0xff]   ;;  %v1168_v20 = vld [vmem:[%s1568_s1 + $0x24] ss:$8 sps:$4 sm:$0xff]   ;;  %v1172_v22 = vld [vmem:[%s1568_s1 + $0x20] ss:$8 sps:$4 sm:$0xff]  }
  0x12   : > { %736 = vmatpush1.bf16.msra.mxu1 %v1149_v7  ;;  %664 = vmatprep.subr.bf16.mxu0 %v1150_v8  ;;  %v1167_v19 = vld [vmem:[%s1568_s1 + $0x130] ss:$8 sps:$4 sm:$0xff]   ;;  %v1170_v21 = vld [vmem:[%s1568_s1 + $0x124] ss:$8 sps:$4 sm:$0xff]   ;;  %v1173_v23 = vld [vmem:[%s1568_s1 + $0x120] ss:$8 sps:$4 sm:$0xff]  }
  0x13   : > { %737 = vmatprep.subr.bf16.mxu1 %v1152_v9  ;;  %v1174_v24 = vld [vmem:[%s1568_s1 + $0x14] ss:$8 sps:$4 sm:$0xff]   ;;  %v1178_v26 = vld [vmem:[%s1568_s1 + $0x10] ss:$8 sps:$4 sm:$0xff]   ;;  %v1180_v28 = vld [vmem:[%s1568_s1 + $0x4] ss:$8 sps:$4 sm:$0xff]  }
  0x14   : > { %v1176_v25 = vld [vmem:[%s1568_s1 + $0x114] ss:$8 sps:$4 sm:$0xff]   ;;  %v1179_v27 = vld [vmem:[%s1568_s1 + $0x110] ss:$8 sps:$4 sm:$0xff]   ;;  %v1182_v29 = vld [vmem:[%s1568_s1 + $0x104] ss:$8 sps:$4 sm:$0xff]  }
  0x15   : > { %665 = vmatpush1.bf16.msra.mxu0 %v1154_v10  ;;  %v1184_v30 = vld [vmem:[%s1568_s1] ss:$8 sps:$4 sm:$0xff]   ;;  %v1186_v32 = vld [vmem:[%s1568_s1 + $0xf4] ss:$8 sps:$4 sm:$0xff]   ;;  %v1190_v34 = vld [vmem:[%s1568_s1 + $0xf0] ss:$8 sps:$4 sm:$0xff]  }
  0x16   : > { %738 = vmatpush1.bf16.msra.mxu1 %v1155_v11  ;;  %666 = vmatprep.subr.bf16.mxu0 %v1156_v12  ;;  %v1185_v31 = vld [vmem:[%s1568_s1 + $0x100] ss:$8 sps:$4 sm:$0xff]   ;;  %v1188_v33 = vld [vmem:[%s1568_s1 + $0x1f4] ss:$8 sps:$4 sm:$0xff]   ;;  %v1191_v35 = vld [vmem:[%s1568_s1 + $0x1f0] ss:$8 sps:$4 sm:$0xff]  }
  0x17   : > { %739 = vmatprep.subr.bf16.mxu1 %v1158_v13  ;;  %v1192_v36 = vld [vmem:[%s1568_s1 + $0xe4] ss:$8 sps:$4 sm:$0xff]   ;;  %s1572_s24 = smov (!%p166_p3, %s1023_s24), 23  ;;  %v1196_v38 = vld [vmem:[%s1568_s1 + $0xe0] ss:$8 sps:$4 sm:$0xff]   ;;  %vm842_vm0 = vcmask 523264  }
  0x18   : > { %v1194_v37 = vld [vmem:[%s1568_s1 + $0x1e4] ss:$8 sps:$4 sm:$0xff]   ;;  %v1197_v39 = vld [vmem:[%s1568_s1 + $0x1e0] ss:$8 sps:$4 sm:$0xff]   ;;  %v1198_v40 = vld [vmem:[%s1568_s1 + $0xd4] ss:$8 sps:$4 sm:$0xff]  }
  0x19   : > { %667 = vmatpush1.bf16.msra.mxu0 %v1160_v14  ;;  %v1200_v41 = vld [vmem:[%s1568_s1 + $0x1d4] ss:$8 sps:$4 sm:$0xff]   ;;  %s1119_s23 = sshll.u32 %s1572_s24, 4  ;;  %v1202_v42 = vld [vmem:[%s1568_s1 + $0xd0] ss:$8 sps:$4 sm:$0xff]  }
  0x1a   : > { %740 = vmatpush1.bf16.msra.mxu1 %v1161_v15  ;;  %668 = vmatprep.subr.bf16.mxu0 %v1162_v16  ;;  %v1203_v43 = vld [vmem:[%s1568_s1 + $0x1d0] ss:$8 sps:$4 sm:$0xff]   ;;  %v1204_v44 = vld [vmem:[%s1568_s1 + $0xc4] ss:$8 sps:$4 sm:$0xff]   ;;  %s1444_s13 = scalar_lea.vmem %s1567_s0, %s1119_s23  ;;  %v1208_v46 = vld [vmem:[%s1568_s1 + $0xc0] ss:$8 sps:$4 sm:$0xff]   ;;  %s1546_s7 = scalar_lea.vmem %s1570_s3, %s1119_s23 }
  0x1b   : > { %741 = vmatprep.subr.bf16.mxu1 %v1164_v17  ;;  %v1206_v45 = vld [vmem:[%s1568_s1 + $0x1c4] ss:$8 sps:$4 sm:$0xff]   ;;  %v1209_v47 = vld [vmem:[%s1568_s1 + $0x1c0] ss:$8 sps:$4 sm:$0xff]   ;;  %v1210_v48 = vld [vmem:[%s1568_s1 + $0xb4] ss:$8 sps:$4 sm:$0xff]  }
  0x1c   : > { %v1236_v49 = vld [vmem:[%s1444_s13 + $0x4] ss:$16 sps:$4 sm:$0xff]   ;;  %v1239_v51 = vld [vmem:[%s1444_s13 + $0xc] ss:$16 sps:$4 sm:$0xff]   ;;  %v1214_v52 = vld [vmem:[%s1568_s1 + $0xb0] ss:$8 sps:$4 sm:$0xff]  }
  0x1d   : > { %669 = vmatpush1.bf16.msra.mxu0 %v1166_v18  ;;  %v1212_v50 = vld [vmem:[%s1568_s1 + $0x1b4] ss:$8 sps:$4 sm:$0xff]   ;;  %692 = vmatprep.mubr.bf16.mxu0 %v1236_v49  ;;  %v1215_v53 = vld [vmem:[%s1568_s1 + $0x1b0] ss:$8 sps:$4 sm:$0xff]   ;;  %v1216_v54 = vld [vmem:[%s1568_s1 + $0xa4] ss:$8 sps:$4 sm:$0xff]  }
  0x1e   : > { %742 = vmatpush1.bf16.msra.mxu1 %v1167_v19  ;;  %670 = vmatprep.subr.bf16.mxu0 %v1168_v20  ;;  %v1218_v55 = vld [vmem:[%s1568_s1 + $0x1a4] ss:$8 sps:$4 sm:$0xff]   ;;  %v1220_v56 = vld [vmem:[%s1568_s1 + $0xa0] ss:$8 sps:$4 sm:$0xff]   ;;  %v1222_v58 = vld [vmem:[%s1568_s1 + $0x94] ss:$8 sps:$4 sm:$0xff]  }
  0x1f   : > { %743 = vmatprep.subr.bf16.mxu1 %v1170_v21  ;;  %765 = vmatprep.mubr.bf16.mxu1 %v1239_v51  ;;  %v1221_v57 = vld [vmem:[%s1568_s1 + $0x1a0] ss:$8 sps:$4 sm:$0xff]   ;;  %v1224_v59 = vld [vmem:[%s1568_s1 + $0x194] ss:$8 sps:$4 sm:$0xff]   ;;  %v1226_v60 = vld [vmem:[%s1568_s1 + $0x90] ss:$8 sps:$4 sm:$0xff]  }
  0x20   : > { %v1227_v61 = vld [vmem:[%s1568_s1 + $0x190] ss:$8 sps:$4 sm:$0xff]   ;;  %v1228_v62 = vld [vmem:[%s1568_s1 + $0x84] ss:$8 sps:$4 sm:$0xff]   ;;  %v1232_v0 = vld [vmem:[%s1568_s1 + $0x80] ss:$8 sps:$4 sm:$0xff]  }
  0x21   : > { %671 = vmatpush1.bf16.msra.mxu0 %v1172_v22  ;;  %v1230_v63 = vld [vmem:[%s1568_s1 + $0x184] ss:$8 sps:$4 sm:$0xff]   ;;  %v1233_v1 = vld [vmem:[%s1568_s1 + $0x180] ss:$8 sps:$4 sm:$0xff]   ;;  %v1270_v16 = vmov 0  }
  0x22   : > { %744 = vmatpush1.bf16.msra.mxu1 %v1173_v23  ;;  %672 = vmatprep.subr.bf16.mxu0 %v1174_v24  ;;  %v1234_v2 = vld [vmem:[%s1444_s13] ss:$16 sps:$4 sm:$0xff]   ;;  %v1237_v3 = vld [vmem:[%s1444_s13 + $0x8] ss:$16 sps:$4 sm:$0xff]   ;;  %v1240_v4 = vld [vmem:[%s1444_s13 + $0x24] ss:$16 sps:$4 sm:$0xff]  }
  0x23   : > { %745 = vmatprep.subr.bf16.mxu1 %v1176_v25  ;;  %v1242_v5 = vld [vmem:[%s1444_s13 + $0x2c] ss:$16 sps:$4 sm:$0xff]   ;;  %v1244_v6 = vld [vmem:[%s1444_s13 + $0x20] ss:$16 sps:$4 sm:$0xff]   ;;  %v1245_v7 = vld [vmem:[%s1444_s13 + $0x28] ss:$16 sps:$4 sm:$0xff]  }
  0x24   : > { %v1246_v8 = vld [vmem:[%s1444_s13 + $0x44] ss:$16 sps:$4 sm:$0xff]   ;;  %v1248_v9 = vld [vmem:[%s1444_s13 + $0x4c] ss:$16 sps:$4 sm:$0xff]   ;;  %v1250_v10 = vld [vmem:[%s1444_s13 + $0x40] ss:$16 sps:$4 sm:$0xff]  }
  0x25   : > { %673 = vmatpush1.bf16.msra.mxu0 %v1178_v26  ;;  %v1251_v11 = vld [vmem:[%s1444_s13 + $0x48] ss:$16 sps:$4 sm:$0xff]   ;;  %v1252_v12 = vld [vmem:[%s1444_s13 + $0x64] ss:$16 sps:$4 sm:$0xff]   ;;  %v1254_v13 = vld [vmem:[%s1444_s13 + $0x6c] ss:$16 sps:$4 sm:$0xff]  }
  0x26   : > { %746 = vmatpush1.bf16.msra.mxu1 %v1179_v27  ;;  %674 = vmatprep.subr.bf16.mxu0 %v1180_v28  ;;  %v1256_v14 = vld [vmem:[%s1444_s13 + $0x60] ss:$16 sps:$4 sm:$0xff]   ;;  %v1257_v15 = vld [vmem:[%s1444_s13 + $0x68] ss:$16 sps:$4 sm:$0xff]  }
  0x27   : > { %747 = vmatprep.subr.bf16.mxu1 %v1182_v29 }
  0x29   : > { %675 = vmatpush1.bf16.msra.mxu0 %v1184_v30 }
  0x2a   : > { %748 = vmatpush1.bf16.msra.mxu1 %v1185_v31  ;;  %676 = vmatprep.subr.bf16.mxu0 %v1186_v32 }
  0x2b   : > { %749 = vmatprep.subr.bf16.mxu1 %v1188_v33 }
  0x2d   : > { %677 = vmatpush2.bf16.msra.mxu0 %v1190_v34 }
  0x2e   : > { %750 = vmatpush2.bf16.msra.mxu1 %v1191_v35  ;;  %678 = vmatprep.subr.bf16.mxu0 %v1192_v36 }
  0x2f   : > { %751 = vmatprep.subr.bf16.mxu1 %v1194_v37 }
  0x31   : > { %679 = vmatpush2.bf16.msra.mxu0 %v1196_v38 }
  0x32   : > { %752 = vmatpush2.bf16.msra.mxu1 %v1197_v39  ;;  %680 = vmatprep.subr.bf16.mxu0 %v1198_v40 }
  0x33   : > { %753 = vmatprep.subr.bf16.mxu1 %v1200_v41 }
  0x35   : > { %681 = vmatpush2.bf16.msra.mxu0 %v1202_v42 }
  0x36   : > { %754 = vmatpush2.bf16.msra.mxu1 %v1203_v43  ;;  %682 = vmatprep.subr.bf16.mxu0 %v1204_v44 }
  0x37   : > { %755 = vmatprep.subr.bf16.mxu1 %v1206_v45 }
  0x39   : > { %683 = vmatpush2.bf16.msra.mxu0 %v1208_v46 }
  0x3a   : > { %756 = vmatpush2.bf16.msra.mxu1 %v1209_v47  ;;  %684 = vmatprep.subr.bf16.mxu0 %v1210_v48 }
  0x3b   : > { %757 = vmatprep.subr.bf16.mxu1 %v1212_v50 }
  0x3d   : > { %685 = vmatpush2.bf16.msra.mxu0 %v1214_v52 }
  0x3e   : > { %758 = vmatpush2.bf16.msra.mxu1 %v1215_v53  ;;  %686 = vmatprep.subr.bf16.mxu0 %v1216_v54 }
  0x3f   : > { %759 = vmatprep.subr.bf16.mxu1 %v1218_v55 }
  0x41   : > { %687 = vmatpush2.bf16.msra.mxu0 %v1220_v56 }
  0x42   : > { %760 = vmatpush2.bf16.msra.mxu1 %v1221_v57  ;;  %688 = vmatprep.subr.bf16.mxu0 %v1222_v58 }
  0x43   : > { %761 = vmatprep.subr.bf16.mxu1 %v1224_v59 }
  0x45   : > { %689 = vmatpush2.bf16.msra.mxu0 %v1226_v60 }
  0x46   : > { %762 = vmatpush2.bf16.msra.mxu1 %v1227_v61  ;;  %690 = vmatprep.subr.bf16.mxu0 %v1228_v62 }
  0x47   : > { %763 = vmatprep.subr.bf16.mxu1 %v1230_v63 }
  0x49   : > { %691 = vmatpush2.bf16.msra.mxu0 %v1232_v0 }
  0x4a   : > { %764 = vmatpush2.bf16.msra.mxu1 %v1233_v1 }
  0x4c   : > { %693 = vmatmul.mubr.bf16.vlgmr.msra.gmra.mxu0 %v1234_v2 }
  0x4d   : > { %766 = vmatmul.mubr.bf16.vlgmr.msra.gmra.mxu1 %v1237_v3  ;;  %702 = vmatprep.mubr.bf16.mxu0 %v1240_v4 }
  0x4e   : > { %775 = vmatprep.mubr.bf16.mxu1 %v1242_v5 }
  0x54   : > { %703 = vmatmul.mubr.bf16.gmra.mxu0 %v1244_v6 }
  0x55   : > { %776 = vmatmul.mubr.bf16.gmra.mxu1 %v1245_v7  ;;  %712 = vmatprep.mubr.bf16.mxu0 %v1246_v8 }
  0x56   : > { %785 = vmatprep.mubr.bf16.mxu1 %v1248_v9  ;;  %v1258_v9 = vld [vmem:[%s1569_s2] sm:$0xff]  }
  0x5c   : > { %713 = vmatmul.mubr.bf16.gmra.mxu0 %v1250_v10  ;;  %v1259_v10 = vld [vmem:[%s1569_s2 + $0x10] sm:$0xff]  }
  0x5d   : > { %786 = vmatmul.mubr.bf16.gmra.mxu1 %v1251_v11  ;;  %722 = vmatprep.mubr.bf16.mxu0 %v1252_v12  ;;  %v1260_v11 = vld [vmem:[%s1569_s2 + $0x8] sm:$0xff]   ;;  %v1261_v12 = vld [vmem:[%s1569_s2 + $0x18] sm:$0xff]  }
  0x5e   : > { %795 = vmatprep.mubr.bf16.mxu1 %v1254_v13 }
  0x64   : > { %723 = vmatmul.mubr.bf16.gmra.mxu0 %v1256_v14 }
  0x65   : > { %796 = vmatmul.mubr.bf16.gmra.mxu1 %v1257_v15  ;;  %887 = vmatprep.mubr.bf16.mxu0 %v1270_v16 }
  0x66   : > { %907 = vmatprep.mubr.bf16.mxu1 %v1270_v16 }
 0x10c   : > { %v1521_v17 = vpop.f32.mrf.mxu0 }
 0x10d   : > { %v1523_v18 = vpop.f32.mrf.mxu1 }
 0x10e   : > { %v696_v19 = vpop.f32.mrf.mxu0  ;;  %v768_v7 = vadd.f32 %v1523_v18, %v1521_v17 }
 0x10f   : > { %v769_v20 = vpop.f32.mrf.mxu1 }
 0x110   : > { %v698_v21 = vpop.f32.mrf.mxu0  ;;  %v770_v3 = vadd.f32 %v769_v20, %v696_v19 }
 0x111   : > { %v771_v22 = vpop.f32.mrf.mxu1 }
 0x112   : > { %v700_v23 = vpop.f32.mrf.mxu0  ;;  %v772_v4 = vadd.f32 %v771_v22, %v698_v21 }
 0x113   : > { %v773_v24 = vpop.f32.mrf.mxu1 }
 0x114   : > { %v704_v25 = vpop.f32.mrf.mxu0  ;;  %v774_v0 = vadd.f32 %v773_v24, %v700_v23  ;;  %v814_v8 = vpack.c.bf16 %v772_v4, %v768_v7 }
 0x115   : > { %v777_v26 = vpop.f32.mrf.mxu1 }
 0x116   : > { %v706_v27 = vpop.f32.mrf.mxu0  ;;  %v778_v2 = vadd.f32 %v777_v26, %v704_v25  ;;  %v815_v6 = vpack.c.bf16 %v774_v0, %v770_v3 }
 0x117   : > { %v779_v28 = vpop.f32.mrf.mxu1 }
 0x118   : > { %v708_v29 = vpop.f32.mrf.mxu0  ;;  %v780_v61 = vadd.f32 %v779_v28, %v706_v27 }
 0x119   : > { %v781_v30 = vpop.f32.mrf.mxu1 }
 0x11a   : > { %v710_v31 = vpop.f32.mrf.mxu0  ;;  %v782_v62 = vadd.f32 %v781_v30, %v708_v29 }
 0x11b   : > { %v783_v32 = vpop.f32.mrf.mxu1 }
 0x11c   : > { %v714_v33 = vpop.f32.mrf.mxu0  ;;  %v784_v58 = vadd.f32 %v783_v32, %v710_v31  ;;  %v816_v5 = vpack.c.bf16 %v782_v62, %v778_v2 }
 0x11d   : > { %v787_v34 = vpop.f32.mrf.mxu1 }
 0x11e   : > { %v716_v35 = vpop.f32.mrf.mxu0  ;;  %v788_v60 = vadd.f32 %v787_v34, %v714_v33  ;;  %v817_v1 = vpack.c.bf16 %v784_v58, %v780_v61 }
 0x11f   : > { %v789_v36 = vpop.f32.mrf.mxu1 }
 0x120   : > { %v718_v37 = vpop.f32.mrf.mxu0  ;;  %v790_v54 = vadd.f32 %v789_v36, %v716_v35 }
 0x121   : > { %v791_v38 = vpop.f32.mrf.mxu1 }
 0x122   : > { %v720_v39 = vpop.f32.mrf.mxu0  ;;  %v792_v56 = vadd.f32 %v791_v38, %v718_v37 }
 0x123   : > { %v793_v40 = vpop.f32.mrf.mxu1 }
 0x124   : > { %v724_v41 = vpop.f32.mrf.mxu0  ;;  %v794_v50 = vadd.f32 %v793_v40, %v720_v39  ;;  %v818_v63 = vpack.c.bf16 %v792_v56, %v788_v60 }
 0x125   : > { %v797_v42 = vpop.f32.mrf.mxu1 }
 0x126   : > { %v726_v43 = vpop.f32.mrf.mxu0  ;;  %v798_v53 = vadd.f32 %v797_v42, %v724_v41  ;;  %v819_v59 = vpack.c.bf16 %v794_v50, %v790_v54 }
 0x127   : > { %v799_v44 = vpop.f32.mrf.mxu1 }
 0x128   : > { %v728_v45 = vpop.f32.mrf.mxu0  ;;  %v800_v51 = vadd.f32 %v799_v44, %v726_v43 }
 0x129   : > { %v801_v46 = vpop.f32.mrf.mxu1 }
 0x12a   : > { %v802_v47 = vadd.f32 %v801_v46, %v728_v45  ;;  %v730_v48 = vpop.f32.mrf.mxu0 }
 0x12b   : > { %v803_v49 = vpop.f32.mrf.mxu1 }
 0x12c   : > { %v804_v52 = vadd.f32 %v803_v49, %v730_v48  ;;  %v820_v57 = vpack.c.bf16 %v802_v47, %v798_v53 }
 0x12e   : > { %v821_v55 = vpack.c.bf16 %v804_v52, %v800_v51 }
 0x130   : > { %863 = vmatprep.subr.bf16.mxu0 %v821_v55  ;;  %1121 = vmatprep.subr.bf16.mxu1 %v821_v55 }
 0x131   : > { %864 = vmatpush1.bf16.msra.mxu0 %v820_v57  ;;  %1125 = vmatpush1.bf16.msra.mxu1 %v820_v57 }
 0x132   : > { %865 = vmatprep.subr.bf16.mxu0 %v819_v59  ;;  %1122 = vmatprep.subr.bf16.mxu1 %v819_v59 }
 0x135   : > { %866 = vmatpush1.bf16.msra.mxu0 %v818_v63  ;;  %1126 = vmatpush1.bf16.msra.mxu1 %v818_v63 }
 0x136   : > { %867 = vmatprep.subr.bf16.mxu0 %v817_v1  ;;  %1123 = vmatprep.subr.bf16.mxu1 %v817_v1 }
 0x139   : > { %868 = vmatpush1.bf16.msra.mxu0 %v816_v5  ;;  %1127 = vmatpush1.bf16.msra.mxu1 %v816_v5 }
 0x13a   : > { %869 = vmatprep.subr.bf16.mxu0 %v815_v6  ;;  %1124 = vmatprep.subr.bf16.mxu1 %v815_v6 }
 0x13d   : > { %870 = vmatpush1.bf16.msra.mxu0 %v814_v8  ;;  %1128 = vmatpush1.bf16.msra.mxu1 %v814_v8 }
 0x140   : > { %1113 = vmatmul.mubr.msk.bf16.vlgmr.msra.gmra.mxu0 %vm842_vm0, %v1258_v9  ;;  %1115 = vmatmul.mubr.msk.bf16.vlgmr.msra.gmra.mxu1 %vm842_vm0, %v1259_v10 }
 0x141   : > { %897 = vmatprep.mubr.bf16.mxu0 %v1270_v16  ;;  %917 = vmatprep.mubr.bf16.mxu1 %v1270_v16 }
 0x148   : > { %1114 = vmatmul.mubr.msk.bf16.gmra.mxu0 %vm842_vm0, %v1260_v11  ;;  %1116 = vmatmul.mubr.msk.bf16.gmra.mxu1 %vm842_vm0, %v1261_v12 }
 0x200   : > { %v889_v13 = vpop.f32.mrf.mxu0  ;;  %v909_v14 = vpop.f32.mrf.mxu1 }
 0x201   : > { %v928_v15 = vmax.f32 %v889_v13, 0.0  ;;  %v936_v16 = vmax.f32 %v909_v14, 0.0 }
 0x202   : > { %v891_v17 = vpop.f32.mrf.mxu0  ;;  %v911_v18 = vpop.f32.mrf.mxu1 }
 0x203   : > { %944 = vst [vmem:[%s1546_s7] sm:$0xff] %v928_v15  ;;  %952 = vst [vmem:[%s1546_s7 + $0x40] sm:$0xff] %v936_v16  ;;  %v929_v19 = vmax.f32 %v891_v17, 0.0  ;;  %v937_v20 = vmax.f32 %v911_v18, 0.0 }
 0x204   : > { %v893_v21 = vpop.f32.mrf.mxu0  ;;  %v913_v22 = vpop.f32.mrf.mxu1 }
 0x205   : > { %945 = vst [vmem:[%s1546_s7 + $0x8] sm:$0xff] %v929_v19  ;;  %953 = vst [vmem:[%s1546_s7 + $0x48] sm:$0xff] %v937_v20  ;;  %v930_v23 = vmax.f32 %v893_v21, 0.0  ;;  %v938_v24 = vmax.f32 %v913_v22, 0.0 }
 0x206   : > { %v895_v25 = vpop.f32.mrf.mxu0  ;;  %v915_v26 = vpop.f32.mrf.mxu1 }
 0x207   : > { %946 = vst [vmem:[%s1546_s7 + $0x10] sm:$0xff] %v930_v23  ;;  %954 = vst [vmem:[%s1546_s7 + $0x50] sm:$0xff] %v938_v24  ;;  %v931_v27 = vmax.f32 %v895_v25, 0.0  ;;  %v939_v28 = vmax.f32 %v915_v26, 0.0 }
 0x208   : > { %v899_v29 = vpop.f32.mrf.mxu0  ;;  %v919_v30 = vpop.f32.mrf.mxu1 }
 0x209   : > { %947 = vst [vmem:[%s1546_s7 + $0x18] sm:$0xff] %v931_v27  ;;  %955 = vst [vmem:[%s1546_s7 + $0x58] sm:$0xff] %v939_v28  ;;  %v932_v31 = vmax.f32 %v899_v29, 0.0  ;;  %v940_v32 = vmax.f32 %v919_v30, 0.0 }
 0x20a   : > { %v901_v33 = vpop.f32.mrf.mxu0  ;;  %v921_v34 = vpop.f32.mrf.mxu1 }
 0x20b   : > { %948 = vst [vmem:[%s1546_s7 + $0x20] sm:$0xff] %v932_v31  ;;  %956 = vst [vmem:[%s1546_s7 + $0x60] sm:$0xff] %v940_v32  ;;  %v933_v35 = vmax.f32 %v901_v33, 0.0  ;;  %v941_v36 = vmax.f32 %v921_v34, 0.0 }
 0x20c   : > { %v903_v37 = vpop.f32.mrf.mxu0  ;;  %v923_v38 = vpop.f32.mrf.mxu1 }
 0x20d   : > { %949 = vst [vmem:[%s1546_s7 + $0x28] sm:$0xff] %v933_v35  ;;  %957 = vst [vmem:[%s1546_s7 + $0x68] sm:$0xff] %v941_v36  ;;  %v934_v39 = vmax.f32 %v903_v37, 0.0  ;;  %v942_v40 = vmax.f32 %v923_v38, 0.0 }
 0x20e   : > { %v905_v41 = vpop.f32.mrf.mxu0  ;;  %v925_v42 = vpop.f32.mrf.mxu1 }
 0x20f   : > { %950 = vst [vmem:[%s1546_s7 + $0x30] sm:$0xff] %v934_v39  ;;  %958 = vst [vmem:[%s1546_s7 + $0x70] sm:$0xff] %v942_v40  ;;  %v935_v43 = vmax.f32 %v905_v41, 0.0  ;;  %v943_v44 = vmax.f32 %v925_v42, 0.0 }
 0x211   : > { %951 = vst [vmem:[%s1546_s7 + $0x38] sm:$0xff] %v935_v43  ;;  %959 = vst [vmem:[%s1546_s7 + $0x78] sm:$0xff] %v943_v44 }
 0x212 PF: > { %s13_s12 = sadd.s32 1, %s1268_s12  }
 0x213   : > { %p10_p4 = scmp.ge.s32.totalorder %s13_s12, 5  }
 0x215   :  { %12 = sbr.rel (!%p10_p4) target bundleno = 1 (0x1), region = 62 }

// kernel: encoder_forward.14
= control target key start
LH: loop header
LB: loop body
LE: loop exit
PB: predicated region body
PF: predicated region fallthrough
CT: control target
= control target key end

     0   :  { %s778_s12 = smov 0   ;;  %s876_s0 = inlined_call_operand.vmem [shape: bf16[128,256], index: 0, kind: input, shape index: {}]   ;;  %s877_s1 = inlined_call_operand.vmem [shape: bf16[256,128], index: 1, kind: input, shape index: {}]   ;;  %s878_s2 = inlined_call_operand.vmem [shape: bf16[64,64], index: 2, kind: input, shape index: {}]   ;;  %s879_s3 = inlined_call_operand.vmem [shape: f32[128,128], index: 3, kind: output, shape index: {}]  }
   0x1 LB: > { %s601_s13 = sadd.s32 4294967295, %s756_s12   ;;  %p605_p0 = scmp.ge.s32.totalorder %s756_s12, 1  ;;  %s756_s12 = sphi %s778_s12, %s13_s12  }
   0x2   : > { %p139_p1 = scmp.lt.s32.totalorder %s756_s12, 3 }
   0x4   : > { %p140_p2 = pnand %p605_p0, %p139_p1 }
   0x5   : > { %s606_s16 = sshll.u32 (!%p140_p2), %s601_s13, 3 }
   0x6   : > { %143 = sbr.rel (%p140_p2) target bundleno = 497 (0x1f1), region = 32  ;;  %p165_p3 = scmp.lt.s32.totalorder (!%p140_p2), %s606_s16, 15 }
   0xb   : > { %v718_v0 = vld [vmem:[%s877_s1 + $0x78] sm:$0xff]   ;;  %v720_v2 = vld [vmem:[%s877_s1 + $0x70] sm:$0xff]   ;;  %v722_v4 = vld [vmem:[%s877_s1 + $0x68] sm:$0xff]   ;;  %s881_s16 = smov (!%p165_p3, %s606_s16), 15  ;;  %vm451_vm0 = vcmask 523264  }
   0xc   : > { %v719_v1 = vld [vmem:[%s877_s1 + $0x38] sm:$0xff]   ;;  %646 = vmatprep.subr.bf16.mxu0 %v718_v0  ;;  %v721_v3 = vld [vmem:[%s877_s1 + $0x30] sm:$0xff]   ;;  %v723_v5 = vld [vmem:[%s877_s1 + $0x28] sm:$0xff]   ;;  %s645_s4 = sshll.u32 %s881_s16, 3 }
   0xd   : > { %647 = vmatpush3.bf16.msra.mxu0 %v719_v1  ;;  %v724_v6 = vld [vmem:[%s877_s1 + $0x60] sm:$0xff]   ;;  %v726_v8 = vld [vmem:[%s877_s1 + $0x58] sm:$0xff]   ;;  %s821_s9 = scalar_lea.vmem %s876_s0, %s645_s4  ;;  %v728_v10 = vld [vmem:[%s877_s1 + $0x50] sm:$0xff]   ;;  %s175_s10 = scalar_lea.vmem %s879_s3, %s645_s4 }
   0xe   : > { %648 = vmatprep.subr.bf16.mxu0 %v720_v2  ;;  %v725_v7 = vld [vmem:[%s877_s1 + $0x20] sm:$0xff]   ;;  %v727_v9 = vld [vmem:[%s877_s1 + $0x18] sm:$0xff]   ;;  %v729_v12 = vld [vmem:[%s877_s1 + $0x10] sm:$0xff]  }
   0xf   : > { %v736_v11 = vld [vmem:[%s821_s9 + $0x4] ss:$8 sps:$4 sm:$0xff]   ;;  %v734_v17 = vld [vmem:[%s821_s9] ss:$8 sps:$4 sm:$0xff]   ;;  %v737_v18 = vld [vmem:[%s821_s9 + $0x14] ss:$8 sps:$4 sm:$0xff]  }
  0x10   : > { %386 = vmatprep.mubr.bf16.mxu0 %v736_v11  ;;  %v730_v13 = vld [vmem:[%s877_s1 + $0x48] sm:$0xff]   ;;  %v732_v15 = vld [vmem:[%s877_s1 + $0x40] sm:$0xff]   ;;  %v739_v19 = vld [vmem:[%s821_s9 + $0x10] ss:$8 sps:$4 sm:$0xff]  }
  0x11   : > { %649 = vmatpush3.bf16.msra.mxu0 %v721_v3  ;;  %v731_v14 = vld [vmem:[%s877_s1 + $0x8] sm:$0xff]   ;;  %v733_v16 = vld [vmem:[%s877_s1] sm:$0xff]   ;;  %v743_v22 = vld [vmem:[%s821_s9 + $0x34] ss:$8 sps:$4 sm:$0xff]  }
  0x12   : > { %650 = vmatprep.subr.bf16.mxu0 %v722_v4  ;;  %v740_v20 = vld [vmem:[%s821_s9 + $0x24] ss:$8 sps:$4 sm:$0xff]   ;;  %v742_v21 = vld [vmem:[%s821_s9 + $0x20] ss:$8 sps:$4 sm:$0xff]   ;;  %v745_v23 = vld [vmem:[%s821_s9 + $0x30] ss:$8 sps:$4 sm:$0xff]  }
  0x13   : > { %v746_v24 = vld [vmem:[%s878_s2] sm:$0xff]   ;;  %v747_v53 = vld [vmem:[%s878_s2 + $0x8] sm:$0xff]   ;;  %v748_v54 = vld [vmem:[%s878_s2 + $0x10] sm:$0xff]  }
  0x14   : > { %702 = vmatprep.mubr.msk.bf16.mxu1 %vm451_vm0, %v746_v24  ;;  %v749_v55 = vld [vmem:[%s878_s2 + $0x18] sm:$0xff]  }
  0x15   : > { %651 = vmatpush3.bf16.msra.mxu0 %v723_v5 }
  0x16   : > { %652 = vmatprep.subr.bf16.mxu0 %v724_v6 }
  0x19   : > { %653 = vmatpush3.bf16.msra.mxu0 %v725_v7 }
  0x1a   : > { %654 = vmatprep.subr.bf16.mxu0 %v726_v8 }
  0x1d   : > { %655 = vmatpush3.bf16.msra.mxu0 %v727_v9 }
  0x1e   : > { %656 = vmatprep.subr.bf16.mxu0 %v728_v10 }
  0x21   : > { %657 = vmatpush3.bf16.msra.mxu0 %v729_v12 }
  0x22   : > { %658 = vmatprep.subr.bf16.mxu0 %v730_v13 }
  0x25   : > { %659 = vmatpush3.bf16.msra.mxu0 %v731_v14 }
  0x26   : > { %660 = vmatprep.subr.bf16.mxu0 %v732_v15 }
  0x29   : > { %661 = vmatpush3.bf16.msra.mxu0 %v733_v16 }
  0x2c   : > { %387 = vmatmul.mubr.bf16.vlgmr.msra.gmra.mxu0 %v734_v17 }
  0x2d   : > { %394 = vmatprep.mubr.bf16.mxu0 %v737_v18 }
  0x34   : > { %395 = vmatmul.mubr.bf16.gmra.mxu0 %v739_v19 }
  0x35   : > { %402 = vmatprep.mubr.bf16.mxu0 %v740_v20 }
  0x3c   : > { %403 = vmatmul.mubr.bf16.gmra.mxu0 %v742_v21 }
  0x3d   : > { %410 = vmatprep.mubr.bf16.mxu0 %v743_v22 }
  0x44   : > { %411 = vmatmul.mubr.bf16.gmra.mxu0 %v745_v23 }
  0xec   : > { %v662_v25 = vpop.f32.mrf.mxu0 }
  0xee   : > { %v663_v26 = vpop.f32.mrf.mxu0 }
  0xef   : > { %v664_v51 = vadd.f32 %v663_v26, %v662_v25 }
  0xf0   : > { %v665_v27 = vpop.f32.mrf.mxu0 }
  0xf2   : > { %v666_v28 = vpop.f32.mrf.mxu0 }
  0xf3   : > { %v667_v49 = vadd.f32 %v666_v28, %v665_v27 }
  0xf4   : > { %v668_v29 = vpop.f32.mrf.mxu0 }
  0xf5   : > { %v427_v52 = vpack.c.bf16 %v667_v49, %v664_v51 }
  0xf6   : > { %v669_v30 = vpop.f32.mrf.mxu0 }
  0xf7   : > { %v670_v48 = vadd.f32 %v669_v30, %v668_v29 }
  0xf8   : > { %v671_v31 = vpop.f32.mrf.mxu0 }
  0xfa   : > { %v672_v32 = vpop.f32.mrf.mxu0 }
  0xfb   : > { %v673_v46 = vadd.f32 %v672_v32, %v671_v31 }
  0xfc   : > { %v674_v33 = vpop.f32.mrf.mxu0 }
  0xfd   : > { %v428_v50 = vpack.c.bf16 %v673_v46, %v670_v48 }
  0xfe   : > { %v675_v34 = vpop.f32.mrf.mxu0 }
  0xff   : > { %v676_v44 = vadd.f32 %v675_v34, %v674_v33 }
 0x100   : > { %v677_v35 = vpop.f32.mrf.mxu0 }
 0x102   : > { %v678_v36 = vpop.f32.mrf.mxu0 }
 0x103   : > { %v679_v41 = vadd.f32 %v678_v36, %v677_v35 }
 0x104   : > { %v680_v37 = vpop.f32.mrf.mxu0 }
 0x105   : > { %v429_v47 = vpack.c.bf16 %v679_v41, %v676_v44 }
 0x106   : > { %v681_v38 = vpop.f32.mrf.mxu0 }
 0x107   : > { %v682_v42 = vadd.f32 %v681_v38, %v680_v37 }
 0x108   : > { %v683_v39 = vpop.f32.mrf.mxu0 }
 0x10a   : > { %v684_v40 = vpop.f32.mrf.mxu0 }
 0x10b   : > { %v685_v43 = vadd.f32 %v684_v40, %v683_v39 }
 0x10d   : > { %v430_v45 = vpack.c.bf16 %v685_v43, %v682_v42 }
 0x10f   : > { %694 = vmatprep.subr.bf16.mxu1 %v430_v45 }
 0x110   : > { %695 = vmatpush3.bf16.msra.mxu1 %v430_v45 }
 0x111   : > { %696 = vmatprep.subr.bf16.mxu1 %v429_v47 }
 0x114   : > { %697 = vmatpush3.bf16.msra.mxu1 %v429_v47 }
 0x115   : > { %698 = vmatprep.subr.bf16.mxu1 %v428_v50 }
 0x118   : > { %699 = vmatpush3.bf16.msra.mxu1 %v428_v50 }
 0x119   : > { %700 = vmatprep.subr.bf16.mxu1 %v427_v52 }
 0x11c   : > { %701 = vmatpush3.bf16.msra.mxu1 %v427_v52 }
 0x11f   : > { %703 = vmatmul.mubr.msk.bf16.vlgmr.msra.gmra.mxu1 %vm451_vm0, %v747_v53 }
 0x120   : > { %706 = vmatprep.mubr.msk.bf16.mxu1 %vm451_vm0, %v748_v54 }
 0x127   : > { %707 = vmatmul.mubr.msk.bf16.gmra.mxu1 %vm451_vm0, %v749_v55 }
 0x1df   : > { %v704_v56 = vpop.f32.mrf.mxu1 }
 0x1e0   : > { %v531_v57 = vmax.f32 %v704_v56, 0.0 }
 0x1e1   : > { %v498_v58 = vpop.f32.mrf.mxu1 }
 0x1e2   : > { %539 = vst [vmem:[%s175_s10 + $0x10] sm:$0xff] %v531_v57  ;;  %v529_v59 = vmax.f32 %v498_v58, 0.0 }
 0x1e3   : > { %v705_v60 = vpop.f32.mrf.mxu1 }
 0x1e4   : > { %537 = vst [vmem:[%s175_s10] sm:$0xff] %v529_v59  ;;  %v532_v61 = vmax.f32 %v705_v60, 0.0 }
 0x1e5   : > { %v501_v62 = vpop.f32.mrf.mxu1 }
 0x1e6   : > { %540 = vst [vmem:[%s175_s10 + $0x18] sm:$0xff] %v532_v61  ;;  %v530_v63 = vmax.f32 %v501_v62, 0.0 }
 0x1e7   : > { %v708_v0 = vpop.f32.mrf.mxu1 }
 0x1e8   : > { %538 = vst [vmem:[%s175_s10 + $0x8] sm:$0xff] %v530_v63  ;;  %v535_v1 = vmax.f32 %v708_v0, 0.0 }
 0x1e9   : > { %v514_v2 = vpop.f32.mrf.mxu1 }
 0x1ea   : > { %543 = vst [vmem:[%s175_s10 + $0x30] sm:$0xff] %v535_v1  ;;  %v533_v3 = vmax.f32 %v514_v2, 0.0 }
 0x1eb   : > { %v709_v4 = vpop.f32.mrf.mxu1 }
 0x1ec   : > { %541 = vst [vmem:[%s175_s10 + $0x20] sm:$0xff] %v533_v3  ;;  %v536_v5 = vmax.f32 %v709_v4, 0.0 }
 0x1ed   : > { %v517_v6 = vpop.f32.mrf.mxu1 }
 0x1ee   : > { %544 = vst [vmem:[%s175_s10 + $0x38] sm:$0xff] %v536_v5  ;;  %v534_v7 = vmax.f32 %v517_v6, 0.0 }
 0x1f0   : > { %542 = vst [vmem:[%s175_s10 + $0x28] sm:$0xff] %v534_v7 }
 0x1f1 PF: > { %s13_s12 = sadd.s32 1, %s756_s12  }
 0x1f2   : > { %p10_p4 = scmp.ge.s32.totalorder %s13_s12, 4  }
 0x1f4   :  { %12 = sbr.rel (!%p10_p4) target bundleno = 1 (0x1), region = 62 }

// kernel: encoder_forward.15
= control target key start
LH: loop header
LB: loop body
LE: loop exit
PB: predicated region body
PF: predicated region fallthrough
CT: control target
= control target key end

     0   :  { %s567_s1 = inlined_call_operand.vmem [shape: bf16[256,128], index: 1, kind: input, shape index: {}]   ;;  %s568_s0 = inlined_call_operand.vmem [shape: bf16[64,256], index: 0, kind: input, shape index: {}]   ;;  %s569_s2 = inlined_call_operand.vmem [shape: f32[1,128], index: 2, kind: input, shape index: {}]   ;;  %s570_s3 = inlined_call_operand.vmem [shape: f32[64,128], index: 3, kind: output, shape index: {}]  }
   0x1   :  { %v404_v0 = vld [vmem:[%s567_s1 + $0x78] sm:$0xff]   ;;  %v406_v2 = vld [vmem:[%s567_s1 + $0x70] sm:$0xff]   ;;  %v408_v4 = vld [vmem:[%s567_s1 + $0x68] sm:$0xff]  }
   0x2   :  { %v405_v1 = vld [vmem:[%s567_s1 + $0x38] sm:$0xff]   ;;  %348 = vmatprep.subr.bf16.mxu0 %v404_v0  ;;  %388 = vmatprep.subr.bf16.mxu1 %v404_v0  ;;  %v407_v3 = vld [vmem:[%s567_s1 + $0x30] sm:$0xff]   ;;  %v409_v5 = vld [vmem:[%s567_s1 + $0x28] sm:$0xff]  }
   0x3   :  { %349 = vmatpush3.bf16.msra.mxu0 %v405_v1  ;;  %396 = vmatpush3.bf16.msra.mxu1 %v405_v1  ;;  %v410_v6 = vld [vmem:[%s567_s1 + $0x60] sm:$0xff]   ;;  %v412_v8 = vld [vmem:[%s567_s1 + $0x58] sm:$0xff]   ;;  %v414_v10 = vld [vmem:[%s567_s1 + $0x50] sm:$0xff]  }
   0x4   :  { %350 = vmatprep.subr.bf16.mxu0 %v406_v2  ;;  %389 = vmatprep.subr.bf16.mxu1 %v406_v2  ;;  %v411_v7 = vld [vmem:[%s567_s1 + $0x20] sm:$0xff]   ;;  %v413_v9 = vld [vmem:[%s567_s1 + $0x18] sm:$0xff]   ;;  %v415_v13 = vld [vmem:[%s567_s1 + $0x10] sm:$0xff]  }
   0x5   :  { %v422_v11 = vld [vmem:[%s568_s0 + $0x4] ss:$8 sps:$4 sm:$0xff]   ;;  %v420_v18 = vld [vmem:[%s568_s0] ss:$8 sps:$4 sm:$0xff]   ;;  %v426_v20 = vld [vmem:[%s568_s0 + $0x14] ss:$8 sps:$4 sm:$0xff]  }
   0x6   :  { %v425_v12 = vld [vmem:[%s568_s0 + $0x24] ss:$8 sps:$4 sm:$0xff]   ;;  %230 = vmatprep.mubr.bf16.mxu0 %v422_v11  ;;  %v423_v19 = vld [vmem:[%s568_s0 + $0x20] ss:$8 sps:$4 sm:$0xff]   ;;  %v428_v21 = vld [vmem:[%s568_s0 + $0x34] ss:$8 sps:$4 sm:$0xff]  }
   0x7   :  { %351 = vmatpush3.bf16.msra.mxu0 %v407_v3  ;;  %397 = vmatpush3.bf16.msra.mxu1 %v407_v3  ;;  %v416_v14 = vld [vmem:[%s567_s1 + $0x48] sm:$0xff]   ;;  %v418_v16 = vld [vmem:[%s567_s1 + $0x40] sm:$0xff]   ;;  %v430_v22 = vld [vmem:[%s568_s0 + $0x10] ss:$8 sps:$4 sm:$0xff]  }
   0x8   :  { %352 = vmatprep.subr.bf16.mxu0 %v408_v4  ;;  %390 = vmatprep.subr.bf16.mxu1 %v408_v4  ;;  %v417_v15 = vld [vmem:[%s567_s1 + $0x8] sm:$0xff]   ;;  %v419_v17 = vld [vmem:[%s567_s1] sm:$0xff]   ;;  %v431_v23 = vld [vmem:[%s568_s0 + $0x30] ss:$8 sps:$4 sm:$0xff]  }
   0x9   :  { %246 = vmatprep.mubr.bf16.mxu1 %v425_v12  ;;  %v315_v26 = vld [vmem:[%s569_s2] ss:$0 sm:$0xff] }
   0xb   :  { %353 = vmatpush3.bf16.msra.mxu0 %v409_v5  ;;  %398 = vmatpush3.bf16.msra.mxu1 %v409_v5 }
   0xc   :  { %354 = vmatprep.subr.bf16.mxu0 %v410_v6  ;;  %391 = vmatprep.subr.bf16.mxu1 %v410_v6 }
   0xf   :  { %355 = vmatpush3.bf16.msra.mxu0 %v411_v7  ;;  %399 = vmatpush3.bf16.msra.mxu1 %v411_v7 }
  0x10   :  { %356 = vmatprep.subr.bf16.mxu0 %v412_v8  ;;  %392 = vmatprep.subr.bf16.mxu1 %v412_v8 }
  0x13   :  { %357 = vmatpush3.bf16.msra.mxu0 %v413_v9  ;;  %400 = vmatpush3.bf16.msra.mxu1 %v413_v9 }
  0x14   :  { %358 = vmatprep.subr.bf16.mxu0 %v414_v10  ;;  %393 = vmatprep.subr.bf16.mxu1 %v414_v10 }
  0x17   :  { %359 = vmatpush3.bf16.msra.mxu0 %v415_v13  ;;  %401 = vmatpush3.bf16.msra.mxu1 %v415_v13 }
  0x18   :  { %360 = vmatprep.subr.bf16.mxu0 %v416_v14  ;;  %394 = vmatprep.subr.bf16.mxu1 %v416_v14 }
  0x1b   :  { %361 = vmatpush3.bf16.msra.mxu0 %v417_v15  ;;  %402 = vmatpush3.bf16.msra.mxu1 %v417_v15 }
  0x1c   :  { %362 = vmatprep.subr.bf16.mxu0 %v418_v16  ;;  %395 = vmatprep.subr.bf16.mxu1 %v418_v16 }
  0x1f   :  { %363 = vmatpush3.bf16.msra.mxu0 %v419_v17  ;;  %403 = vmatpush3.bf16.msra.mxu1 %v419_v17 }
  0x22   :  { %231 = vmatmul.mubr.bf16.vlgmr.msra.gmra.mxu0 %v420_v18  ;;  %247 = vmatmul.mubr.bf16.vlgmr.msra.gmra.mxu1 %v423_v19 }
  0x23   :  { %238 = vmatprep.mubr.bf16.mxu0 %v426_v20  ;;  %254 = vmatprep.mubr.bf16.mxu1 %v428_v21 }
  0x2a   :  { %239 = vmatmul.mubr.bf16.gmra.mxu0 %v430_v22  ;;  %255 = vmatmul.mubr.bf16.gmra.mxu1 %v431_v23 }
  0xe2   :  { %v364_v24 = vpop.f32.mrf.mxu0  ;;  %v376_v25 = vpop.f32.mrf.mxu1 }
  0xe4   :  { %v365_v27 = vpop.f32.mrf.mxu0  ;;  %v377_v28 = vpop.f32.mrf.mxu1 }
  0xe5   :  { %v366_v29 = vadd.f32 %v365_v27, %v364_v24  ;;  %v378_v30 = vadd.f32 %v377_v28, %v376_v25 }
  0xe6   :  { %v367_v31 = vpop.f32.mrf.mxu0  ;;  %v379_v32 = vpop.f32.mrf.mxu1 }
  0xe7   :  { %v233_v33 = vadd.f32 %v366_v29, %v315_v26  ;;  %v249_v34 = vadd.f32 %v378_v30, %v315_v26 }
  0xe8   :  { %v368_v35 = vpop.f32.mrf.mxu0  ;;  %v380_v36 = vpop.f32.mrf.mxu1 }
  0xe9   :  { %v271_v37 = vmul.f32 1.442695, %v233_v33  ;;  %v279_v38 = vmul.f32 1.442695, %v249_v34  ;;  %v369_v39 = vadd.f32 %v368_v35, %v367_v31  ;;  %v381_v40 = vadd.f32 %v380_v36, %v379_v32 }
  0xea   :  { %v370_v41 = vpop.f32.mrf.mxu0  ;;  %v382_v42 = vpop.f32.mrf.mxu1  ;;  %vm263_vm0 = vcmp.gt.f32.partialorder %v233_v33, 0.0  ;;  %vm267_vm1 = vcmp.gt.f32.partialorder %v249_v34, 0.0 }
  0xeb   :  { %432 = vpow2.f32 %v271_v37  ;;  %v236_v43 = vadd.f32 %v369_v39, %v315_v26  ;;  %v252_v44 = vadd.f32 %v381_v40, %v315_v26 }
  0xec   :  { %434 = vpow2.f32 %v279_v38  ;;  %v371_v45 = vpop.f32.mrf.mxu0  ;;  %v383_v46 = vpop.f32.mrf.mxu1 }
  0xed   :  { %v372_v47 = vadd.f32 %v371_v45, %v370_v41  ;;  %v384_v48 = vadd.f32 %v383_v46, %v382_v42  ;;  %v273_v49 = vmul.f32 1.442695, %v236_v43  ;;  %v281_v50 = vmul.f32 1.442695, %v252_v44 }
  0xee   :  { %v373_v51 = vpop.f32.mrf.mxu0  ;;  %v385_v52 = vpop.f32.mrf.mxu1  ;;  %vm264_vm2 = vcmp.gt.f32.partialorder %v236_v43, 0.0  ;;  %vm268_vm3 = vcmp.gt.f32.partialorder %v252_v44, 0.0 }
  0xef   :  { %v241_v53 = vadd.f32 %v372_v47, %v315_v26  ;;  %v257_v54 = vadd.f32 %v384_v48, %v315_v26  ;;  %436 = vpow2.f32 %v273_v49 }
  0xf0   :  { %v374_v55 = vpop.f32.mrf.mxu0  ;;  %v386_v56 = vpop.f32.mrf.mxu1  ;;  %438 = vpow2.f32 %v281_v50 }
  0xf1   :  { %v275_v57 = vmul.f32 1.442695, %v241_v53  ;;  %v283_v58 = vmul.f32 1.442695, %v257_v54  ;;  %v375_v59 = vadd.f32 %v374_v55, %v373_v51  ;;  %v387_v60 = vadd.f32 %v386_v56, %v385_v52 }
  0xf2   :  { %vm265_vm4 = vcmp.gt.f32.partialorder %v241_v53, 0.0  ;;  %vm269_vm5 = vcmp.gt.f32.partialorder %v257_v54, 0.0 }
  0xf3   :  { %440 = vpow2.f32 %v275_v57  ;;  %v244_v61 = vadd.f32 %v375_v59, %v315_v26  ;;  %v260_v62 = vadd.f32 %v387_v60, %v315_v26 }
  0xf4   :  { %442 = vpow2.f32 %v283_v58 }
  0xf5   :  { %v277_v63 = vmul.f32 1.442695, %v244_v61  ;;  %v285_v0 = vmul.f32 1.442695, %v260_v62  ;;  %vm266_vm6 = vcmp.gt.f32.partialorder %v244_v61, 0.0  ;;  %vm270_vm7 = vcmp.gt.f32.partialorder %v260_v62, 0.0 }
  0xf7   :  { %444 = vpow2.f32 %v277_v63 }
  0xf8   :  { %v433_v1 = vpop.eup %432  ;;  %446 = vpow2.f32 %v285_v0 }
  0xf9   :  { %v435_v2 = vpop.eup %434  ;;  %v340_v3 = vadd.f32 -1.0, %v433_v1 }
  0xfa   :  { %v344_v4 = vadd.f32 -1.0, %v435_v2 }
  0xfb   :  { %v295_v5 = vsel %vm263_vm0, %v233_v33, %v340_v3 }
  0xfc   :  { %303 = vst [vmem:[%s570_s3] sm:$0xff] %v295_v5  ;;  %v299_v6 = vsel %vm267_vm1, %v249_v34, %v344_v4  ;;  %v437_v7 = vpop.eup %436 }
  0xfd   :  { %307 = vst [vmem:[%s570_s3 + $0x20] sm:$0xff] %v299_v6  ;;  %v439_v8 = vpop.eup %438  ;;  %v341_v9 = vadd.f32 -1.0, %v437_v7 }
  0xfe   :  { %v345_v10 = vadd.f32 -1.0, %v439_v8 }
  0xff   :  { %v296_v12 = vsel %vm264_vm2, %v236_v43, %v341_v9 }
 0x100   :  { %v441_v11 = vpop.eup %440  ;;  %304 = vst [vmem:[%s570_s3 + $0x8] sm:$0xff] %v296_v12  ;;  %v300_v14 = vsel %vm268_vm3, %v252_v44, %v345_v10 }
 0x101   :  { %v443_v13 = vpop.eup %442  ;;  %v342_v15 = vadd.f32 -1.0, %v441_v11  ;;  %308 = vst [vmem:[%s570_s3 + $0x28] sm:$0xff] %v300_v14 }
 0x102   :  { %v346_v16 = vadd.f32 -1.0, %v443_v13 }
 0x103   :  { %v297_v17 = vsel %vm265_vm4, %v241_v53, %v342_v15 }
 0x104   :  { %305 = vst [vmem:[%s570_s3 + $0x10] sm:$0xff] %v297_v17  ;;  %v301_v18 = vsel %vm269_vm5, %v257_v54, %v346_v16  ;;  %v445_v19 = vpop.eup %444 }
 0x105   :  { %309 = vst [vmem:[%s570_s3 + $0x30] sm:$0xff] %v301_v18  ;;  %v447_v20 = vpop.eup %446  ;;  %v343_v21 = vadd.f32 -1.0, %v445_v19 }
 0x106   :  { %v347_v22 = vadd.f32 -1.0, %v447_v20 }
 0x107   :  { %v298_v23 = vsel %vm266_vm6, %v244_v61, %v343_v21 }
 0x108   :  { %306 = vst [vmem:[%s570_s3 + $0x18] sm:$0xff] %v298_v23  ;;  %v302_v24 = vsel %vm270_vm7, %v260_v62, %v347_v22 }
 0x109   :  { %310 = vst [vmem:[%s570_s3 + $0x38] sm:$0xff] %v302_v24 }

// kernel: encoder_forward.18
= control target key start
LH: loop header
LB: loop body
LE: loop exit
PB: predicated region body
PF: predicated region fallthrough
CT: control target
= control target key end

     0   :  { %vm72_vm0 = vcmask 523264   ;;  %s435_s1 = inlined_call_operand.vmem [shape: bf16[64,128], index: 1, kind: input, shape index: {}]   ;;  %s436_s0 = inlined_call_operand.vmem [shape: bf16[64,64], index: 0, kind: input, shape index: {}]   ;;  %s437_s2 = inlined_call_operand.vmem [shape: f32[64,128], index: 2, kind: output, shape index: {}]  }
   0x1   :  { %v302_v0 = vld [vmem:[%s435_s1 + $0x18] sm:$0xff]   ;;  %v303_v1 = vld [vmem:[%s435_s1 + $0x10] sm:$0xff]   ;;  %v304_v2 = vld [vmem:[%s435_s1 + $0x8] sm:$0xff]  }
   0x2   :  { %278 = vmatprep.subr.bf16.mxu0 %v302_v0  ;;  %294 = vmatprep.subr.bf16.mxu1 %v302_v0  ;;  %v306_v3 = vld [vmem:[%s436_s0] sm:$0xff]   ;;  %v307_v4 = vld [vmem:[%s436_s0 + $0x10] sm:$0xff]   ;;  %v308_v6 = vld [vmem:[%s436_s0 + $0x8] sm:$0xff]  }
   0x3   :  { %279 = vmatpush3.bf16.msra.mxu0 %v302_v0  ;;  %298 = vmatpush3.bf16.msra.mxu1 %v302_v0  ;;  %v305_v5 = vld [vmem:[%s435_s1] sm:$0xff]   ;;  %v309_v7 = vld [vmem:[%s436_s0 + $0x18] sm:$0xff]  }
   0x4   :  { %280 = vmatprep.subr.bf16.mxu0 %v303_v1  ;;  %295 = vmatprep.subr.bf16.mxu1 %v303_v1 }
   0x5   :  { %286 = vmatprep.mubr.msk.bf16.mxu0 %vm72_vm0, %v306_v3  ;;  %290 = vmatprep.mubr.msk.bf16.mxu1 %vm72_vm0, %v307_v4 }
   0x7   :  { %281 = vmatpush3.bf16.msra.mxu0 %v303_v1  ;;  %299 = vmatpush3.bf16.msra.mxu1 %v303_v1 }
   0x8   :  { %282 = vmatprep.subr.bf16.mxu0 %v304_v2  ;;  %296 = vmatprep.subr.bf16.mxu1 %v304_v2 }
   0xb   :  { %283 = vmatpush3.bf16.msra.mxu0 %v304_v2  ;;  %300 = vmatpush3.bf16.msra.mxu1 %v304_v2 }
   0xc   :  { %284 = vmatprep.subr.bf16.mxu0 %v305_v5  ;;  %297 = vmatprep.subr.bf16.mxu1 %v305_v5 }
   0xf   :  { %285 = vmatpush3.bf16.msra.mxu0 %v305_v5  ;;  %301 = vmatpush3.bf16.msra.mxu1 %v305_v5 }
  0x12   :  { %287 = vmatmul.mubr.msk.bf16.vlgmr.msra.gmra.mxu0 %vm72_vm0, %v308_v6  ;;  %291 = vmatmul.mubr.msk.bf16.vlgmr.msra.gmra.mxu1 %vm72_vm0, %v309_v7 }
  0xd2   :  { %v288_v8 = vpop.f32.mrf.mxu0  ;;  %v401_v9 = vpop.f32.mrf.mxu1 }
  0xd3   :  { %v152_v10 = vmul.f32 %v288_v8, %v288_v8  ;;  %v156_v23 = vmul.f32 %v401_v9, %v401_v9 }
  0xd4   :  { %v119_v11 = vpop.f32.mrf.mxu0  ;;  %v135_v12 = vpop.f32.mrf.mxu1 }
  0xd5   :  { %162 = vadd.xlane.f32.xlu1 %v152_v10  ;;  %v150_v13 = vmul.f32 %v119_v11, %v119_v11  ;;  %v154_v18 = vmul.f32 %v135_v12, %v135_v12 }
  0xd6   :  { %v289_v14 = vpop.f32.mrf.mxu0  ;;  %v403_v15 = vpop.f32.mrf.mxu1 }
  0xd7   :  { %158 = vadd.xlane.f32.xlu0 %v150_v13  ;;  %v153_v16 = vmul.f32 %v289_v14, %v289_v14  ;;  %v157_v22 = vmul.f32 %v403_v15, %v403_v15 }
  0xd8   :  { %v138_v17 = vpop.f32.mrf.mxu1  ;;  %v122_v19 = vpop.f32.mrf.mxu0 }
  0xd9   :  { %164 = vadd.xlane.f32.xlu1 %v153_v16  ;;  %v155_v20 = vmul.f32 %v138_v17, %v138_v17  ;;  %v151_v21 = vmul.f32 %v122_v19, %v122_v19 }
  0xdb   :  { %166 = vadd.xlane.f32.xlu0 %v154_v18 }
  0xdd   :  { %168 = vadd.xlane.f32.xlu1 %v155_v20 }
  0xdf   :  { %160 = vadd.xlane.f32.xlu0 %v151_v21 }
  0xe1   :  { %172 = vadd.xlane.f32.xlu1 %v157_v22 }
  0xe3   :  { %170 = vadd.xlane.f32.xlu0 %v156_v23 }
 0x15e   :  { %v163_v24 = vpop.xlane.xlu1 %162 }
 0x15f   :  { %v176_v25 = vmax.f32 %v163_v24, 1e-24 }
 0x160   :  { %v159_v26 = vpop.xlane.xlu0 %158 }
 0x161   :  { %310 = vrsqrt.f32 %v176_v25  ;;  %v174_v27 = vmax.f32 %v159_v26, 1e-24 }
 0x162   :  { %v165_v28 = vpop.xlane.xlu1 %164 }
 0x163   :  { %312 = vrsqrt.f32 %v174_v27  ;;  %v177_v29 = vmax.f32 %v165_v28, 1e-24 }
 0x164   :  { %v167_v30 = vpop.xlane.xlu0 %166 }
 0x165   :  { %314 = vrsqrt.f32 %v177_v29  ;;  %v178_v31 = vmax.f32 %v167_v30, 1e-24 }
 0x166   :  { %v169_v32 = vpop.xlane.xlu1 %168 }
 0x167   :  { %316 = vrsqrt.f32 %v178_v31  ;;  %v179_v33 = vmax.f32 %v169_v32, 1e-24 }
 0x168   :  { %v161_v34 = vpop.xlane.xlu0 %160 }
 0x169   :  { %318 = vrsqrt.f32 %v179_v33  ;;  %v175_v35 = vmax.f32 %v161_v34, 1e-24 }
 0x16a   :  { %v173_v36 = vpop.xlane.xlu1 %172 }
 0x16b   :  { %320 = vrsqrt.f32 %v175_v35  ;;  %v181_v37 = vmax.f32 %v173_v36, 1e-24 }
 0x16c   :  { %v171_v38 = vpop.xlane.xlu0 %170 }
 0x16d   :  { %322 = vrsqrt.f32 %v181_v37  ;;  %v180_v39 = vmax.f32 %v171_v38, 1e-24 }
 0x16e   :  { %v311_v40 = vpop.eup %310 }
 0x16f   :  { %v192_v41 = vmul.f32 %v311_v40, %v288_v8  ;;  %324 = vrsqrt.f32 %v180_v39 }
 0x170   :  { %v313_v42 = vpop.eup %312 }
 0x171   :  { %v200_v43 = vsub.f32 0.0, %v192_v41  ;;  %v190_v44 = vmul.f32 %v313_v42, %v119_v11 }
 0x172   :  { %v315_v45 = vpop.eup %314 }
 0x173   :  { %v210_v46 = vmul.f32 1.442695, %v200_v43  ;;  %v198_v47 = vsub.f32 0.0, %v190_v44  ;;  %v193_v48 = vmul.f32 %v315_v45, %v289_v14 }
 0x174   :  { %v317_v49 = vpop.eup %316 }
 0x175   :  { %326 = vpow2.f32 %v210_v46  ;;  %v206_v50 = vmul.f32 1.442695, %v198_v47  ;;  %v201_v51 = vsub.f32 0.0, %v193_v48  ;;  %v194_v52 = vmul.f32 %v317_v49, %v135_v12 }
 0x176   :  { %v319_v53 = vpop.eup %318 }
 0x177   :  { %328 = vpow2.f32 %v206_v50  ;;  %v212_v54 = vmul.f32 1.442695, %v201_v51  ;;  %v202_v55 = vsub.f32 0.0, %v194_v52  ;;  %v195_v56 = vmul.f32 %v319_v53, %v138_v17 }
 0x178   :  { %v321_v57 = vpop.eup %320 }
 0x179   :  { %330 = vpow2.f32 %v212_v54  ;;  %v214_v58 = vmul.f32 1.442695, %v202_v55  ;;  %v203_v59 = vsub.f32 0.0, %v195_v56  ;;  %v191_v60 = vmul.f32 %v321_v57, %v122_v19 }
 0x17a   :  { %v323_v61 = vpop.eup %322 }
 0x17b   :  { %332 = vpow2.f32 %v214_v58  ;;  %v216_v62 = vmul.f32 1.442695, %v203_v59  ;;  %v199_v63 = vsub.f32 0.0, %v191_v60  ;;  %v197_v0 = vmul.f32 %v323_v61, %v403_v15 }
 0x17c   :  { %v325_v1 = vpop.eup %324 }
 0x17d   :  { %334 = vpow2.f32 %v216_v62  ;;  %v208_v2 = vmul.f32 1.442695, %v199_v63  ;;  %v205_v3 = vsub.f32 0.0, %v197_v0  ;;  %v196_v4 = vmul.f32 %v325_v1, %v401_v9 }
 0x17f   :  { %336 = vpow2.f32 %v208_v2  ;;  %v220_v5 = vmul.f32 1.442695, %v205_v3  ;;  %v204_v6 = vsub.f32 0.0, %v196_v4 }
 0x181   :  { %338 = vpow2.f32 %v220_v5  ;;  %v218_v7 = vmul.f32 1.442695, %v204_v6 }
 0x182   :  { %v327_v8 = vpop.eup %326 }
 0x183   :  { %v224_v10 = vadd.f32 1.0, %v327_v8  ;;  %340 = vpow2.f32 %v218_v7 }
 0x184   :  { %v329_v11 = vpop.eup %328 }
 0x185   :  { %342 = vrcp.f32 %v224_v10  ;;  %v222_v12 = vadd.f32 1.0, %v329_v11 }
 0x186   :  { %v331_v13 = vpop.eup %330 }
 0x187   :  { %344 = vrcp.f32 %v222_v12  ;;  %v225_v14 = vadd.f32 1.0, %v331_v13 }
 0x188   :  { %v333_v15 = vpop.eup %332 }
 0x189   :  { %346 = vrcp.f32 %v225_v14  ;;  %v226_v16 = vadd.f32 1.0, %v333_v15 }
 0x18a   :  { %v335_v17 = vpop.eup %334 }
 0x18b   :  { %348 = vrcp.f32 %v226_v16  ;;  %v227_v9 = vadd.f32 1.0, %v335_v17 }
 0x18c   :  { %v337_v18 = vpop.eup %336 }
 0x18d   :  { %350 = vrcp.f32 %v227_v9  ;;  %v223_v19 = vadd.f32 1.0, %v337_v18 }
 0x18e   :  { %v339_v20 = vpop.eup %338 }
 0x18f   :  { %352 = vrcp.f32 %v223_v19  ;;  %v229_v21 = vadd.f32 1.0, %v339_v20 }
 0x190   :  { %v341_v22 = vpop.eup %340 }
 0x191   :  { %354 = vrcp.f32 %v229_v21  ;;  %v228_v23 = vadd.f32 1.0, %v341_v22 }
 0x192   :  { %v343_v24 = vpop.eup %342 }
 0x193   :  { %248 = vst [vmem:[%s437_s2 + $0x10] sm:$0xff] %v343_v24  ;;  %356 = vrcp.f32 %v228_v23 }
 0x194   :  { %v345_v25 = vpop.eup %344 }
 0x195   :  { %246 = vst [vmem:[%s437_s2] sm:$0xff] %v345_v25 }
 0x196   :  { %v347_v26 = vpop.eup %346 }
 0x197   :  { %249 = vst [vmem:[%s437_s2 + $0x18] sm:$0xff] %v347_v26 }
 0x198   :  { %v349_v27 = vpop.eup %348 }
 0x199   :  { %250 = vst [vmem:[%s437_s2 + $0x20] sm:$0xff] %v349_v27 }
 0x19a   :  { %v351_v28 = vpop.eup %350 }
 0x19b   :  { %251 = vst [vmem:[%s437_s2 + $0x28] sm:$0xff] %v351_v28 }
 0x19c   :  { %v353_v29 = vpop.eup %352 }
 0x19d   :  { %247 = vst [vmem:[%s437_s2 + $0x8] sm:$0xff] %v353_v29 }
 0x19e   :  { %v355_v30 = vpop.eup %354 }
 0x19f   :  { %253 = vst [vmem:[%s437_s2 + $0x38] sm:$0xff] %v355_v30 }
 0x1a0   :  { %v357_v31 = vpop.eup %356 }
 0x1a1   :  { %252 = vst [vmem:[%s437_s2 + $0x30] sm:$0xff] %v357_v31 }

// kernel: encoder_forward.19
= control target key start
LH: loop header
LB: loop body
LE: loop exit
PB: predicated region body
PF: predicated region fallthrough
CT: control target
= control target key end

     0   :  { %v517_v45 = vmov 0   ;;  %s651_s3 = inlined_call_operand.vmem [shape: bf16[128,128], index: 3, kind: input, shape index: {}]   ;;  %s652_s0 = inlined_call_operand.vmem [shape: bf16[64,128], index: 0, kind: input, shape index: {}]   ;;  %s653_s4 = inlined_call_operand.<no memory space> [shape: f32[1,1], index: 4, kind: input, shape index: {}]   ;;  %s654_s2 = inlined_call_operand.vmem [shape: bf16[64,128], index: 2, kind: input, shape index: {}]   ;;  %s655_s1 = inlined_call_operand.vmem [shape: bf16[64,128], index: 1, kind: input, shape index: {}]   ;;  %s656_s5 = inlined_call_operand.vmem [shape: f32[64,128], index: 5, kind: output, shape index: {}]  }
   0x1   :  { %v505_v0 = vld [vmem:[%s651_s3 + $0x38] sm:$0xff]   ;;  %v506_v1 = vld [vmem:[%s651_s3 + $0x30] sm:$0xff]   ;;  %v507_v2 = vld [vmem:[%s651_s3 + $0x28] sm:$0xff]   ;;  %v10_v12 = vstv %s653_s4  ;;  %503 = vset.pattern.permute.xlu1 %v517_v45  ;;  %504 = vset.pattern.permute.xlu0 %v517_v45 }
   0x2   :  { %462 = vmatprep.subr.bf16.mxu0 %v505_v0  ;;  %486 = vmatprep.subr.bf16.mxu1 %v505_v0  ;;  %v508_v3 = vld [vmem:[%s651_s3 + $0x20] sm:$0xff]   ;;  %v514_v5 = vld [vmem:[%s652_s0 + $0x10] sm:$0xff]   ;;  %v509_v6 = vld [vmem:[%s651_s3 + $0x18] sm:$0xff]   ;;  %11 = vst [vmem:[#allocation2] sm:$0x1] %v10_v12 }
   0x3   :  { %463 = vmatpush3.bf16.msra.mxu0 %v505_v0  ;;  %494 = vmatpush3.bf16.msra.mxu1 %v505_v0  ;;  %v513_v4 = vld [vmem:[%s652_s0] sm:$0xff]   ;;  %v510_v7 = vld [vmem:[%s651_s3 + $0x10] sm:$0xff]   ;;  %v511_v8 = vld [vmem:[%s651_s3 + $0x8] sm:$0xff]  }
   0x4   :  { %464 = vmatprep.subr.bf16.mxu0 %v506_v1  ;;  %487 = vmatprep.subr.bf16.mxu1 %v506_v1  ;;  %v512_v9 = vld [vmem:[%s651_s3] sm:$0xff]   ;;  %v515_v10 = vld [vmem:[%s652_s0 + $0x8] sm:$0xff]   ;;  %v516_v11 = vld [vmem:[%s652_s0 + $0x18] sm:$0xff]  }
   0x5   :  { %478 = vmatprep.mubr.bf16.mxu0 %v513_v4  ;;  %482 = vmatprep.mubr.bf16.mxu1 %v514_v5  ;;  %v449_v13 = vld [vmem:[%s654_s2 + $0x18] sm:$0xff]   ;;  %v447_v14 = vld [vmem:[%s654_s2 + $0x8] sm:$0xff]   ;;  %v429_v25 = vld [vmem:[%s654_s2] sm:$0xff]  }
   0x6   :  { %v442_v15 = vunpack.c.l.bf16 %v449_v13  ;;  %v434_v16 = vunpack.c.l.bf16 %v447_v14  ;;  %v444_v17 = vld [vmem:[%s655_s1 + $0x8] sm:$0xff]   ;;  %v435_v23 = vunpack.c.h.bf16 %v447_v14  ;;  %v430_v30 = vunpack.c.l.bf16 %v429_v25  ;;  %v448_v31 = vld [vmem:[%s654_s2 + $0x10] sm:$0xff]   ;;  %v413_v36 = vld [vmem:[%s655_s1] sm:$0xff]  }
   0x7   :  { %465 = vmatpush3.bf16.msra.mxu0 %v506_v1  ;;  %495 = vmatpush3.bf16.msra.mxu1 %v506_v1  ;;  %v418_v22 = vunpack.c.l.bf16 %v444_v17  ;;  %v443_v32 = vunpack.c.h.bf16 %v449_v13  ;;  %v438_v35 = vunpack.c.l.bf16 %v448_v31  ;;  %v419_v38 = vunpack.c.h.bf16 %v444_v17  ;;  %v446_v41 = vld [vmem:[%s655_s1 + $0x18] sm:$0xff]   ;;  %v445_v42 = vld [vmem:[%s655_s1 + $0x10] sm:$0xff]  }
   0x8   :  { %466 = vmatprep.subr.bf16.mxu0 %v507_v2  ;;  %488 = vmatprep.subr.bf16.mxu1 %v507_v2  ;;  %v414_v40 = vunpack.c.l.bf16 %v413_v36  ;;  %v427_v44 = vunpack.c.h.bf16 %v446_v41  ;;  %v422_v47 = vunpack.c.l.bf16 %v445_v42  ;;  %v439_v48 = vunpack.c.h.bf16 %v448_v31 }
   0x9   :  { %v431_v51 = vunpack.c.h.bf16 %v429_v25  ;;  %v415_v54 = vunpack.c.h.bf16 %v413_v36  ;;  %v426_v57 = vunpack.c.l.bf16 %v446_v41  ;;  %v423_v59 = vunpack.c.h.bf16 %v445_v42  ;;  %v411_v62 = vld [vmem:[#allocation2] ss:$0 sm:$0xff] }
   0xa   :  { %v287_v31 = vlaneseq }
   0xb   :  { %467 = vmatpush3.bf16.msra.mxu0 %v507_v2  ;;  %496 = vmatpush3.bf16.msra.mxu1 %v507_v2 }
   0xc   :  { %468 = vmatprep.subr.bf16.mxu0 %v508_v3  ;;  %489 = vmatprep.subr.bf16.mxu1 %v508_v3 }
   0xf   :  { %469 = vmatpush3.bf16.msra.mxu0 %v508_v3  ;;  %497 = vmatpush3.bf16.msra.mxu1 %v508_v3 }
  0x10   :  { %470 = vmatprep.subr.bf16.mxu0 %v509_v6  ;;  %490 = vmatprep.subr.bf16.mxu1 %v509_v6 }
  0x13   :  { %471 = vmatpush3.bf16.msra.mxu0 %v509_v6  ;;  %498 = vmatpush3.bf16.msra.mxu1 %v509_v6 }
  0x14   :  { %472 = vmatprep.subr.bf16.mxu0 %v510_v7  ;;  %491 = vmatprep.subr.bf16.mxu1 %v510_v7 }
  0x17   :  { %473 = vmatpush3.bf16.msra.mxu0 %v510_v7  ;;  %499 = vmatpush3.bf16.msra.mxu1 %v510_v7 }
  0x18   :  { %474 = vmatprep.subr.bf16.mxu0 %v511_v8  ;;  %492 = vmatprep.subr.bf16.mxu1 %v511_v8 }
  0x1b   :  { %475 = vmatpush3.bf16.msra.mxu0 %v511_v8  ;;  %500 = vmatpush3.bf16.msra.mxu1 %v511_v8 }
  0x1c   :  { %476 = vmatprep.subr.bf16.mxu0 %v512_v9  ;;  %493 = vmatprep.subr.bf16.mxu1 %v512_v9 }
  0x1f   :  { %477 = vmatpush3.bf16.msra.mxu0 %v512_v9  ;;  %501 = vmatpush3.bf16.msra.mxu1 %v512_v9 }
  0x22   :  { %479 = vmatmul.mubr.bf16.vlgmr.msra.gmra.mxu0 %v515_v10  ;;  %483 = vmatmul.mubr.bf16.vlgmr.msra.gmra.mxu1 %v516_v11 }
  0xe2   :  { %v480_v18 = vpop.f32.mrf.mxu0  ;;  %v484_v19 = vpop.f32.mrf.mxu1 }
  0xe3   :  { %v261_v20 = vmul.f32 %v484_v19, %v442_v15  ;;  %v257_v21 = vmul.f32 %v480_v18, %v434_v16  ;;  %v203_v28 = vmul.f32 %v480_v18, %v418_v22  ;;  %v207_v60 = vmul.f32 %v484_v19, %v426_v57 }
  0xe4   :  { %v153_v24 = vpop.f32.mrf.mxu0  ;;  %v169_v26 = vpop.f32.mrf.mxu1 }
  0xe5   :  { %275 = vadd.xlane.f32.xlu0 %v261_v20  ;;  %267 = vadd.xlane.f32.xlu1 %v257_v21  ;;  %v255_v34 = vmul.f32 %v430_v30, %v153_v24  ;;  %v259_v39 = vmul.f32 %v438_v35, %v169_v26  ;;  %v201_v46 = vmul.f32 %v414_v40, %v153_v24 }
  0xe6   :  { %v481_v27 = vpop.f32.mrf.mxu0  ;;  %v485_v33 = vpop.f32.mrf.mxu1  ;;  %v205_v52 = vmul.f32 %v422_v47, %v169_v26 }
  0xe7   :  { %v258_v29 = vmul.f32 %v481_v27, %v435_v23  ;;  %v262_v37 = vmul.f32 %v485_v33, %v443_v32  ;;  %v204_v43 = vmul.f32 %v481_v27, %v419_v38  ;;  %v208_v49 = vmul.f32 %v485_v33, %v427_v44 }
  0xe8   :  { %v172_v50 = vpop.f32.mrf.mxu1  ;;  %v156_v53 = vpop.f32.mrf.mxu0  ;;  %v288_v33 = vand.u32 127, %v287_v31 }
  0xe9   :  { %213 = vadd.xlane.f32.xlu0 %v203_v28  ;;  %269 = vadd.xlane.f32.xlu1 %v258_v29  ;;  %v260_v55 = vmul.f32 %v439_v48, %v172_v50  ;;  %v256_v56 = vmul.f32 %v431_v51, %v156_v53  ;;  %v202_v58 = vmul.f32 %v415_v54, %v156_v53 }
  0xea   :  { %v206_v61 = vmul.f32 %v423_v59, %v172_v50  ;;  %vm290_vm0 = vcmp.eq.s32.totalorder %v288_v33, 1  ;;  %vm289_vm1 = vcmp.eq.s32.totalorder %v288_v33, 0 }
  0xed   :  { %263 = vadd.xlane.f32.xlu0 %v255_v34  ;;  %277 = vadd.xlane.f32.xlu1 %v262_v37 }
  0xf1   :  { %271 = vadd.xlane.f32.xlu0 %v259_v39  ;;  %215 = vadd.xlane.f32.xlu1 %v204_v43 }
  0xf5   :  { %209 = vadd.xlane.f32.xlu0 %v201_v46  ;;  %223 = vadd.xlane.f32.xlu1 %v208_v49 }
  0xf9   :  { %217 = vadd.xlane.f32.xlu0 %v205_v52  ;;  %273 = vadd.xlane.f32.xlu1 %v260_v55 }
  0xfd   :  { %265 = vadd.xlane.f32.xlu0 %v256_v56  ;;  %211 = vadd.xlane.f32.xlu1 %v202_v58 }
 0x101   :  { %221 = vadd.xlane.f32.xlu0 %v207_v60  ;;  %219 = vadd.xlane.f32.xlu1 %v206_v61 }
 0x16e   :  { %v276_v63 = vpop.xlane.xlu0 %275  ;;  %v268_v0 = vpop.xlane.xlu1 %267 }
 0x16f   :  { %v281_v1 = vadd.f32 %v411_v62, %v268_v0  ;;  %v285_v3 = vadd.f32 %v411_v62, %v276_v63 }
 0x171   :  { %303 = vperm.xlu1 %503, %v281_v1  }
 0x172   :  { %v214_v2 = vpop.xlane.xlu0 %213  ;;  %v270_v4 = vpop.xlane.xlu1 %269 }
 0x173   :  { %v233_v6 = vadd.f32 %v411_v62, %v214_v2  ;;  %v282_v19 = vadd.f32 %v411_v62, %v270_v4 }
 0x175   :  { %323 = vperm.xlu1 %503, %v285_v3  }
 0x176   :  { %v264_v5 = vpop.xlane.xlu0 %263  ;;  %v278_v8 = vpop.xlane.xlu1 %277 }
 0x177   :  { %v279_v7 = vadd.f32 %v411_v62, %v264_v5  ;;  %v286_v22 = vadd.f32 %v411_v62, %v278_v8 }
 0x179   :  { %293 = vperm.xlu0 %504, %v279_v7   ;;  %351 = vperm.xlu1 %503, %v233_v6  }
 0x17a   :  { %v272_v9 = vpop.xlane.xlu0 %271  ;;  %v216_v11 = vpop.xlane.xlu1 %215 }
 0x17b   :  { %v283_v10 = vadd.f32 %v411_v62, %v272_v9  ;;  %v234_v12 = vadd.f32 %v411_v62, %v216_v11 }
 0x17d   :  { %313 = vperm.xlu1 %503, %v283_v10   ;;  %356 = vperm.xlu0 %504, %v234_v12  }
 0x17e   :  { %v210_v13 = vpop.xlane.xlu0 %209  ;;  %v224_v15 = vpop.xlane.xlu1 %223 }
 0x17f   :  { %v231_v14 = vadd.f32 %v411_v62, %v210_v13  ;;  %v238_v27 = vadd.f32 %v411_v62, %v224_v15 }
 0x181   :  { %341 = vperm.xlu1 %503, %v231_v14  }
 0x182   :  { %v218_v16 = vpop.xlane.xlu0 %217  ;;  %v274_v18 = vpop.xlane.xlu1 %273 }
 0x183   :  { %v235_v17 = vadd.f32 %v411_v62, %v218_v16  ;;  %v284_v28 = vadd.f32 %v411_v62, %v274_v18 }
 0x185   :  { %361 = vperm.xlu1 %503, %v235_v17  }
 0x186   :  { %v212_v20 = vpop.xlane.xlu1 %211  ;;  %v266_v24 = vpop.xlane.xlu0 %265 }
 0x187   :  { %v232_v21 = vadd.f32 %v411_v62, %v212_v20  ;;  %v280_v26 = vadd.f32 %v411_v62, %v266_v24 }
 0x189   :  { %308 = vperm.xlu1 %503, %v282_v19   ;;  %346 = vperm.xlu0 %504, %v232_v21  }
 0x18a   :  { %v220_v23 = vpop.xlane.xlu1 %219  ;;  %v222_v29 = vpop.xlane.xlu0 %221 }
 0x18b   :  { %v236_v25 = vadd.f32 %v411_v62, %v220_v23  ;;  %v237_v30 = vadd.f32 %v411_v62, %v222_v29 }
 0x18d   :  { %328 = vperm.xlu1 %503, %v286_v22   ;;  %366 = vperm.xlu0 %504, %v236_v25  }
 0x191   :  { %298 = vperm.xlu1 %503, %v280_v26   ;;  %376 = vperm.xlu0 %504, %v238_v27  }
 0x195   :  { %318 = vperm.xlu1 %503, %v284_v28  }
 0x199   :  { %371 = vperm.xlu1 %503, %v237_v30  }
 0x1ec   :  { %v304_v32 = vpop.permute.xlu1 %303 }
 0x1ed   :  { %v333_v35 = vsel %vm290_vm0, %v304_v32, 0.0 }
 0x1f0   :  { %v324_v34 = vpop.permute.xlu1 %323 }
 0x1f1   :  { %v337_v62 = vsel %vm290_vm0, %v324_v34, 0.0 }
 0x1f4   :  { %v352_v36 = vpop.permute.xlu1 %351  ;;  %v294_v39 = vpop.permute.xlu0 %293 }
 0x1f5   :  { %v381_v37 = vsel %vm289_vm1, %v352_v36, %v333_v35  ;;  %v331_v40 = vsel %vm290_vm0, %v294_v39, 0.0 }
 0x1f6   :  { %389 = vst [vmem:[%s656_s5 + $0x10] sm:$0xff] %v381_v37 }
 0x1f8   :  { %v314_v38 = vpop.permute.xlu1 %313  ;;  %v357_v45 = vpop.permute.xlu0 %356 }
 0x1f9   :  { %v335_v43 = vsel %vm290_vm0, %v314_v38, 0.0 }
 0x1fc   :  { %v342_v41 = vpop.permute.xlu1 %341 }
 0x1fd   :  { %v379_v42 = vsel %vm289_vm1, %v342_v41, %v331_v40 }
 0x1fe   :  { %387 = vst [vmem:[%s656_s5] sm:$0xff] %v379_v42 }
 0x200   :  { %v362_v44 = vpop.permute.xlu1 %361 }
 0x201   :  { %v383_v46 = vsel %vm289_vm1, %v362_v44, %v335_v43 }
 0x202   :  { %391 = vst [vmem:[%s656_s5 + $0x20] sm:$0xff] %v383_v46 }
 0x204   :  { %v309_v47 = vpop.permute.xlu1 %308  ;;  %v347_v48 = vpop.permute.xlu0 %346 }
 0x205   :  { %v334_v49 = vsel %vm290_vm0, %v309_v47, 0.0 }
 0x206   :  { %v382_v50 = vsel %vm289_vm1, %v357_v45, %v334_v49 }
 0x207   :  { %390 = vst [vmem:[%s656_s5 + $0x18] sm:$0xff] %v382_v50 }
 0x208   :  { %v329_v51 = vpop.permute.xlu1 %328  ;;  %v367_v52 = vpop.permute.xlu0 %366 }
 0x209   :  { %v338_v54 = vsel %vm290_vm0, %v329_v51, 0.0 }
 0x20c   :  { %v299_v53 = vpop.permute.xlu1 %298  ;;  %v377_v55 = vpop.permute.xlu0 %376 }
 0x20d   :  { %v332_v56 = vsel %vm290_vm0, %v299_v53, 0.0  ;;  %v386_v57 = vsel %vm289_vm1, %v377_v55, %v338_v54 }
 0x20e   :  { %v380_v58 = vsel %vm289_vm1, %v347_v48, %v332_v56  ;;  %394 = vst [vmem:[%s656_s5 + $0x38] sm:$0xff] %v386_v57 }
 0x20f   :  { %388 = vst [vmem:[%s656_s5 + $0x8] sm:$0xff] %v380_v58 }
 0x210   :  { %v319_v59 = vpop.permute.xlu1 %318 }
 0x211   :  { %v336_v60 = vsel %vm290_vm0, %v319_v59, 0.0 }
 0x212   :  { %v384_v61 = vsel %vm289_vm1, %v367_v52, %v336_v60 }
 0x213   :  { %392 = vst [vmem:[%s656_s5 + $0x28] sm:$0xff] %v384_v61 }
 0x214   :  { %v372_v63 = vpop.permute.xlu1 %371 }
 0x215   :  { %v385_v0 = vsel %vm289_vm1, %v372_v63, %v337_v62 }
 0x216   :  { %393 = vst [vmem:[%s656_s5 + $0x30] sm:$0xff] %v385_v0 }

// kernel: encoder_forward.17
= control target key start
LH: loop header
LB: loop body
LE: loop exit
PB: predicated region body
PF: predicated region fallthrough
CT: control target
= control target key end

     0   :  { %s483_s1 = inlined_call_operand.vmem [shape: bf16[128,128], index: 1, kind: input, shape index: {}]   ;;  %s484_s0 = inlined_call_operand.vmem [shape: bf16[128,128], index: 0, kind: input, shape index: {}]   ;;  %s485_s2 = inlined_call_operand.vmem [shape: f32[1,128], index: 2, kind: input, shape index: {}]   ;;  %s486_s3 = inlined_call_operand.vmem [shape: f32[128,128], index: 3, kind: output, shape index: {}]  }
   0x1   :  { %v348_v0 = vld [vmem:[%s483_s1 + $0x38] sm:$0xff]   ;;  %v349_v1 = vld [vmem:[%s483_s1 + $0x30] sm:$0xff]   ;;  %v350_v2 = vld [vmem:[%s483_s1 + $0x28] sm:$0xff]  }
   0x2   :  { %300 = vmatprep.subr.bf16.mxu0 %v348_v0  ;;  %332 = vmatprep.subr.bf16.mxu1 %v348_v0  ;;  %v351_v3 = vld [vmem:[%s483_s1 + $0x20] sm:$0xff]   ;;  %v352_v6 = vld [vmem:[%s483_s1 + $0x18] sm:$0xff]   ;;  %v353_v7 = vld [vmem:[%s483_s1 + $0x10] sm:$0xff]  }
   0x3   :  { %301 = vmatpush3.bf16.msra.mxu0 %v348_v0  ;;  %340 = vmatpush3.bf16.msra.mxu1 %v348_v0  ;;  %v356_v4 = vld [vmem:[%s484_s0] sm:$0xff]   ;;  %v354_v8 = vld [vmem:[%s483_s1 + $0x8] sm:$0xff]   ;;  %v360_v12 = vld [vmem:[%s484_s0 + $0x10] sm:$0xff]  }
   0x4   :  { %302 = vmatprep.subr.bf16.mxu0 %v349_v1  ;;  %333 = vmatprep.subr.bf16.mxu1 %v349_v1  ;;  %v357_v5 = vld [vmem:[%s484_s0 + $0x20] sm:$0xff]   ;;  %v358_v10 = vld [vmem:[%s484_s0 + $0x8] sm:$0xff]   ;;  %v361_v13 = vld [vmem:[%s484_s0 + $0x30] sm:$0xff]  }
   0x5   :  { %316 = vmatprep.mubr.bf16.mxu0 %v356_v4  ;;  %324 = vmatprep.mubr.bf16.mxu1 %v357_v5  ;;  %v355_v9 = vld [vmem:[%s483_s1] sm:$0xff]   ;;  %v359_v11 = vld [vmem:[%s484_s0 + $0x28] sm:$0xff]   ;;  %v362_v14 = vld [vmem:[%s484_s0 + $0x18] sm:$0xff]  }
   0x6   :  { %v363_v15 = vld [vmem:[%s484_s0 + $0x38] sm:$0xff]   ;;  %v267_v16 = vld [vmem:[%s485_s2] ss:$0 sm:$0xff] }
   0x7   :  { %303 = vmatpush3.bf16.msra.mxu0 %v349_v1  ;;  %341 = vmatpush3.bf16.msra.mxu1 %v349_v1 }
   0x8   :  { %304 = vmatprep.subr.bf16.mxu0 %v350_v2  ;;  %334 = vmatprep.subr.bf16.mxu1 %v350_v2 }
   0xb   :  { %305 = vmatpush3.bf16.msra.mxu0 %v350_v2  ;;  %342 = vmatpush3.bf16.msra.mxu1 %v350_v2 }
   0xc   :  { %306 = vmatprep.subr.bf16.mxu0 %v351_v3  ;;  %335 = vmatprep.subr.bf16.mxu1 %v351_v3 }
   0xf   :  { %307 = vmatpush3.bf16.msra.mxu0 %v351_v3  ;;  %343 = vmatpush3.bf16.msra.mxu1 %v351_v3 }
  0x10   :  { %308 = vmatprep.subr.bf16.mxu0 %v352_v6  ;;  %336 = vmatprep.subr.bf16.mxu1 %v352_v6 }
  0x13   :  { %309 = vmatpush3.bf16.msra.mxu0 %v352_v6  ;;  %344 = vmatpush3.bf16.msra.mxu1 %v352_v6 }
  0x14   :  { %310 = vmatprep.subr.bf16.mxu0 %v353_v7  ;;  %337 = vmatprep.subr.bf16.mxu1 %v353_v7 }
  0x17   :  { %311 = vmatpush3.bf16.msra.mxu0 %v353_v7  ;;  %345 = vmatpush3.bf16.msra.mxu1 %v353_v7 }
  0x18   :  { %312 = vmatprep.subr.bf16.mxu0 %v354_v8  ;;  %338 = vmatprep.subr.bf16.mxu1 %v354_v8 }
  0x1b   :  { %313 = vmatpush3.bf16.msra.mxu0 %v354_v8  ;;  %346 = vmatpush3.bf16.msra.mxu1 %v354_v8 }
  0x1c   :  { %314 = vmatprep.subr.bf16.mxu0 %v355_v9  ;;  %339 = vmatprep.subr.bf16.mxu1 %v355_v9 }
  0x1f   :  { %315 = vmatpush3.bf16.msra.mxu0 %v355_v9  ;;  %347 = vmatpush3.bf16.msra.mxu1 %v355_v9 }
  0x22   :  { %317 = vmatmul.mubr.bf16.vlgmr.msra.gmra.mxu0 %v358_v10  ;;  %325 = vmatmul.mubr.bf16.vlgmr.msra.gmra.mxu1 %v359_v11 }
  0x23   :  { %320 = vmatprep.mubr.bf16.mxu0 %v360_v12  ;;  %328 = vmatprep.mubr.bf16.mxu1 %v361_v13 }
  0x2a   :  { %321 = vmatmul.mubr.bf16.gmra.mxu0 %v362_v14  ;;  %329 = vmatmul.mubr.bf16.gmra.mxu1 %v363_v15 }
  0xe2   :  { %v318_v17 = vpop.f32.mrf.mxu0  ;;  %v326_v18 = vpop.f32.mrf.mxu1 }
  0xe3   :  { %v193_v19 = vadd.f32 %v318_v17, %v267_v16  ;;  %v225_v20 = vadd.f32 %v326_v18, %v267_v16 }
  0xe4   :  { %v184_v21 = vpop.f32.mrf.mxu0  ;;  %v216_v22 = vpop.f32.mrf.mxu1 }
  0xe5   :  { %249 = vst [vmem:[%s486_s3 + $0x10] sm:$0xff] %v193_v19  ;;  %257 = vst [vmem:[%s486_s3 + $0x50] sm:$0xff] %v225_v20  ;;  %v185_v23 = vadd.f32 %v267_v16, %v184_v21  ;;  %v217_v24 = vadd.f32 %v267_v16, %v216_v22 }
  0xe6   :  { %v319_v25 = vpop.f32.mrf.mxu0  ;;  %v327_v26 = vpop.f32.mrf.mxu1 }
  0xe7   :  { %247 = vst [vmem:[%s486_s3] sm:$0xff] %v185_v23  ;;  %255 = vst [vmem:[%s486_s3 + $0x40] sm:$0xff] %v217_v24  ;;  %v196_v27 = vadd.f32 %v319_v25, %v267_v16  ;;  %v228_v28 = vadd.f32 %v327_v26, %v267_v16 }
  0xe8   :  { %v187_v29 = vpop.f32.mrf.mxu0  ;;  %v219_v30 = vpop.f32.mrf.mxu1 }
  0xe9   :  { %250 = vst [vmem:[%s486_s3 + $0x18] sm:$0xff] %v196_v27  ;;  %258 = vst [vmem:[%s486_s3 + $0x58] sm:$0xff] %v228_v28  ;;  %v188_v31 = vadd.f32 %v267_v16, %v187_v29  ;;  %v220_v32 = vadd.f32 %v267_v16, %v219_v30 }
  0xea   :  { %v322_v33 = vpop.f32.mrf.mxu0  ;;  %v330_v34 = vpop.f32.mrf.mxu1 }
  0xeb   :  { %248 = vst [vmem:[%s486_s3 + $0x8] sm:$0xff] %v188_v31  ;;  %256 = vst [vmem:[%s486_s3 + $0x48] sm:$0xff] %v220_v32  ;;  %v209_v35 = vadd.f32 %v322_v33, %v267_v16  ;;  %v241_v36 = vadd.f32 %v330_v34, %v267_v16 }
  0xec   :  { %v200_v37 = vpop.f32.mrf.mxu0  ;;  %v232_v38 = vpop.f32.mrf.mxu1 }
  0xed   :  { %253 = vst [vmem:[%s486_s3 + $0x30] sm:$0xff] %v209_v35  ;;  %261 = vst [vmem:[%s486_s3 + $0x70] sm:$0xff] %v241_v36  ;;  %v201_v39 = vadd.f32 %v267_v16, %v200_v37  ;;  %v233_v40 = vadd.f32 %v267_v16, %v232_v38 }
  0xee   :  { %v323_v41 = vpop.f32.mrf.mxu0  ;;  %v331_v42 = vpop.f32.mrf.mxu1 }
  0xef   :  { %251 = vst [vmem:[%s486_s3 + $0x20] sm:$0xff] %v201_v39  ;;  %259 = vst [vmem:[%s486_s3 + $0x60] sm:$0xff] %v233_v40  ;;  %v212_v43 = vadd.f32 %v323_v41, %v267_v16  ;;  %v244_v44 = vadd.f32 %v331_v42, %v267_v16 }
  0xf0   :  { %v203_v45 = vpop.f32.mrf.mxu0  ;;  %v235_v46 = vpop.f32.mrf.mxu1 }
  0xf1   :  { %254 = vst [vmem:[%s486_s3 + $0x38] sm:$0xff] %v212_v43  ;;  %262 = vst [vmem:[%s486_s3 + $0x78] sm:$0xff] %v244_v44  ;;  %v204_v47 = vadd.f32 %v267_v16, %v203_v45  ;;  %v236_v48 = vadd.f32 %v267_v16, %v235_v46 }
  0xf3   :  { %252 = vst [vmem:[%s486_s3 + $0x28] sm:$0xff] %v204_v47  ;;  %260 = vst [vmem:[%s486_s3 + $0x68] sm:$0xff] %v236_v48 }

</bundles_post_ra>
